<compile_context>
chip_gen: v7x
topology: tpu7x:2x2x1
jax: 0.10.0
libtpu: 0.0.40
codegen_flags: <defaults>
</compile_context>

<pallas_src>
import functools

import jax
import jax.numpy as jnp
from jax.experimental import pallas as pl
from jax.experimental.pallas import tpu as pltpu


# ---------------------------------------------------------------------------
# In-kernel helpers
# ---------------------------------------------------------------------------
def _shift_lanes(a, off):
    """s[:, j] = a[:, j + off] with zero fill (off is a static Python int)."""
    if off == 0:
        return a
    c, m = a.shape
    if off > 0:
        return jnp.concatenate([a[:, off:], jnp.zeros((c, off), a.dtype)], axis=1)
    off = -off
    return jnp.concatenate([jnp.zeros((c, off), a.dtype), a[:, : m - off]], axis=1)


def _spatial_positions(m, h, w):
    """(x, y) position of every lane of an (n, y, x)-flattened axis of length m."""
    flat = jax.lax.broadcasted_iota(jnp.int32, (1, m), 1)
    if (w & (w - 1)) == 0 and (h & (h - 1)) == 0:   # powers of two (always here)
        xpos = jnp.bitwise_and(flat, w - 1)
        ypos = jnp.bitwise_and(flat >> (w.bit_length() - 1), h - 1)
    else:
        xpos = flat % w
        ypos = (flat // w) % h
    return xpos, ypos


# ---------------------------------------------------------------------------
# Kernel 1: ConvTranspose2d(nz, C, 4, 1, 0) on a 1x1 input, fused with
# BatchNorm2d (batch stats) + ReLU.
#   x_ref : (N, nz)       bf16
#   w_ref : (nz, 16*C)    bf16, columns ordered (ky, kx, co)
#   g_ref : (1, C)  f32   BN gamma
#   b_ref : (1, C)  f32   BN beta
#   o_ref : (N, 16*C) f32 rows n, columns (ky, kx, co)   (lane-dense: 16*C)
# ---------------------------------------------------------------------------
def _head_convt_bn_relu_kernel(x_ref, w_ref, g_ref, b_ref, o_ref, *, C, eps):
    y = jnp.dot(x_ref[...], w_ref[...], preferred_element_type=jnp.float32)
    n_rows = y.shape[0]
    ssum = jnp.zeros((1, C), jnp.float32)
    ssq = jnp.zeros((1, C), jnp.float32)
    for g in range(16):                     # per-channel stats over (n, ky, kx)
        blk = y[:, g * C:(g + 1) * C]
        ssum = ssum + jnp.sum(blk, axis=0, keepdims=True)
        ssq = ssq + jnp.sum(blk * blk, axis=0, keepdims=True)
    cnt = float(16 * n_rows)
    mean = ssum / cnt
    var = ssq / cnt - mean * mean           # biased (training-mode) variance
    scale = jax.lax.rsqrt(var + eps) * g_ref[...]
    shift = b_ref[...] - mean * scale
    scale_full = jnp.concatenate([scale] * 16, axis=1)
    shift_full = jnp.concatenate([shift] * 16, axis=1)
    o_ref[...] = jnp.maximum(y * scale_full + shift_full, 0.0)


# ---------------------------------------------------------------------------
# Kernel 2: ConvTranspose2d(Cin, Cout, 4, 2, 1) via the 4-output-phase
# decomposition, fused with optional BatchNorm2d (batch stats) + ReLU / Tanh.
#   a_ref : (Cin, M)          bf16, M = N*H*W flattened (n, y, x)
#   w_ref : (4, 4, Cout, Cin) bf16, [phase, tap] -> W[:, :, ky, kx]^T
#   g_ref : (Cout, 1) f32  (only if has_bn)
#   b_ref : (Cout, 1) f32  (only if has_bn)
#   o_ref : (4, Cout, M) f32  per-phase output (lane-dense: M on lanes)
# ---------------------------------------------------------------------------
def _convt_phase_kernel(*refs, H, W, eps, has_bn, act):
    if has_bn:
        a_ref, w_ref, g_ref, b_ref, o_ref = refs
    else:
        a_ref, w_ref, o_ref = refs
    a = a_ref[...]
    cin, m = a.shape
    cout = o_ref.shape[1]
    xpos, ypos = _spatial_positions(m, H, W)

    # Shifted + boundary-masked copies of the input, one per distinct offset.
    taps = {}

    def tap_input(dy, dx):
        if (dy, dx) not in taps:
            s = _shift_lanes(a, dy * W + dx)
            if dy != 0 or dx != 0:
                valid = ((xpos + dx >= 0) & (xpos + dx < W) &
                         (ypos + dy >= 0) & (ypos + dy < H))
                s = s * valid.astype(s.dtype)
            taps[(dy, dx)] = s
        return taps[(dy, dx)]

    phase_out = []
    for p in range(4):                       # output phase (py, px)
        py, px = p // 2, p % 2
        acc = jnp.zeros((cout, m), jnp.float32)
        for t in range(4):                   # 2x2 taps of the sub-convolution
            ty, tx = t // 2, t % 2
            dy, dx = ty - 1 + py, tx - 1 + px
            acc = acc + jnp.dot(w_ref[p, t], tap_input(dy, dx),
                                preferred_element_type=jnp.float32)
        phase_out.append(acc)

    if has_bn:                               # stats over all 4*M output positions
        cnt = float(4 * m)
        ssum = jnp.zeros((cout, 1), jnp.float32)
        ssq = jnp.zeros((cout, 1), jnp.float32)
        for po in phase_out:
            ssum = ssum + jnp.sum(po, axis=1, keepdims=True)
            ssq = ssq + jnp.sum(po * po, axis=1, keepdims=True)
        mean = ssum / cnt
        var = ssq / cnt - mean * mean        # biased (training-mode) variance
        scale = jax.lax.rsqrt(var + eps) * g_ref[...]
        shift = b_ref[...] - mean * scale
        phase_out = [po * scale + shift for po in phase_out]

    for p in range(4):
        po = phase_out[p]
        if act == "relu":
            po = jnp.maximum(po, 0.0)
        elif act == "tanh":
            po = jnp.tanh(po)
        o_ref[p, :, :] = po


# ---------------------------------------------------------------------------
# Host-side wrappers: weight packing, pallas_call plumbing, phase interleave
# ---------------------------------------------------------------------------
_VMEM = pl.BlockSpec(memory_space=pltpu.MemorySpace.VMEM)


def head_convt_bn_relu(x2, w, gamma, beta, eps=1e-5):
    """ConvTranspose2d(nz, C, 4, 1, 0) on 1x1 input + BN + ReLU.

    x2: (N, nz) f32; w: (nz, C, 4, 4). Returns (C, N*16) f32, flat (n, ky, kx).
    """
    n, nz = x2.shape
    c = w.shape[1]
    wpack = jnp.transpose(w, (0, 2, 3, 1)).reshape(nz, 16 * c)  # cols (ky,kx,co)
    kernel = functools.partial(_head_convt_bn_relu_kernel, C=c, eps=eps)
    cost = pl.CostEstimate(flops=2 * n * nz * 16 * c, transcendentals=0,
                           bytes_accessed=(n * nz + nz * 16 * c) * 2 + n * 16 * c * 4)
    y = pl.pallas_call(
        kernel,
        out_shape=jax.ShapeDtypeStruct((n, 16 * c), jnp.float32),
        in_specs=[_VMEM] * 4,
        out_specs=_VMEM,
        cost_estimate=cost,
    )(x2.astype(jnp.bfloat16), wpack.astype(jnp.bfloat16),
      gamma.reshape(1, c).astype(jnp.float32),
      beta.reshape(1, c).astype(jnp.float32))
    # (N, 4, 4, C) -> (C, N*16): channels-major with the spatial axis on lanes.
    return jnp.transpose(y.reshape(n, 4, 4, c), (3, 0, 1, 2)).reshape(c, n * 16)


def _pack_phase_weights(w):
    """(Cin, Cout, 4, 4) ConvTranspose2d weight -> (4 phases, 4 taps, Cout, Cin)."""
    mats = []
    for py in range(2):
        for px in range(2):
            row = []
            for ty in range(2):
                for tx in range(2):
                    ky = 3 - 2 * ty - py
                    kx = 3 - 2 * tx - px
                    row.append(jnp.transpose(w[:, :, ky, kx]))   # (Cout, Cin)
            mats.append(jnp.stack(row))
    return jnp.stack(mats)


def convt_phase_layer(a, w, gamma, beta, n, h, w_sp, act, eps=1e-5,
                      batch_grid=False):
    """Stride-2 ConvTranspose2d (+BN) (+act) on a (Cin, N*H*W) activation.

    Returns (4, Cout, N*H*W): per-output-phase results (interleave afterwards).
    """
    cin, cout = w.shape[0], w.shape[1]
    m = n * h * w_sp
    assert a.shape == (cin, m)
    wpack = _pack_phase_weights(w).astype(jnp.bfloat16)
    has_bn = gamma is not None
    kernel = functools.partial(_convt_phase_kernel, H=h, W=w_sp, eps=eps,
                               has_bn=has_bn, act=act)
    args = [a.astype(jnp.bfloat16), wpack]
    if has_bn:
        args += [gamma.reshape(cout, 1).astype(jnp.float32),
                 beta.reshape(cout, 1).astype(jnp.float32)]
    cost = pl.CostEstimate(
        flops=2 * 16 * cout * cin * m,
        transcendentals=4 * cout * m if act == "tanh" else 0,
        bytes_accessed=(cin * m + 16 * cout * cin) * 2 + 4 * cout * m * 4)
    out_shape = jax.ShapeDtypeStruct((4, cout, m), jnp.float32)

    hw = h * w_sp
    if batch_grid and not has_bn and n > 1 and hw % 128 == 0:
        # Images are independent (no BN coupling) -> grid over the batch,
        # marked 'parallel' so it shards across TensorCores on megacore parts.
        return pl.pallas_call(
            kernel,
            out_shape=out_shape,
            grid=(n,),
            in_specs=[pl.BlockSpec((cin, hw), lambda i: (0, i)),
                      pl.BlockSpec((4, 4, cout, cin), lambda i: (0, 0, 0, 0))],
            out_specs=pl.BlockSpec((4, cout, hw), lambda i: (0, 0, i)),
            compiler_params=pltpu.CompilerParams(
                dimension_semantics=("parallel",)),
            cost_estimate=cost,
        )(*args)

    return pl.pallas_call(
        kernel,
        out_shape=out_shape,
        in_specs=[_VMEM] * len(args),
        out_specs=_VMEM,
        cost_estimate=cost,
    )(*args)


def _interleave_phases(o, n, h, w):
    """(4, C, N*H*W) per-phase outputs -> (C, N*(2H)*(2W)), flat (n, y, x)."""
    c = o.shape[1]
    o = o.reshape(2, 2, c, n, h, w)                 # (py, px, c, n, y, x)
    o = jnp.transpose(o, (2, 3, 4, 0, 5, 1))        # (c, n, y, py, x, px)
    return o.reshape(c, n * (2 * h) * (2 * w))


# ---------------------------------------------------------------------------
# Parameters (weights_init: ConvTranspose weights ~ N(0, 0.02), bias=False;
# BN weight ~ N(1, 0.02), BN bias = 0).
# ---------------------------------------------------------------------------
def init_params(key, nz, ngf):
    c1, c2, c3, c4 = ngf // 2, ngf // 4, ngf // 8, 100
    ks = jax.random.split(key, 7)

    def nrm(k, shape, mean=0.0, std=0.02):
        return mean + std * jax.random.normal(k, shape, jnp.float32)

    return {
        "w1": nrm(ks[0], (nz, c1, 4, 4)),
        "bn1_g": nrm(ks[1], (c1,), 1.0, 0.02), "bn1_b": jnp.zeros((c1,), jnp.float32),
        "w2": nrm(ks[2], (c1, c2, 4, 4)),
        "bn2_g": nrm(ks[3], (c2,), 1.0, 0.02), "bn2_b": jnp.zeros((c2,), jnp.float32),
        "w3": nrm(ks[4], (c2, c3, 4, 4)),
        "bn3_g": nrm(ks[5], (c3,), 1.0, 0.02), "bn3_b": jnp.zeros((c3,), jnp.float32),
        "w4": nrm(ks[6], (c3, c4, 4, 4)),
    }


# ---------------------------------------------------------------------------
# Forward pass (== _netG1.forward, training-mode BatchNorm)
# ---------------------------------------------------------------------------
def netg1_forward(params, x, eps=1e-5):
    if x.ndim == 4:
        assert x.shape[2] == 1 and x.shape[3] == 1
        x2 = x.reshape(x.shape[0], x.shape[1])
    else:
        x2 = x
    n = x2.shape[0]

    # ConvTranspose2d(nz, ngf//2, 4, 1, 0) + BN + ReLU            1x1 -> 4x4
    a = head_convt_bn_relu(x2, params["w1"], params["bn1_g"], params["bn1_b"], eps)
    h = w = 4

    # ConvTranspose2d(ngf//2, ngf//4, 4, 2, 1) + BN + ReLU        4x4 -> 8x8
    o = convt_phase_layer(a, params["w2"], params["bn2_g"], params["bn2_b"],
                          n, h, w, act="relu", eps=eps)
    a = _interleave_phases(o, n, h, w)
    h, w = 2 * h, 2 * w

    # ConvTranspose2d(ngf//4, ngf//8, 4, 2, 1) + BN + ReLU        8x8 -> 16x16
    o = convt_phase_layer(a, params["w3"], params["bn3_g"], params["bn3_b"],
                          n, h, w, act="relu", eps=eps)
    a = _interleave_phases(o, n, h, w)
    h, w = 2 * h, 2 * w

    # ConvTranspose2d(ngf//8, 100, 4, 2, 1) + Tanh               16x16 -> 32x32
    o = convt_phase_layer(a, params["w4"], None, None,
                          n, h, w, act="tanh", eps=eps, batch_grid=True)
    a = _interleave_phases(o, n, h, w)
    h, w = 2 * h, 2 * w

    c_out = params["w4"].shape[1]
    return jnp.transpose(a.reshape(c_out, n, h, w), (1, 0, 2, 3))   # NCHW


# ---------------------------------------------------------------------------
# Plain-JAX reference (for a numerical cross-check only)
# ---------------------------------------------------------------------------
def _ref_convt(x, w, stride, pad):
    k = w.shape[2]
    wt = jnp.transpose(w, (1, 0, 2, 3))[:, :, ::-1, ::-1]      # (Cout, Cin, kh, kw)
    return jax.lax.conv_general_dilated(
        x, wt, window_strides=(1, 1),
        padding=[(k - 1 - pad, k - 1 - pad)] * 2,
        lhs_dilation=(stride, stride),
        dimension_numbers=("NCHW", "OIHW", "NCHW"))


def _ref_bn(x, g, b, eps=1e-5):
    mean = jnp.mean(x, axis=(0, 2, 3), keepdims=True)
    var = jnp.mean(jnp.square(x - mean), axis=(0, 2, 3), keepdims=True)
    return ((x - mean) * jax.lax.rsqrt(var + eps) * g.reshape(1, -1, 1, 1)
            + b.reshape(1, -1, 1, 1))


def netg1_reference(params, x, eps=1e-5):
    if x.ndim == 2:
        x = x.reshape(x.shape[0], x.shape[1], 1, 1)
    y = _ref_convt(x, params["w1"], 1, 0)
    y = jnp.maximum(_ref_bn(y, params["bn1_g"], params["bn1_b"], eps), 0.0)
    y = _ref_convt(y, params["w2"], 2, 1)
    y = jnp.maximum(_ref_bn(y, params["bn2_g"], params["bn2_b"], eps), 0.0)
    y = _ref_convt(y, params["w3"], 2, 1)
    y = jnp.maximum(_ref_bn(y, params["bn3_g"], params["bn3_b"], eps), 0.0)
    y = _ref_convt(y, params["w4"], 2, 1)
    return jnp.tanh(y)


# ---------------------------------------------------------------------------
if __name__ == "__main__":
    nz, ngf, batch = 32, 64, 2
    key = jax.random.PRNGKey(0)
    k_param, k_x = jax.random.split(key)
    params = init_params(k_param, nz, ngf)
    x = jax.random.normal(k_x, (batch, nz, 1, 1), jnp.float32)

    fwd = jax.jit(netg1_forward)
    out = jax.block_until_ready(fwd(params, x))

    assert out.shape == (batch, 100, 32, 32), out.shape
    assert out.dtype == jnp.float32
    assert bool(jnp.all(jnp.isfinite(out)))
    assert bool(jnp.all(jnp.abs(out) <= 1.0))           # tanh output range

    # Cross-check against a plain-JAX/XLA reference of the same module
    # (bf16 MXU inputs in the Pallas path -> loose tolerance).
    ref = jax.jit(netg1_reference)(params, x)
    max_err = float(jnp.max(jnp.abs(out - ref)))
    assert max_err < 5e-2, f"max |pallas - reference| = {max_err}"

    print("KERNEL_OK")
</pallas_src>

<mosaic_0001>
module attributes {stable_mosaic.version = 11 : i64} {
  func.func @_head_convt_bn_relu_kernel(%arg0: memref<2x32xbf16, #tpu.memory_space<vmem>>, %arg1: memref<32x512xbf16, #tpu.memory_space<vmem>>, %arg2: memref<1x32xf32, #tpu.memory_space<vmem>>, %arg3: memref<1x32xf32, #tpu.memory_space<vmem>>, %arg4: memref<2x512xf32, #tpu.memory_space<vmem>>) attributes {dimension_semantics = [], scalar_prefetch = 0 : i64, scratch_operands = 0 : i64, tpu.core_type = #tpu.core_type<tc>} {
    %c0 = arith.constant 0 : index
    %c0_0 = arith.constant 0 : index
    %0 = vector.load %arg0[%c0, %c0_0] : memref<2x32xbf16, #tpu.memory_space<vmem>>, vector<2x32xbf16>
    %c0_1 = arith.constant 0 : index
    %c0_2 = arith.constant 0 : index
    %1 = vector.load %arg1[%c0_1, %c0_2] : memref<32x512xbf16, #tpu.memory_space<vmem>>, vector<32x512xbf16>
    %cst = arith.constant dense<0.000000e+00> : vector<2x512xf32>
    %2 = tpu.matmul %0, %1, %cst {dimension_numbers = #tpu.dot_dimension_numbers<[1], [0], [0], [1], [0, 0, 1, 1], [], []>} : vector<2x32xbf16>, vector<32x512xbf16>, vector<2x512xf32> -> vector<2x512xf32>
    %cst_3 = arith.constant 0.000000e+00 : f32
    %3 = vector.broadcast %cst_3 : f32 to vector<1x32xf32>
    %cst_4 = arith.constant 0.000000e+00 : f32
    %4 = vector.broadcast %cst_4 : f32 to vector<1x32xf32>
    %5 = vector.extract_strided_slice %2 {offsets = [0, 0], sizes = [2, 32], strides = [1, 1]} : vector<2x512xf32> to vector<2x32xf32>
    %cst_5 = arith.constant dense<0.000000e+00> : vector<32xf32>
    %6 = vector.multi_reduction <add>, %5, %cst_5 [0] : vector<2x32xf32> to vector<32xf32>
    %7 = vector.shape_cast %6 : vector<32xf32> to vector<1x32xf32>
    %8 = arith.addf %3, %7 : vector<1x32xf32>
    %9 = arith.mulf %5, %5 : vector<2x32xf32>
    %cst_6 = arith.constant dense<0.000000e+00> : vector<32xf32>
    %10 = vector.multi_reduction <add>, %9, %cst_6 [0] : vector<2x32xf32> to vector<32xf32>
    %11 = vector.shape_cast %10 : vector<32xf32> to vector<1x32xf32>
    %12 = arith.addf %4, %11 : vector<1x32xf32>
    %13 = vector.extract_strided_slice %2 {offsets = [0, 32], sizes = [2, 32], strides = [1, 1]} : vector<2x512xf32> to vector<2x32xf32>
    %cst_7 = arith.constant dense<0.000000e+00> : vector<32xf32>
    %14 = vector.multi_reduction <add>, %13, %cst_7 [0] : vector<2x32xf32> to vector<32xf32>
    %15 = vector.shape_cast %14 : vector<32xf32> to vector<1x32xf32>
    %16 = arith.addf %8, %15 : vector<1x32xf32>
    %17 = arith.mulf %13, %13 : vector<2x32xf32>
    %cst_8 = arith.constant dense<0.000000e+00> : vector<32xf32>
    %18 = vector.multi_reduction <add>, %17, %cst_8 [0] : vector<2x32xf32> to vector<32xf32>
    %19 = vector.shape_cast %18 : vector<32xf32> to vector<1x32xf32>
    %20 = arith.addf %12, %19 : vector<1x32xf32>
    %21 = vector.extract_strided_slice %2 {offsets = [0, 64], sizes = [2, 32], strides = [1, 1]} : vector<2x512xf32> to vector<2x32xf32>
    %cst_9 = arith.constant dense<0.000000e+00> : vector<32xf32>
    %22 = vector.multi_reduction <add>, %21, %cst_9 [0] : vector<2x32xf32> to vector<32xf32>
    %23 = vector.shape_cast %22 : vector<32xf32> to vector<1x32xf32>
    %24 = arith.addf %16, %23 : vector<1x32xf32>
    %25 = arith.mulf %21, %21 : vector<2x32xf32>
    %cst_10 = arith.constant dense<0.000000e+00> : vector<32xf32>
    %26 = vector.multi_reduction <add>, %25, %cst_10 [0] : vector<2x32xf32> to vector<32xf32>
    %27 = vector.shape_cast %26 : vector<32xf32> to vector<1x32xf32>
    %28 = arith.addf %20, %27 : vector<1x32xf32>
    %29 = vector.extract_strided_slice %2 {offsets = [0, 96], sizes = [2, 32], strides = [1, 1]} : vector<2x512xf32> to vector<2x32xf32>
    %cst_11 = arith.constant dense<0.000000e+00> : vector<32xf32>
    %30 = vector.multi_reduction <add>, %29, %cst_11 [0] : vector<2x32xf32> to vector<32xf32>
    %31 = vector.shape_cast %30 : vector<32xf32> to vector<1x32xf32>
    %32 = arith.addf %24, %31 : vector<1x32xf32>
    %33 = arith.mulf %29, %29 : vector<2x32xf32>
    %cst_12 = arith.constant dense<0.000000e+00> : vector<32xf32>
    %34 = vector.multi_reduction <add>, %33, %cst_12 [0] : vector<2x32xf32> to vector<32xf32>
    %35 = vector.shape_cast %34 : vector<32xf32> to vector<1x32xf32>
    %36 = arith.addf %28, %35 : vector<1x32xf32>
    %37 = vector.extract_strided_slice %2 {offsets = [0, 128], sizes = [2, 32], strides = [1, 1]} : vector<2x512xf32> to vector<2x32xf32>
    %cst_13 = arith.constant dense<0.000000e+00> : vector<32xf32>
    %38 = vector.multi_reduction <add>, %37, %cst_13 [0] : vector<2x32xf32> to vector<32xf32>
    %39 = vector.shape_cast %38 : vector<32xf32> to vector<1x32xf32>
    %40 = arith.addf %32, %39 : vector<1x32xf32>
    %41 = arith.mulf %37, %37 : vector<2x32xf32>
    %cst_14 = arith.constant dense<0.000000e+00> : vector<32xf32>
    %42 = vector.multi_reduction <add>, %41, %cst_14 [0] : vector<2x32xf32> to vector<32xf32>
    %43 = vector.shape_cast %42 : vector<32xf32> to vector<1x32xf32>
    %44 = arith.addf %36, %43 : vector<1x32xf32>
    %45 = vector.extract_strided_slice %2 {offsets = [0, 160], sizes = [2, 32], strides = [1, 1]} : vector<2x512xf32> to vector<2x32xf32>
    %cst_15 = arith.constant dense<0.000000e+00> : vector<32xf32>
    %46 = vector.multi_reduction <add>, %45, %cst_15 [0] : vector<2x32xf32> to vector<32xf32>
    %47 = vector.shape_cast %46 : vector<32xf32> to vector<1x32xf32>
    %48 = arith.addf %40, %47 : vector<1x32xf32>
    %49 = arith.mulf %45, %45 : vector<2x32xf32>
    %cst_16 = arith.constant dense<0.000000e+00> : vector<32xf32>
    %50 = vector.multi_reduction <add>, %49, %cst_16 [0] : vector<2x32xf32> to vector<32xf32>
    %51 = vector.shape_cast %50 : vector<32xf32> to vector<1x32xf32>
    %52 = arith.addf %44, %51 : vector<1x32xf32>
    %53 = vector.extract_strided_slice %2 {offsets = [0, 192], sizes = [2, 32], strides = [1, 1]} : vector<2x512xf32> to vector<2x32xf32>
    %cst_17 = arith.constant dense<0.000000e+00> : vector<32xf32>
    %54 = vector.multi_reduction <add>, %53, %cst_17 [0] : vector<2x32xf32> to vector<32xf32>
    %55 = vector.shape_cast %54 : vector<32xf32> to vector<1x32xf32>
    %56 = arith.addf %48, %55 : vector<1x32xf32>
    %57 = arith.mulf %53, %53 : vector<2x32xf32>
    %cst_18 = arith.constant dense<0.000000e+00> : vector<32xf32>
    %58 = vector.multi_reduction <add>, %57, %cst_18 [0] : vector<2x32xf32> to vector<32xf32>
    %59 = vector.shape_cast %58 : vector<32xf32> to vector<1x32xf32>
    %60 = arith.addf %52, %59 : vector<1x32xf32>
    %61 = vector.extract_strided_slice %2 {offsets = [0, 224], sizes = [2, 32], strides = [1, 1]} : vector<2x512xf32> to vector<2x32xf32>
    %cst_19 = arith.constant dense<0.000000e+00> : vector<32xf32>
    %62 = vector.multi_reduction <add>, %61, %cst_19 [0] : vector<2x32xf32> to vector<32xf32>
    %63 = vector.shape_cast %62 : vector<32xf32> to vector<1x32xf32>
    %64 = arith.addf %56, %63 : vector<1x32xf32>
    %65 = arith.mulf %61, %61 : vector<2x32xf32>
    %cst_20 = arith.constant dense<0.000000e+00> : vector<32xf32>
    %66 = vector.multi_reduction <add>, %65, %cst_20 [0] : vector<2x32xf32> to vector<32xf32>
    %67 = vector.shape_cast %66 : vector<32xf32> to vector<1x32xf32>
    %68 = arith.addf %60, %67 : vector<1x32xf32>
    %69 = vector.extract_strided_slice %2 {offsets = [0, 256], sizes = [2, 32], strides = [1, 1]} : vector<2x512xf32> to vector<2x32xf32>
    %cst_21 = arith.constant dense<0.000000e+00> : vector<32xf32>
    %70 = vector.multi_reduction <add>, %69, %cst_21 [0] : vector<2x32xf32> to vector<32xf32>
    %71 = vector.shape_cast %70 : vector<32xf32> to vector<1x32xf32>
    %72 = arith.addf %64, %71 : vector<1x32xf32>
    %73 = arith.mulf %69, %69 : vector<2x32xf32>
    %cst_22 = arith.constant dense<0.000000e+00> : vector<32xf32>
    %74 = vector.multi_reduction <add>, %73, %cst_22 [0] : vector<2x32xf32> to vector<32xf32>
    %75 = vector.shape_cast %74 : vector<32xf32> to vector<1x32xf32>
    %76 = arith.addf %68, %75 : vector<1x32xf32>
    %77 = vector.extract_strided_slice %2 {offsets = [0, 288], sizes = [2, 32], strides = [1, 1]} : vector<2x512xf32> to vector<2x32xf32>
    %cst_23 = arith.constant dense<0.000000e+00> : vector<32xf32>
    %78 = vector.multi_reduction <add>, %77, %cst_23 [0] : vector<2x32xf32> to vector<32xf32>
    %79 = vector.shape_cast %78 : vector<32xf32> to vector<1x32xf32>
    %80 = arith.addf %72, %79 : vector<1x32xf32>
    %81 = arith.mulf %77, %77 : vector<2x32xf32>
    %cst_24 = arith.constant dense<0.000000e+00> : vector<32xf32>
    %82 = vector.multi_reduction <add>, %81, %cst_24 [0] : vector<2x32xf32> to vector<32xf32>
    %83 = vector.shape_cast %82 : vector<32xf32> to vector<1x32xf32>
    %84 = arith.addf %76, %83 : vector<1x32xf32>
    %85 = vector.extract_strided_slice %2 {offsets = [0, 320], sizes = [2, 32], strides = [1, 1]} : vector<2x512xf32> to vector<2x32xf32>
    %cst_25 = arith.constant dense<0.000000e+00> : vector<32xf32>
    %86 = vector.multi_reduction <add>, %85, %cst_25 [0] : vector<2x32xf32> to vector<32xf32>
    %87 = vector.shape_cast %86 : vector<32xf32> to vector<1x32xf32>
    %88 = arith.addf %80, %87 : vector<1x32xf32>
    %89 = arith.mulf %85, %85 : vector<2x32xf32>
    %cst_26 = arith.constant dense<0.000000e+00> : vector<32xf32>
    %90 = vector.multi_reduction <add>, %89, %cst_26 [0] : vector<2x32xf32> to vector<32xf32>
    %91 = vector.shape_cast %90 : vector<32xf32> to vector<1x32xf32>
    %92 = arith.addf %84, %91 : vector<1x32xf32>
    %93 = vector.extract_strided_slice %2 {offsets = [0, 352], sizes = [2, 32], strides = [1, 1]} : vector<2x512xf32> to vector<2x32xf32>
    %cst_27 = arith.constant dense<0.000000e+00> : vector<32xf32>
    %94 = vector.multi_reduction <add>, %93, %cst_27 [0] : vector<2x32xf32> to vector<32xf32>
    %95 = vector.shape_cast %94 : vector<32xf32> to vector<1x32xf32>
    %96 = arith.addf %88, %95 : vector<1x32xf32>
    %97 = arith.mulf %93, %93 : vector<2x32xf32>
    %cst_28 = arith.constant dense<0.000000e+00> : vector<32xf32>
    %98 = vector.multi_reduction <add>, %97, %cst_28 [0] : vector<2x32xf32> to vector<32xf32>
    %99 = vector.shape_cast %98 : vector<32xf32> to vector<1x32xf32>
    %100 = arith.addf %92, %99 : vector<1x32xf32>
    %101 = vector.extract_strided_slice %2 {offsets = [0, 384], sizes = [2, 32], strides = [1, 1]} : vector<2x512xf32> to vector<2x32xf32>
    %cst_29 = arith.constant dense<0.000000e+00> : vector<32xf32>
    %102 = vector.multi_reduction <add>, %101, %cst_29 [0] : vector<2x32xf32> to vector<32xf32>
    %103 = vector.shape_cast %102 : vector<32xf32> to vector<1x32xf32>
    %104 = arith.addf %96, %103 : vector<1x32xf32>
    %105 = arith.mulf %101, %101 : vector<2x32xf32>
    %cst_30 = arith.constant dense<0.000000e+00> : vector<32xf32>
    %106 = vector.multi_reduction <add>, %105, %cst_30 [0] : vector<2x32xf32> to vector<32xf32>
    %107 = vector.shape_cast %106 : vector<32xf32> to vector<1x32xf32>
    %108 = arith.addf %100, %107 : vector<1x32xf32>
    %109 = vector.extract_strided_slice %2 {offsets = [0, 416], sizes = [2, 32], strides = [1, 1]} : vector<2x512xf32> to vector<2x32xf32>
    %cst_31 = arith.constant dense<0.000000e+00> : vector<32xf32>
    %110 = vector.multi_reduction <add>, %109, %cst_31 [0] : vector<2x32xf32> to vector<32xf32>
    %111 = vector.shape_cast %110 : vector<32xf32> to vector<1x32xf32>
    %112 = arith.addf %104, %111 : vector<1x32xf32>
    %113 = arith.mulf %109, %109 : vector<2x32xf32>
    %cst_32 = arith.constant dense<0.000000e+00> : vector<32xf32>
    %114 = vector.multi_reduction <add>, %113, %cst_32 [0] : vector<2x32xf32> to vector<32xf32>
    %115 = vector.shape_cast %114 : vector<32xf32> to vector<1x32xf32>
    %116 = arith.addf %108, %115 : vector<1x32xf32>
    %117 = vector.extract_strided_slice %2 {offsets = [0, 448], sizes = [2, 32], strides = [1, 1]} : vector<2x512xf32> to vector<2x32xf32>
    %cst_33 = arith.constant dense<0.000000e+00> : vector<32xf32>
    %118 = vector.multi_reduction <add>, %117, %cst_33 [0] : vector<2x32xf32> to vector<32xf32>
    %119 = vector.shape_cast %118 : vector<32xf32> to vector<1x32xf32>
    %120 = arith.addf %112, %119 : vector<1x32xf32>
    %121 = arith.mulf %117, %117 : vector<2x32xf32>
    %cst_34 = arith.constant dense<0.000000e+00> : vector<32xf32>
    %122 = vector.multi_reduction <add>, %121, %cst_34 [0] : vector<2x32xf32> to vector<32xf32>
    %123 = vector.shape_cast %122 : vector<32xf32> to vector<1x32xf32>
    %124 = arith.addf %116, %123 : vector<1x32xf32>
    %125 = vector.extract_strided_slice %2 {offsets = [0, 480], sizes = [2, 32], strides = [1, 1]} : vector<2x512xf32> to vector<2x32xf32>
    %cst_35 = arith.constant dense<0.000000e+00> : vector<32xf32>
    %126 = vector.multi_reduction <add>, %125, %cst_35 [0] : vector<2x32xf32> to vector<32xf32>
    %127 = vector.shape_cast %126 : vector<32xf32> to vector<1x32xf32>
    %128 = arith.addf %120, %127 : vector<1x32xf32>
    %129 = arith.mulf %125, %125 : vector<2x32xf32>
    %cst_36 = arith.constant dense<0.000000e+00> : vector<32xf32>
    %130 = vector.multi_reduction <add>, %129, %cst_36 [0] : vector<2x32xf32> to vector<32xf32>
    %131 = vector.shape_cast %130 : vector<32xf32> to vector<1x32xf32>
    %132 = arith.addf %124, %131 : vector<1x32xf32>
    %cst_37 = arith.constant 3.200000e+01 : f32
    %133 = vector.broadcast %cst_37 : f32 to vector<1x32xf32>
    %134 = arith.divf %128, %133 : vector<1x32xf32>
    %cst_38 = arith.constant 3.200000e+01 : f32
    %135 = vector.broadcast %cst_38 : f32 to vector<1x32xf32>
    %136 = arith.divf %132, %135 : vector<1x32xf32>
    %137 = arith.mulf %134, %134 : vector<1x32xf32>
    %138 = arith.subf %136, %137 : vector<1x32xf32>
    %cst_39 = arith.constant 9.99999974E-6 : f32
    %139 = vector.broadcast %cst_39 : f32 to vector<1x32xf32>
    %140 = arith.addf %138, %139 : vector<1x32xf32>
    %141 = math.rsqrt %140 : vector<1x32xf32>
    %c0_40 = arith.constant 0 : index
    %c0_41 = arith.constant 0 : index
    %142 = vector.load %arg2[%c0_40, %c0_41] : memref<1x32xf32, #tpu.memory_space<vmem>>, vector<1x32xf32>
    %143 = arith.mulf %141, %142 : vector<1x32xf32>
    %c0_42 = arith.constant 0 : index
    %c0_43 = arith.constant 0 : index
    %144 = vector.load %arg3[%c0_42, %c0_43] : memref<1x32xf32, #tpu.memory_space<vmem>>, vector<1x32xf32>
    %145 = arith.mulf %134, %143 : vector<1x32xf32>
    %146 = arith.subf %144, %145 : vector<1x32xf32>
    %147 = tpu.concatenate %143, %143, %143, %143, %143, %143, %143, %143, %143, %143, %143, %143, %143, %143, %143, %143 in 1 : vector<1x32xf32>, vector<1x32xf32>, vector<1x32xf32>, vector<1x32xf32>, vector<1x32xf32>, vector<1x32xf32>, vector<1x32xf32>, vector<1x32xf32>, vector<1x32xf32>, vector<1x32xf32>, vector<1x32xf32>, vector<1x32xf32>, vector<1x32xf32>, vector<1x32xf32>, vector<1x32xf32>, vector<1x32xf32> -> vector<1x512xf32>
    %148 = tpu.concatenate %146, %146, %146, %146, %146, %146, %146, %146, %146, %146, %146, %146, %146, %146, %146, %146 in 1 : vector<1x32xf32>, vector<1x32xf32>, vector<1x32xf32>, vector<1x32xf32>, vector<1x32xf32>, vector<1x32xf32>, vector<1x32xf32>, vector<1x32xf32>, vector<1x32xf32>, vector<1x32xf32>, vector<1x32xf32>, vector<1x32xf32>, vector<1x32xf32>, vector<1x32xf32>, vector<1x32xf32>, vector<1x32xf32> -> vector<1x512xf32>
    %149 = vector.broadcast %147 : vector<1x512xf32> to vector<2x512xf32>
    %150 = arith.mulf %2, %149 : vector<2x512xf32>
    %151 = vector.broadcast %148 : vector<1x512xf32> to vector<2x512xf32>
    %152 = arith.addf %150, %151 : vector<2x512xf32>
    %cst_44 = arith.constant 0.000000e+00 : f32
    %153 = vector.broadcast %cst_44 : f32 to vector<2x512xf32>
    %154 = arith.maximumf %152, %153 : vector<2x512xf32>
    %c0_45 = arith.constant 0 : index
    %c0_46 = arith.constant 0 : index
    %155 = vector.load %arg4[%c0_45, %c0_46] : memref<2x512xf32, #tpu.memory_space<vmem>>, vector<2x512xf32>
    tpu.vector_store %arg4[%c0_45, %c0_46], %154 {strides = array<i32>} : memref<2x512xf32, #tpu.memory_space<vmem>>, vector<2x512xf32>,
    return
  }
}

module attributes {stable_mosaic.version = 11 : i64} {
  func.func @_convt_phase_kernel(%arg0: memref<32x32xbf16, #tpu.memory_space<vmem>>, %arg1: memref<4x4x16x32xbf16, #tpu.memory_space<vmem>>, %arg2: memref<16x1xf32, #tpu.memory_space<vmem>>, %arg3: memref<16x1xf32, #tpu.memory_space<vmem>>, %arg4: memref<4x16x32xf32, #tpu.memory_space<vmem>>) attributes {dimension_semantics = [], scalar_prefetch = 0 : i64, scratch_operands = 0 : i64, tpu.core_type = #tpu.core_type<tc>} {
    %c0 = arith.constant 0 : index
    %c0_0 = arith.constant 0 : index
    %0 = vector.load %arg0[%c0, %c0_0] : memref<32x32xbf16, #tpu.memory_space<vmem>>, vector<32x32xbf16>
    %1 = tpu.iota {dimensions = array<i32: 1>} : vector<1x32xi32>
    %c3_i32 = arith.constant 3 : i32
    %2 = vector.broadcast %c3_i32 : i32 to vector<1x32xi32>
    %3 = arith.andi %1, %2 : vector<1x32xi32>
    %c2_i32 = arith.constant 2 : i32
    %4 = vector.broadcast %c2_i32 : i32 to vector<1x32xi32>
    %5 = arith.shrsi %1, %4 : vector<1x32xi32>
    %c3_i32_1 = arith.constant 3 : i32
    %6 = vector.broadcast %c3_i32_1 : i32 to vector<1x32xi32>
    %7 = arith.andi %5, %6 : vector<1x32xi32>
    %cst = arith.constant 0.000000e+00 : f32
    %8 = vector.broadcast %cst : f32 to vector<16x32xf32>
    %c0_2 = arith.constant 0 : index
    %c0_3 = arith.constant 0 : index
    %c0_4 = arith.constant 0 : index
    %c0_5 = arith.constant 0 : index
    %9 = vector.load %arg1[%c0_2, %c0_3, %c0_4, %c0_5] : memref<4x4x16x32xbf16, #tpu.memory_space<vmem>>, vector<1x1x16x32xbf16>
    %10 = vector.shape_cast %9 : vector<1x1x16x32xbf16> to vector<16x32xbf16>
    %cst_6 = arith.constant 0.000000e+00 : bf16
    %11 = vector.broadcast %cst_6 : bf16 to vector<32x5xbf16>
    %12 = vector.extract_strided_slice %0 {offsets = [0, 0], sizes = [32, 27], strides = [1, 1]} : vector<32x32xbf16> to vector<32x27xbf16>
    %13 = tpu.concatenate %11, %12 in 1 : vector<32x5xbf16>, vector<32x27xbf16> -> vector<32x32xbf16>
    %c-1_i32 = arith.constant -1 : i32
    %14 = vector.broadcast %c-1_i32 : i32 to vector<1x32xi32>
    %15 = arith.addi %3, %14 : vector<1x32xi32>
    %c0_i32 = arith.constant 0 : i32
    %16 = vector.broadcast %c0_i32 : i32 to vector<1x32xi32>
    %17 = arith.cmpi sge, %15, %16 : vector<1x32xi32>
    %c-1_i32_7 = arith.constant -1 : i32
    %18 = vector.broadcast %c-1_i32_7 : i32 to vector<1x32xi32>
    %19 = arith.addi %3, %18 : vector<1x32xi32>
    %c4_i32 = arith.constant 4 : i32
    %20 = vector.broadcast %c4_i32 : i32 to vector<1x32xi32>
    %21 = arith.cmpi slt, %19, %20 : vector<1x32xi32>
    %22 = arith.andi %17, %21 : vector<1x32xi1>
    %c-1_i32_8 = arith.constant -1 : i32
    %23 = vector.broadcast %c-1_i32_8 : i32 to vector<1x32xi32>
    %24 = arith.addi %7, %23 : vector<1x32xi32>
    %c0_i32_9 = arith.constant 0 : i32
    %25 = vector.broadcast %c0_i32_9 : i32 to vector<1x32xi32>
    %26 = arith.cmpi sge, %24, %25 : vector<1x32xi32>
    %27 = arith.andi %22, %26 : vector<1x32xi1>
    %c-1_i32_10 = arith.constant -1 : i32
    %28 = vector.broadcast %c-1_i32_10 : i32 to vector<1x32xi32>
    %29 = arith.addi %7, %28 : vector<1x32xi32>
    %c4_i32_11 = arith.constant 4 : i32
    %30 = vector.broadcast %c4_i32_11 : i32 to vector<1x32xi32>
    %31 = arith.cmpi slt, %29, %30 : vector<1x32xi32>
    %32 = arith.andi %27, %31 : vector<1x32xi1>
    %33 = arith.extui %32 : vector<1x32xi1> to vector<1x32xi32>
    %34 = arith.sitofp %33 : vector<1x32xi32> to vector<1x32xf32>
    %35 = arith.truncf %34 : vector<1x32xf32> to vector<1x32xbf16>
    %36 = vector.broadcast %35 : vector<1x32xbf16> to vector<32x32xbf16>
    %37 = arith.mulf %13, %36 : vector<32x32xbf16>
    %cst_12 = arith.constant dense<0.000000e+00> : vector<16x32xf32>
    %38 = tpu.matmul %10, %37, %cst_12 {dimension_numbers = #tpu.dot_dimension_numbers<[1], [0], [0], [1], [0, 0, 1, 1], [], []>} : vector<16x32xbf16>, vector<32x32xbf16>, vector<16x32xf32> -> vector<16x32xf32>
    %39 = arith.addf %8, %38 : vector<16x32xf32>
    %c0_13 = arith.constant 0 : index
    %c1 = arith.constant 1 : index
    %c0_14 = arith.constant 0 : index
    %c0_15 = arith.constant 0 : index
    %40 = vector.load %arg1[%c0_13, %c1, %c0_14, %c0_15] : memref<4x4x16x32xbf16, #tpu.memory_space<vmem>>, vector<1x1x16x32xbf16>
    %41 = vector.shape_cast %40 : vector<1x1x16x32xbf16> to vector<16x32xbf16>
    %cst_16 = arith.constant 0.000000e+00 : bf16
    %42 = vector.broadcast %cst_16 : bf16 to vector<32x4xbf16>
    %43 = vector.extract_strided_slice %0 {offsets = [0, 0], sizes = [32, 28], strides = [1, 1]} : vector<32x32xbf16> to vector<32x28xbf16>
    %44 = tpu.concatenate %42, %43 in 1 : vector<32x4xbf16>, vector<32x28xbf16> -> vector<32x32xbf16>
    %c0_i32_17 = arith.constant 0 : i32
    %45 = vector.broadcast %c0_i32_17 : i32 to vector<1x32xi32>
    %46 = arith.addi %3, %45 : vector<1x32xi32>
    %c0_i32_18 = arith.constant 0 : i32
    %47 = vector.broadcast %c0_i32_18 : i32 to vector<1x32xi32>
    %48 = arith.cmpi sge, %46, %47 : vector<1x32xi32>
    %c0_i32_19 = arith.constant 0 : i32
    %49 = vector.broadcast %c0_i32_19 : i32 to vector<1x32xi32>
    %50 = arith.addi %3, %49 : vector<1x32xi32>
    %c4_i32_20 = arith.constant 4 : i32
    %51 = vector.broadcast %c4_i32_20 : i32 to vector<1x32xi32>
    %52 = arith.cmpi slt, %50, %51 : vector<1x32xi32>
    %53 = arith.andi %48, %52 : vector<1x32xi1>
    %c-1_i32_21 = arith.constant -1 : i32
    %54 = vector.broadcast %c-1_i32_21 : i32 to vector<1x32xi32>
    %55 = arith.addi %7, %54 : vector<1x32xi32>
    %c0_i32_22 = arith.constant 0 : i32
    %56 = vector.broadcast %c0_i32_22 : i32 to vector<1x32xi32>
    %57 = arith.cmpi sge, %55, %56 : vector<1x32xi32>
    %58 = arith.andi %53, %57 : vector<1x32xi1>
    %c-1_i32_23 = arith.constant -1 : i32
    %59 = vector.broadcast %c-1_i32_23 : i32 to vector<1x32xi32>
    %60 = arith.addi %7, %59 : vector<1x32xi32>
    %c4_i32_24 = arith.constant 4 : i32
    %61 = vector.broadcast %c4_i32_24 : i32 to vector<1x32xi32>
    %62 = arith.cmpi slt, %60, %61 : vector<1x32xi32>
    %63 = arith.andi %58, %62 : vector<1x32xi1>
    %64 = arith.extui %63 : vector<1x32xi1> to vector<1x32xi32>
    %65 = arith.sitofp %64 : vector<1x32xi32> to vector<1x32xf32>
    %66 = arith.truncf %65 : vector<1x32xf32> to vector<1x32xbf16>
    %67 = vector.broadcast %66 : vector<1x32xbf16> to vector<32x32xbf16>
    %68 = arith.mulf %44, %67 : vector<32x32xbf16>
    %cst_25 = arith.constant dense<0.000000e+00> : vector<16x32xf32>
    %69 = tpu.matmul %41, %68, %cst_25 {dimension_numbers = #tpu.dot_dimension_numbers<[1], [0], [0], [1], [0, 0, 1, 1], [], []>} : vector<16x32xbf16>, vector<32x32xbf16>, vector<16x32xf32> -> vector<16x32xf32>
    %70 = arith.addf %39, %69 : vector<16x32xf32>
    %c0_26 = arith.constant 0 : index
    %c2 = arith.constant 2 : index
    %c0_27 = arith.constant 0 : index
    %c0_28 = arith.constant 0 : index
    %71 = vector.load %arg1[%c0_26, %c2, %c0_27, %c0_28] : memref<4x4x16x32xbf16, #tpu.memory_space<vmem>>, vector<1x1x16x32xbf16>
    %72 = vector.shape_cast %71 : vector<1x1x16x32xbf16> to vector<16x32xbf16>
    %cst_29 = arith.constant 0.000000e+00 : bf16
    %73 = vector.broadcast %cst_29 : bf16 to vector<32x1xbf16>
    %74 = vector.extract_strided_slice %0 {offsets = [0, 0], sizes = [32, 31], strides = [1, 1]} : vector<32x32xbf16> to vector<32x31xbf16>
    %75 = tpu.concatenate %73, %74 in 1 : vector<32x1xbf16>, vector<32x31xbf16> -> vector<32x32xbf16>
    %c-1_i32_30 = arith.constant -1 : i32
    %76 = vector.broadcast %c-1_i32_30 : i32 to vector<1x32xi32>
    %77 = arith.addi %3, %76 : vector<1x32xi32>
    %c0_i32_31 = arith.constant 0 : i32
    %78 = vector.broadcast %c0_i32_31 : i32 to vector<1x32xi32>
    %79 = arith.cmpi sge, %77, %78 : vector<1x32xi32>
    %c-1_i32_32 = arith.constant -1 : i32
    %80 = vector.broadcast %c-1_i32_32 : i32 to vector<1x32xi32>
    %81 = arith.addi %3, %80 : vector<1x32xi32>
    %c4_i32_33 = arith.constant 4 : i32
    %82 = vector.broadcast %c4_i32_33 : i32 to vector<1x32xi32>
    %83 = arith.cmpi slt, %81, %82 : vector<1x32xi32>
    %84 = arith.andi %79, %83 : vector<1x32xi1>
    %c0_i32_34 = arith.constant 0 : i32
    %85 = vector.broadcast %c0_i32_34 : i32 to vector<1x32xi32>
    %86 = arith.addi %7, %85 : vector<1x32xi32>
    %c0_i32_35 = arith.constant 0 : i32
    %87 = vector.broadcast %c0_i32_35 : i32 to vector<1x32xi32>
    %88 = arith.cmpi sge, %86, %87 : vector<1x32xi32>
    %89 = arith.andi %84, %88 : vector<1x32xi1>
    %c0_i32_36 = arith.constant 0 : i32
    %90 = vector.broadcast %c0_i32_36 : i32 to vector<1x32xi32>
    %91 = arith.addi %7, %90 : vector<1x32xi32>
    %c4_i32_37 = arith.constant 4 : i32
    %92 = vector.broadcast %c4_i32_37 : i32 to vector<1x32xi32>
    %93 = arith.cmpi slt, %91, %92 : vector<1x32xi32>
    %94 = arith.andi %89, %93 : vector<1x32xi1>
    %95 = arith.extui %94 : vector<1x32xi1> to vector<1x32xi32>
    %96 = arith.sitofp %95 : vector<1x32xi32> to vector<1x32xf32>
    %97 = arith.truncf %96 : vector<1x32xf32> to vector<1x32xbf16>
    %98 = vector.broadcast %97 : vector<1x32xbf16> to vector<32x32xbf16>
    %99 = arith.mulf %75, %98 : vector<32x32xbf16>
    %cst_38 = arith.constant dense<0.000000e+00> : vector<16x32xf32>
    %100 = tpu.matmul %72, %99, %cst_38 {dimension_numbers = #tpu.dot_dimension_numbers<[1], [0], [0], [1], [0, 0, 1, 1], [], []>} : vector<16x32xbf16>, vector<32x32xbf16>, vector<16x32xf32> -> vector<16x32xf32>
    %101 = arith.addf %70, %100 : vector<16x32xf32>
    %c0_39 = arith.constant 0 : index
    %c3 = arith.constant 3 : index
    %c0_40 = arith.constant 0 : index
    %c0_41 = arith.constant 0 : index
    %102 = vector.load %arg1[%c0_39, %c3, %c0_40, %c0_41] : memref<4x4x16x32xbf16, #tpu.memory_space<vmem>>, vector<1x1x16x32xbf16>
    %103 = vector.shape_cast %102 : vector<1x1x16x32xbf16> to vector<16x32xbf16>
    %cst_42 = arith.constant dense<0.000000e+00> : vector<16x32xf32>
    %104 = tpu.matmul %103, %0, %cst_42 {dimension_numbers = #tpu.dot_dimension_numbers<[1], [0], [0], [1], [0, 0, 1, 1], [], []>} : vector<16x32xbf16>, vector<32x32xbf16>, vector<16x32xf32> -> vector<16x32xf32>
    %105 = arith.addf %101, %104 : vector<16x32xf32>
    %cst_43 = arith.constant 0.000000e+00 : f32
    %106 = vector.broadcast %cst_43 : f32 to vector<16x32xf32>
    %c1_44 = arith.constant 1 : index
    %c0_45 = arith.constant 0 : index
    %c0_46 = arith.constant 0 : index
    %c0_47 = arith.constant 0 : index
    %107 = vector.load %arg1[%c1_44, %c0_45, %c0_46, %c0_47] : memref<4x4x16x32xbf16, #tpu.memory_space<vmem>>, vector<1x1x16x32xbf16>
    %108 = vector.shape_cast %107 : vector<1x1x16x32xbf16> to vector<16x32xbf16>
    %cst_48 = arith.constant dense<0.000000e+00> : vector<16x32xf32>
    %109 = tpu.matmul %108, %68, %cst_48 {dimension_numbers = #tpu.dot_dimension_numbers<[1], [0], [0], [1], [0, 0, 1, 1], [], []>} : vector<16x32xbf16>, vector<32x32xbf16>, vector<16x32xf32> -> vector<16x32xf32>
    %110 = arith.addf %106, %109 : vector<16x32xf32>
    %c1_49 = arith.constant 1 : index
    %c1_50 = arith.constant 1 : index
    %c0_51 = arith.constant 0 : index
    %c0_52 = arith.constant 0 : index
    %111 = vector.load %arg1[%c1_49, %c1_50, %c0_51, %c0_52] : memref<4x4x16x32xbf16, #tpu.memory_space<vmem>>, vector<1x1x16x32xbf16>
    %112 = vector.shape_cast %111 : vector<1x1x16x32xbf16> to vector<16x32xbf16>
    %cst_53 = arith.constant 0.000000e+00 : bf16
    %113 = vector.broadcast %cst_53 : bf16 to vector<32x3xbf16>
    %114 = vector.extract_strided_slice %0 {offsets = [0, 0], sizes = [32, 29], strides = [1, 1]} : vector<32x32xbf16> to vector<32x29xbf16>
    %115 = tpu.concatenate %113, %114 in 1 : vector<32x3xbf16>, vector<32x29xbf16> -> vector<32x32xbf16>
    %c1_i32 = arith.constant 1 : i32
    %116 = vector.broadcast %c1_i32 : i32 to vector<1x32xi32>
    %117 = arith.addi %3, %116 : vector<1x32xi32>
    %c0_i32_54 = arith.constant 0 : i32
    %118 = vector.broadcast %c0_i32_54 : i32 to vector<1x32xi32>
    %119 = arith.cmpi sge, %117, %118 : vector<1x32xi32>
    %c1_i32_55 = arith.constant 1 : i32
    %120 = vector.broadcast %c1_i32_55 : i32 to vector<1x32xi32>
    %121 = arith.addi %3, %120 : vector<1x32xi32>
    %c4_i32_56 = arith.constant 4 : i32
    %122 = vector.broadcast %c4_i32_56 : i32 to vector<1x32xi32>
    %123 = arith.cmpi slt, %121, %122 : vector<1x32xi32>
    %124 = arith.andi %119, %123 : vector<1x32xi1>
    %c-1_i32_57 = arith.constant -1 : i32
    %125 = vector.broadcast %c-1_i32_57 : i32 to vector<1x32xi32>
    %126 = arith.addi %7, %125 : vector<1x32xi32>
    %c0_i32_58 = arith.constant 0 : i32
    %127 = vector.broadcast %c0_i32_58 : i32 to vector<1x32xi32>
    %128 = arith.cmpi sge, %126, %127 : vector<1x32xi32>
    %129 = arith.andi %124, %128 : vector<1x32xi1>
    %c-1_i32_59 = arith.constant -1 : i32
    %130 = vector.broadcast %c-1_i32_59 : i32 to vector<1x32xi32>
    %131 = arith.addi %7, %130 : vector<1x32xi32>
    %c4_i32_60 = arith.constant 4 : i32
    %132 = vector.broadcast %c4_i32_60 : i32 to vector<1x32xi32>
    %133 = arith.cmpi slt, %131, %132 : vector<1x32xi32>
    %134 = arith.andi %129, %133 : vector<1x32xi1>
    %135 = arith.extui %134 : vector<1x32xi1> to vector<1x32xi32>
    %136 = arith.sitofp %135 : vector<1x32xi32> to vector<1x32xf32>
    %137 = arith.truncf %136 : vector<1x32xf32> to vector<1x32xbf16>
    %138 = vector.broadcast %137 : vector<1x32xbf16> to vector<32x32xbf16>
    %139 = arith.mulf %115, %138 : vector<32x32xbf16>
    %cst_61 = arith.constant dense<0.000000e+00> : vector<16x32xf32>
    %140 = tpu.matmul %112, %139, %cst_61 {dimension_numbers = #tpu.dot_dimension_numbers<[1], [0], [0], [1], [0, 0, 1, 1], [], []>} : vector<16x32xbf16>, vector<32x32xbf16>, vector<16x32xf32> -> vector<16x32xf32>
    %141 = arith.addf %110, %140 : vector<16x32xf32>
    %c1_62 = arith.constant 1 : index
    %c2_63 = arith.constant 2 : index
    %c0_64 = arith.constant 0 : index
    %c0_65 = arith.constant 0 : index
    %142 = vector.load %arg1[%c1_62, %c2_63, %c0_64, %c0_65] : memref<4x4x16x32xbf16, #tpu.memory_space<vmem>>, vector<1x1x16x32xbf16>
    %143 = vector.shape_cast %142 : vector<1x1x16x32xbf16> to vector<16x32xbf16>
    %cst_66 = arith.constant dense<0.000000e+00> : vector<16x32xf32>
    %144 = tpu.matmul %143, %0, %cst_66 {dimension_numbers = #tpu.dot_dimension_numbers<[1], [0], [0], [1], [0, 0, 1, 1], [], []>} : vector<16x32xbf16>, vector<32x32xbf16>, vector<16x32xf32> -> vector<16x32xf32>
    %145 = arith.addf %141, %144 : vector<16x32xf32>
    %c1_67 = arith.constant 1 : index
    %c3_68 = arith.constant 3 : index
    %c0_69 = arith.constant 0 : index
    %c0_70 = arith.constant 0 : index
    %146 = vector.load %arg1[%c1_67, %c3_68, %c0_69, %c0_70] : memref<4x4x16x32xbf16, #tpu.memory_space<vmem>>, vector<1x1x16x32xbf16>
    %147 = vector.shape_cast %146 : vector<1x1x16x32xbf16> to vector<16x32xbf16>
    %148 = vector.extract_strided_slice %0 {offsets = [0, 1], sizes = [32, 31], strides = [1, 1]} : vector<32x32xbf16> to vector<32x31xbf16>
    %cst_71 = arith.constant 0.000000e+00 : bf16
    %149 = vector.broadcast %cst_71 : bf16 to vector<32x1xbf16>
    %150 = tpu.concatenate %148, %149 in 1 : vector<32x31xbf16>, vector<32x1xbf16> -> vector<32x32xbf16>
    %c1_i32_72 = arith.constant 1 : i32
    %151 = vector.broadcast %c1_i32_72 : i32 to vector<1x32xi32>
    %152 = arith.addi %3, %151 : vector<1x32xi32>
    %c0_i32_73 = arith.constant 0 : i32
    %153 = vector.broadcast %c0_i32_73 : i32 to vector<1x32xi32>
    %154 = arith.cmpi sge, %152, %153 : vector<1x32xi32>
    %c1_i32_74 = arith.constant 1 : i32
    %155 = vector.broadcast %c1_i32_74 : i32 to vector<1x32xi32>
    %156 = arith.addi %3, %155 : vector<1x32xi32>
    %c4_i32_75 = arith.constant 4 : i32
    %157 = vector.broadcast %c4_i32_75 : i32 to vector<1x32xi32>
    %158 = arith.cmpi slt, %156, %157 : vector<1x32xi32>
    %159 = arith.andi %154, %158 : vector<1x32xi1>
    %c0_i32_76 = arith.constant 0 : i32
    %160 = vector.broadcast %c0_i32_76 : i32 to vector<1x32xi32>
    %161 = arith.addi %7, %160 : vector<1x32xi32>
    %c0_i32_77 = arith.constant 0 : i32
    %162 = vector.broadcast %c0_i32_77 : i32 to vector<1x32xi32>
    %163 = arith.cmpi sge, %161, %162 : vector<1x32xi32>
    %164 = arith.andi %159, %163 : vector<1x32xi1>
    %c0_i32_78 = arith.constant 0 : i32
    %165 = vector.broadcast %c0_i32_78 : i32 to vector<1x32xi32>
    %166 = arith.addi %7, %165 : vector<1x32xi32>
    %c4_i32_79 = arith.constant 4 : i32
    %167 = vector.broadcast %c4_i32_79 : i32 to vector<1x32xi32>
    %168 = arith.cmpi slt, %166, %167 : vector<1x32xi32>
    %169 = arith.andi %164, %168 : vector<1x32xi1>
    %170 = arith.extui %169 : vector<1x32xi1> to vector<1x32xi32>
    %171 = arith.sitofp %170 : vector<1x32xi32> to vector<1x32xf32>
    %172 = arith.truncf %171 : vector<1x32xf32> to vector<1x32xbf16>
    %173 = vector.broadcast %172 : vector<1x32xbf16> to vector<32x32xbf16>
    %174 = arith.mulf %150, %173 : vector<32x32xbf16>
    %cst_80 = arith.constant dense<0.000000e+00> : vector<16x32xf32>
    %175 = tpu.matmul %147, %174, %cst_80 {dimension_numbers = #tpu.dot_dimension_numbers<[1], [0], [0], [1], [0, 0, 1, 1], [], []>} : vector<16x32xbf16>, vector<32x32xbf16>, vector<16x32xf32> -> vector<16x32xf32>
    %176 = arith.addf %145, %175 : vector<16x32xf32>
    %cst_81 = arith.constant 0.000000e+00 : f32
    %177 = vector.broadcast %cst_81 : f32 to vector<16x32xf32>
    %c2_82 = arith.constant 2 : index
    %c0_83 = arith.constant 0 : index
    %c0_84 = arith.constant 0 : index
    %c0_85 = arith.constant 0 : index
    %178 = vector.load %arg1[%c2_82, %c0_83, %c0_84, %c0_85] : memref<4x4x16x32xbf16, #tpu.memory_space<vmem>>, vector<1x1x16x32xbf16>
    %179 = vector.shape_cast %178 : vector<1x1x16x32xbf16> to vector<16x32xbf16>
    %cst_86 = arith.constant dense<0.000000e+00> : vector<16x32xf32>
    %180 = tpu.matmul %179, %99, %cst_86 {dimension_numbers = #tpu.dot_dimension_numbers<[1], [0], [0], [1], [0, 0, 1, 1], [], []>} : vector<16x32xbf16>, vector<32x32xbf16>, vector<16x32xf32> -> vector<16x32xf32>
    %181 = arith.addf %177, %180 : vector<16x32xf32>
    %c2_87 = arith.constant 2 : index
    %c1_88 = arith.constant 1 : index
    %c0_89 = arith.constant 0 : index
    %c0_90 = arith.constant 0 : index
    %182 = vector.load %arg1[%c2_87, %c1_88, %c0_89, %c0_90] : memref<4x4x16x32xbf16, #tpu.memory_space<vmem>>, vector<1x1x16x32xbf16>
    %183 = vector.shape_cast %182 : vector<1x1x16x32xbf16> to vector<16x32xbf16>
    %cst_91 = arith.constant dense<0.000000e+00> : vector<16x32xf32>
    %184 = tpu.matmul %183, %0, %cst_91 {dimension_numbers = #tpu.dot_dimension_numbers<[1], [0], [0], [1], [0, 0, 1, 1], [], []>} : vector<16x32xbf16>, vector<32x32xbf16>, vector<16x32xf32> -> vector<16x32xf32>
    %185 = arith.addf %181, %184 : vector<16x32xf32>
    %c2_92 = arith.constant 2 : index
    %c2_93 = arith.constant 2 : index
    %c0_94 = arith.constant 0 : index
    %c0_95 = arith.constant 0 : index
    %186 = vector.load %arg1[%c2_92, %c2_93, %c0_94, %c0_95] : memref<4x4x16x32xbf16, #tpu.memory_space<vmem>>, vector<1x1x16x32xbf16>
    %187 = vector.shape_cast %186 : vector<1x1x16x32xbf16> to vector<16x32xbf16>
    %188 = vector.extract_strided_slice %0 {offsets = [0, 3], sizes = [32, 29], strides = [1, 1]} : vector<32x32xbf16> to vector<32x29xbf16>
    %cst_96 = arith.constant 0.000000e+00 : bf16
    %189 = vector.broadcast %cst_96 : bf16 to vector<32x3xbf16>
    %190 = tpu.concatenate %188, %189 in 1 : vector<32x29xbf16>, vector<32x3xbf16> -> vector<32x32xbf16>
    %c-1_i32_97 = arith.constant -1 : i32
    %191 = vector.broadcast %c-1_i32_97 : i32 to vector<1x32xi32>
    %192 = arith.addi %3, %191 : vector<1x32xi32>
    %c0_i32_98 = arith.constant 0 : i32
    %193 = vector.broadcast %c0_i32_98 : i32 to vector<1x32xi32>
    %194 = arith.cmpi sge, %192, %193 : vector<1x32xi32>
    %c-1_i32_99 = arith.constant -1 : i32
    %195 = vector.broadcast %c-1_i32_99 : i32 to vector<1x32xi32>
    %196 = arith.addi %3, %195 : vector<1x32xi32>
    %c4_i32_100 = arith.constant 4 : i32
    %197 = vector.broadcast %c4_i32_100 : i32 to vector<1x32xi32>
    %198 = arith.cmpi slt, %196, %197 : vector<1x32xi32>
    %199 = arith.andi %194, %198 : vector<1x32xi1>
    %c1_i32_101 = arith.constant 1 : i32
    %200 = vector.broadcast %c1_i32_101 : i32 to vector<1x32xi32>
    %201 = arith.addi %7, %200 : vector<1x32xi32>
    %c0_i32_102 = arith.constant 0 : i32
    %202 = vector.broadcast %c0_i32_102 : i32 to vector<1x32xi32>
    %203 = arith.cmpi sge, %201, %202 : vector<1x32xi32>
    %204 = arith.andi %199, %203 : vector<1x32xi1>
    %c1_i32_103 = arith.constant 1 : i32
    %205 = vector.broadcast %c1_i32_103 : i32 to vector<1x32xi32>
    %206 = arith.addi %7, %205 : vector<1x32xi32>
    %c4_i32_104 = arith.constant 4 : i32
    %207 = vector.broadcast %c4_i32_104 : i32 to vector<1x32xi32>
    %208 = arith.cmpi slt, %206, %207 : vector<1x32xi32>
    %209 = arith.andi %204, %208 : vector<1x32xi1>
    %210 = arith.extui %209 : vector<1x32xi1> to vector<1x32xi32>
    %211 = arith.sitofp %210 : vector<1x32xi32> to vector<1x32xf32>
    %212 = arith.truncf %211 : vector<1x32xf32> to vector<1x32xbf16>
    %213 = vector.broadcast %212 : vector<1x32xbf16> to vector<32x32xbf16>
    %214 = arith.mulf %190, %213 : vector<32x32xbf16>
    %cst_105 = arith.constant dense<0.000000e+00> : vector<16x32xf32>
    %215 = tpu.matmul %187, %214, %cst_105 {dimension_numbers = #tpu.dot_dimension_numbers<[1], [0], [0], [1], [0, 0, 1, 1], [], []>} : vector<16x32xbf16>, vector<32x32xbf16>, vector<16x32xf32> -> vector<16x32xf32>
    %216 = arith.addf %185, %215 : vector<16x32xf32>
    %c2_106 = arith.constant 2 : index
    %c3_107 = arith.constant 3 : index
    %c0_108 = arith.constant 0 : index
    %c0_109 = arith.constant 0 : index
    %217 = vector.load %arg1[%c2_106, %c3_107, %c0_108, %c0_109] : memref<4x4x16x32xbf16, #tpu.memory_space<vmem>>, vector<1x1x16x32xbf16>
    %218 = vector.shape_cast %217 : vector<1x1x16x32xbf16> to vector<16x32xbf16>
    %219 = vector.extract_strided_slice %0 {offsets = [0, 4], sizes = [32, 28], strides = [1, 1]} : vector<32x32xbf16> to vector<32x28xbf16>
    %cst_110 = arith.constant 0.000000e+00 : bf16
    %220 = vector.broadcast %cst_110 : bf16 to vector<32x4xbf16>
    %221 = tpu.concatenate %219, %220 in 1 : vector<32x28xbf16>, vector<32x4xbf16> -> vector<32x32xbf16>
    %c0_i32_111 = arith.constant 0 : i32
    %222 = vector.broadcast %c0_i32_111 : i32 to vector<1x32xi32>
    %223 = arith.addi %3, %222 : vector<1x32xi32>
    %c0_i32_112 = arith.constant 0 : i32
    %224 = vector.broadcast %c0_i32_112 : i32 to vector<1x32xi32>
    %225 = arith.cmpi sge, %223, %224 : vector<1x32xi32>
    %c0_i32_113 = arith.constant 0 : i32
    %226 = vector.broadcast %c0_i32_113 : i32 to vector<1x32xi32>
    %227 = arith.addi %3, %226 : vector<1x32xi32>
    %c4_i32_114 = arith.constant 4 : i32
    %228 = vector.broadcast %c4_i32_114 : i32 to vector<1x32xi32>
    %229 = arith.cmpi slt, %227, %228 : vector<1x32xi32>
    %230 = arith.andi %225, %229 : vector<1x32xi1>
    %c1_i32_115 = arith.constant 1 : i32
    %231 = vector.broadcast %c1_i32_115 : i32 to vector<1x32xi32>
    %232 = arith.addi %7, %231 : vector<1x32xi32>
    %c0_i32_116 = arith.constant 0 : i32
    %233 = vector.broadcast %c0_i32_116 : i32 to vector<1x32xi32>
    %234 = arith.cmpi sge, %232, %233 : vector<1x32xi32>
    %235 = arith.andi %230, %234 : vector<1x32xi1>
    %c1_i32_117 = arith.constant 1 : i32
    %236 = vector.broadcast %c1_i32_117 : i32 to vector<1x32xi32>
    %237 = arith.addi %7, %236 : vector<1x32xi32>
    %c4_i32_118 = arith.constant 4 : i32
    %238 = vector.broadcast %c4_i32_118 : i32 to vector<1x32xi32>
    %239 = arith.cmpi slt, %237, %238 : vector<1x32xi32>
    %240 = arith.andi %235, %239 : vector<1x32xi1>
    %241 = arith.extui %240 : vector<1x32xi1> to vector<1x32xi32>
    %242 = arith.sitofp %241 : vector<1x32xi32> to vector<1x32xf32>
    %243 = arith.truncf %242 : vector<1x32xf32> to vector<1x32xbf16>
    %244 = vector.broadcast %243 : vector<1x32xbf16> to vector<32x32xbf16>
    %245 = arith.mulf %221, %244 : vector<32x32xbf16>
    %cst_119 = arith.constant dense<0.000000e+00> : vector<16x32xf32>
    %246 = tpu.matmul %218, %245, %cst_119 {dimension_numbers = #tpu.dot_dimension_numbers<[1], [0], [0], [1], [0, 0, 1, 1], [], []>} : vector<16x32xbf16>, vector<32x32xbf16>, vector<16x32xf32> -> vector<16x32xf32>
    %247 = arith.addf %216, %246 : vector<16x32xf32>
    %cst_120 = arith.constant 0.000000e+00 : f32
    %248 = vector.broadcast %cst_120 : f32 to vector<16x32xf32>
    %c3_121 = arith.constant 3 : index
    %c0_122 = arith.constant 0 : index
    %c0_123 = arith.constant 0 : index
    %c0_124 = arith.constant 0 : index
    %249 = vector.load %arg1[%c3_121, %c0_122, %c0_123, %c0_124] : memref<4x4x16x32xbf16, #tpu.memory_space<vmem>>, vector<1x1x16x32xbf16>
    %250 = vector.shape_cast %249 : vector<1x1x16x32xbf16> to vector<16x32xbf16>
    %cst_125 = arith.constant dense<0.000000e+00> : vector<16x32xf32>
    %251 = tpu.matmul %250, %0, %cst_125 {dimension_numbers = #tpu.dot_dimension_numbers<[1], [0], [0], [1], [0, 0, 1, 1], [], []>} : vector<16x32xbf16>, vector<32x32xbf16>, vector<16x32xf32> -> vector<16x32xf32>
    %252 = arith.addf %248, %251 : vector<16x32xf32>
    %c3_126 = arith.constant 3 : index
    %c1_127 = arith.constant 1 : index
    %c0_128 = arith.constant 0 : index
    %c0_129 = arith.constant 0 : index
    %253 = vector.load %arg1[%c3_126, %c1_127, %c0_128, %c0_129] : memref<4x4x16x32xbf16, #tpu.memory_space<vmem>>, vector<1x1x16x32xbf16>
    %254 = vector.shape_cast %253 : vector<1x1x16x32xbf16> to vector<16x32xbf16>
    %cst_130 = arith.constant dense<0.000000e+00> : vector<16x32xf32>
    %255 = tpu.matmul %254, %174, %cst_130 {dimension_numbers = #tpu.dot_dimension_numbers<[1], [0], [0], [1], [0, 0, 1, 1], [], []>} : vector<16x32xbf16>, vector<32x32xbf16>, vector<16x32xf32> -> vector<16x32xf32>
    %256 = arith.addf %252, %255 : vector<16x32xf32>
    %c3_131 = arith.constant 3 : index
    %c2_132 = arith.constant 2 : index
    %c0_133 = arith.constant 0 : index
    %c0_134 = arith.constant 0 : index
    %257 = vector.load %arg1[%c3_131, %c2_132, %c0_133, %c0_134] : memref<4x4x16x32xbf16, #tpu.memory_space<vmem>>, vector<1x1x16x32xbf16>
    %258 = vector.shape_cast %257 : vector<1x1x16x32xbf16> to vector<16x32xbf16>
    %cst_135 = arith.constant dense<0.000000e+00> : vector<16x32xf32>
    %259 = tpu.matmul %258, %245, %cst_135 {dimension_numbers = #tpu.dot_dimension_numbers<[1], [0], [0], [1], [0, 0, 1, 1], [], []>} : vector<16x32xbf16>, vector<32x32xbf16>, vector<16x32xf32> -> vector<16x32xf32>
    %260 = arith.addf %256, %259 : vector<16x32xf32>
    %c3_136 = arith.constant 3 : index
    %c3_137 = arith.constant 3 : index
    %c0_138 = arith.constant 0 : index
    %c0_139 = arith.constant 0 : index
    %261 = vector.load %arg1[%c3_136, %c3_137, %c0_138, %c0_139] : memref<4x4x16x32xbf16, #tpu.memory_space<vmem>>, vector<1x1x16x32xbf16>
    %262 = vector.shape_cast %261 : vector<1x1x16x32xbf16> to vector<16x32xbf16>
    %263 = vector.extract_strided_slice %0 {offsets = [0, 5], sizes = [32, 27], strides = [1, 1]} : vector<32x32xbf16> to vector<32x27xbf16>
    %cst_140 = arith.constant 0.000000e+00 : bf16
    %264 = vector.broadcast %cst_140 : bf16 to vector<32x5xbf16>
    %265 = tpu.concatenate %263, %264 in 1 : vector<32x27xbf16>, vector<32x5xbf16> -> vector<32x32xbf16>
    %c1_i32_141 = arith.constant 1 : i32
    %266 = vector.broadcast %c1_i32_141 : i32 to vector<1x32xi32>
    %267 = arith.addi %3, %266 : vector<1x32xi32>
    %c0_i32_142 = arith.constant 0 : i32
    %268 = vector.broadcast %c0_i32_142 : i32 to vector<1x32xi32>
    %269 = arith.cmpi sge, %267, %268 : vector<1x32xi32>
    %c1_i32_143 = arith.constant 1 : i32
    %270 = vector.broadcast %c1_i32_143 : i32 to vector<1x32xi32>
    %271 = arith.addi %3, %270 : vector<1x32xi32>
    %c4_i32_144 = arith.constant 4 : i32
    %272 = vector.broadcast %c4_i32_144 : i32 to vector<1x32xi32>
    %273 = arith.cmpi slt, %271, %272 : vector<1x32xi32>
    %274 = arith.andi %269, %273 : vector<1x32xi1>
    %c1_i32_145 = arith.constant 1 : i32
    %275 = vector.broadcast %c1_i32_145 : i32 to vector<1x32xi32>
    %276 = arith.addi %7, %275 : vector<1x32xi32>
    %c0_i32_146 = arith.constant 0 : i32
    %277 = vector.broadcast %c0_i32_146 : i32 to vector<1x32xi32>
    %278 = arith.cmpi sge, %276, %277 : vector<1x32xi32>
    %279 = arith.andi %274, %278 : vector<1x32xi1>
    %c1_i32_147 = arith.constant 1 : i32
    %280 = vector.broadcast %c1_i32_147 : i32 to vector<1x32xi32>
    %281 = arith.addi %7, %280 : vector<1x32xi32>
    %c4_i32_148 = arith.constant 4 : i32
    %282 = vector.broadcast %c4_i32_148 : i32 to vector<1x32xi32>
    %283 = arith.cmpi slt, %281, %282 : vector<1x32xi32>
    %284 = arith.andi %279, %283 : vector<1x32xi1>
    %285 = arith.extui %284 : vector<1x32xi1> to vector<1x32xi32>
    %286 = arith.sitofp %285 : vector<1x32xi32> to vector<1x32xf32>
    %287 = arith.truncf %286 : vector<1x32xf32> to vector<1x32xbf16>
    %288 = vector.broadcast %287 : vector<1x32xbf16> to vector<32x32xbf16>
    %289 = arith.mulf %265, %288 : vector<32x32xbf16>
    %cst_149 = arith.constant dense<0.000000e+00> : vector<16x32xf32>
    %290 = tpu.matmul %262, %289, %cst_149 {dimension_numbers = #tpu.dot_dimension_numbers<[1], [0], [0], [1], [0, 0, 1, 1], [], []>} : vector<16x32xbf16>, vector<32x32xbf16>, vector<16x32xf32> -> vector<16x32xf32>
    %291 = arith.addf %260, %290 : vector<16x32xf32>
    %cst_150 = arith.constant 0.000000e+00 : f32
    %292 = vector.broadcast %cst_150 : f32 to vector<16x1xf32>
    %cst_151 = arith.constant 0.000000e+00 : f32
    %293 = vector.broadcast %cst_151 : f32 to vector<16x1xf32>
    %cst_152 = arith.constant dense<0.000000e+00> : vector<16xf32>
    %294 = vector.multi_reduction <add>, %105, %cst_152 [1] : vector<16x32xf32> to vector<16xf32>
    %295 = vector.shape_cast %294 : vector<16xf32> to vector<16x1xf32>
    %296 = arith.addf %292, %295 : vector<16x1xf32>
    %297 = arith.mulf %105, %105 : vector<16x32xf32>
    %cst_153 = arith.constant dense<0.000000e+00> : vector<16xf32>
    %298 = vector.multi_reduction <add>, %297, %cst_153 [1] : vector<16x32xf32> to vector<16xf32>
    %299 = vector.shape_cast %298 : vector<16xf32> to vector<16x1xf32>
    %300 = arith.addf %293, %299 : vector<16x1xf32>
    %cst_154 = arith.constant dense<0.000000e+00> : vector<16xf32>
    %301 = vector.multi_reduction <add>, %176, %cst_154 [1] : vector<16x32xf32> to vector<16xf32>
    %302 = vector.shape_cast %301 : vector<16xf32> to vector<16x1xf32>
    %303 = arith.addf %296, %302 : vector<16x1xf32>
    %304 = arith.mulf %176, %176 : vector<16x32xf32>
    %cst_155 = arith.constant dense<0.000000e+00> : vector<16xf32>
    %305 = vector.multi_reduction <add>, %304, %cst_155 [1] : vector<16x32xf32> to vector<16xf32>
    %306 = vector.shape_cast %305 : vector<16xf32> to vector<16x1xf32>
    %307 = arith.addf %300, %306 : vector<16x1xf32>
    %cst_156 = arith.constant dense<0.000000e+00> : vector<16xf32>
    %308 = vector.multi_reduction <add>, %247, %cst_156 [1] : vector<16x32xf32> to vector<16xf32>
    %309 = vector.shape_cast %308 : vector<16xf32> to vector<16x1xf32>
    %310 = arith.addf %303, %309 : vector<16x1xf32>
    %311 = arith.mulf %247, %247 : vector<16x32xf32>
    %cst_157 = arith.constant dense<0.000000e+00> : vector<16xf32>
    %312 = vector.multi_reduction <add>, %311, %cst_157 [1] : vector<16x32xf32> to vector<16xf32>
    %313 = vector.shape_cast %312 : vector<16xf32> to vector<16x1xf32>
    %314 = arith.addf %307, %313 : vector<16x1xf32>
    %cst_158 = arith.constant dense<0.000000e+00> : vector<16xf32>
    %315 = vector.multi_reduction <add>, %291, %cst_158 [1] : vector<16x32xf32> to vector<16xf32>
    %316 = vector.shape_cast %315 : vector<16xf32> to vector<16x1xf32>
    %317 = arith.addf %310, %316 : vector<16x1xf32>
    %318 = arith.mulf %291, %291 : vector<16x32xf32>
    %cst_159 = arith.constant dense<0.000000e+00> : vector<16xf32>
    %319 = vector.multi_reduction <add>, %318, %cst_159 [1] : vector<16x32xf32> to vector<16xf32>
    %320 = vector.shape_cast %319 : vector<16xf32> to vector<16x1xf32>
    %321 = arith.addf %314, %320 : vector<16x1xf32>
    %cst_160 = arith.constant 1.280000e+02 : f32
    %322 = vector.broadcast %cst_160 : f32 to vector<16x1xf32>
    %323 = arith.divf %317, %322 : vector<16x1xf32>
    %cst_161 = arith.constant 1.280000e+02 : f32
    %324 = vector.broadcast %cst_161 : f32 to vector<16x1xf32>
    %325 = arith.divf %321, %324 : vector<16x1xf32>
    %326 = arith.mulf %323, %323 : vector<16x1xf32>
    %327 = arith.subf %325, %326 : vector<16x1xf32>
    %cst_162 = arith.constant 9.99999974E-6 : f32
    %328 = vector.broadcast %cst_162 : f32 to vector<16x1xf32>
    %329 = arith.addf %327, %328 : vector<16x1xf32>
    %330 = math.rsqrt %329 : vector<16x1xf32>
    %c0_163 = arith.constant 0 : index
    %c0_164 = arith.constant 0 : index
    %331 = vector.load %arg2[%c0_163, %c0_164] : memref<16x1xf32, #tpu.memory_space<vmem>>, vector<16x1xf32>
    %332 = arith.mulf %330, %331 : vector<16x1xf32>
    %c0_165 = arith.constant 0 : index
    %c0_166 = arith.constant 0 : index
    %333 = vector.load %arg3[%c0_165, %c0_166] : memref<16x1xf32, #tpu.memory_space<vmem>>, vector<16x1xf32>
    %334 = arith.mulf %323, %332 : vector<16x1xf32>
    %335 = arith.subf %333, %334 : vector<16x1xf32>
    %336 = vector.broadcast %332 : vector<16x1xf32> to vector<16x32xf32>
    %337 = arith.mulf %105, %336 : vector<16x32xf32>
    %338 = vector.broadcast %335 : vector<16x1xf32> to vector<16x32xf32>
    %339 = arith.addf %337, %338 : vector<16x32xf32>
    %340 = vector.broadcast %332 : vector<16x1xf32> to vector<16x32xf32>
    %341 = arith.mulf %176, %340 : vector<16x32xf32>
    %342 = vector.broadcast %335 : vector<16x1xf32> to vector<16x32xf32>
    %343 = arith.addf %341, %342 : vector<16x32xf32>
    %344 = vector.broadcast %332 : vector<16x1xf32> to vector<16x32xf32>
    %345 = arith.mulf %247, %344 : vector<16x32xf32>
    %346 = vector.broadcast %335 : vector<16x1xf32> to vector<16x32xf32>
    %347 = arith.addf %345, %346 : vector<16x32xf32>
    %348 = vector.broadcast %332 : vector<16x1xf32> to vector<16x32xf32>
    %349 = arith.mulf %291, %348 : vector<16x32xf32>
    %350 = vector.broadcast %335 : vector<16x1xf32> to vector<16x32xf32>
    %351 = arith.addf %349, %350 : vector<16x32xf32>
    %cst_167 = arith.constant 0.000000e+00 : f32
    %352 = vector.broadcast %cst_167 : f32 to vector<16x32xf32>
    %353 = arith.maximumf %339, %352 : vector<16x32xf32>
    %c0_168 = arith.constant 0 : index
    %c0_169 = arith.constant 0 : index
    %c0_170 = arith.constant 0 : index
    %354 = vector.load %arg4[%c0_168, %c0_169, %c0_170] : memref<4x16x32xf32, #tpu.memory_space<vmem>>, vector<1x16x32xf32>
    %355 = vector.shape_cast %354 : vector<1x16x32xf32> to vector<16x32xf32>
    %356 = vector.shape_cast %353 : vector<16x32xf32> to vector<1x16x32xf32>
    tpu.vector_store %arg4[%c0_168, %c0_169, %c0_170], %356 {strides = array<i32>} : memref<4x16x32xf32, #tpu.memory_space<vmem>>, vector<1x16x32xf32>,
    %cst_171 = arith.constant 0.000000e+00 : f32
    %357 = vector.broadcast %cst_171 : f32 to vector<16x32xf32>
    %358 = arith.maximumf %343, %357 : vector<16x32xf32>
    %c1_172 = arith.constant 1 : index
    %c0_173 = arith.constant 0 : index
    %c0_174 = arith.constant 0 : index
    %359 = vector.load %arg4[%c1_172, %c0_173, %c0_174] : memref<4x16x32xf32, #tpu.memory_space<vmem>>, vector<1x16x32xf32>
    %360 = vector.shape_cast %359 : vector<1x16x32xf32> to vector<16x32xf32>
    %361 = vector.shape_cast %358 : vector<16x32xf32> to vector<1x16x32xf32>
    tpu.vector_store %arg4[%c1_172, %c0_173, %c0_174], %361 {strides = array<i32>} : memref<4x16x32xf32, #tpu.memory_space<vmem>>, vector<1x16x32xf32>,
    %cst_175 = arith.constant 0.000000e+00 : f32
    %362 = vector.broadcast %cst_175 : f32 to vector<16x32xf32>
    %363 = arith.maximumf %347, %362 : vector<16x32xf32>
    %c2_176 = arith.constant 2 : index
    %c0_177 = arith.constant 0 : index
    %c0_178 = arith.constant 0 : index
    %364 = vector.load %arg4[%c2_176, %c0_177, %c0_178] : memref<4x16x32xf32, #tpu.memory_space<vmem>>, vector<1x16x32xf32>
    %365 = vector.shape_cast %364 : vector<1x16x32xf32> to vector<16x32xf32>
    %366 = vector.shape_cast %363 : vector<16x32xf32> to vector<1x16x32xf32>
    tpu.vector_store %arg4[%c2_176, %c0_177, %c0_178], %366 {strides = array<i32>} : memref<4x16x32xf32, #tpu.memory_space<vmem>>, vector<1x16x32xf32>,
    %cst_179 = arith.constant 0.000000e+00 : f32
    %367 = vector.broadcast %cst_179 : f32 to vector<16x32xf32>
    %368 = arith.maximumf %351, %367 : vector<16x32xf32>
    %c3_180 = arith.constant 3 : index
    %c0_181 = arith.constant 0 : index
    %c0_182 = arith.constant 0 : index
    %369 = vector.load %arg4[%c3_180, %c0_181, %c0_182] : memref<4x16x32xf32, #tpu.memory_space<vmem>>, vector<1x16x32xf32>
    %370 = vector.shape_cast %369 : vector<1x16x32xf32> to vector<16x32xf32>
    %371 = vector.shape_cast %368 : vector<16x32xf32> to vector<1x16x32xf32>
    tpu.vector_store %arg4[%c3_180, %c0_181, %c0_182], %371 {strides = array<i32>} : memref<4x16x32xf32, #tpu.memory_space<vmem>>, vector<1x16x32xf32>,
    return
  }
}

module attributes {stable_mosaic.version = 11 : i64} {
  func.func @_convt_phase_kernel(%arg0: memref<16x128xbf16, #tpu.memory_space<vmem>>, %arg1: memref<4x4x8x16xbf16, #tpu.memory_space<vmem>>, %arg2: memref<8x1xf32, #tpu.memory_space<vmem>>, %arg3: memref<8x1xf32, #tpu.memory_space<vmem>>, %arg4: memref<4x8x128xf32, #tpu.memory_space<vmem>>) attributes {dimension_semantics = [], scalar_prefetch = 0 : i64, scratch_operands = 0 : i64, tpu.core_type = #tpu.core_type<tc>} {
    %c0 = arith.constant 0 : index
    %c0_0 = arith.constant 0 : index
    %0 = vector.load %arg0[%c0, %c0_0] : memref<16x128xbf16, #tpu.memory_space<vmem>>, vector<16x128xbf16>
    %1 = tpu.iota {dimensions = array<i32: 1>} : vector<1x128xi32>
    %c7_i32 = arith.constant 7 : i32
    %2 = vector.broadcast %c7_i32 : i32 to vector<1x128xi32>
    %3 = arith.andi %1, %2 : vector<1x128xi32>
    %c3_i32 = arith.constant 3 : i32
    %4 = vector.broadcast %c3_i32 : i32 to vector<1x128xi32>
    %5 = arith.shrsi %1, %4 : vector<1x128xi32>
    %c7_i32_1 = arith.constant 7 : i32
    %6 = vector.broadcast %c7_i32_1 : i32 to vector<1x128xi32>
    %7 = arith.andi %5, %6 : vector<1x128xi32>
    %cst = arith.constant 0.000000e+00 : f32
    %8 = vector.broadcast %cst : f32 to vector<8x128xf32>
    %c0_2 = arith.constant 0 : index
    %c0_3 = arith.constant 0 : index
    %c0_4 = arith.constant 0 : index
    %c0_5 = arith.constant 0 : index
    %9 = vector.load %arg1[%c0_2, %c0_3, %c0_4, %c0_5] : memref<4x4x8x16xbf16, #tpu.memory_space<vmem>>, vector<1x1x8x16xbf16>
    %10 = vector.shape_cast %9 : vector<1x1x8x16xbf16> to vector<8x16xbf16>
    %cst_6 = arith.constant 0.000000e+00 : bf16
    %11 = vector.broadcast %cst_6 : bf16 to vector<16x9xbf16>
    %12 = vector.extract_strided_slice %0 {offsets = [0, 0], sizes = [16, 119], strides = [1, 1]} : vector<16x128xbf16> to vector<16x119xbf16>
    %13 = tpu.concatenate %11, %12 in 1 : vector<16x9xbf16>, vector<16x119xbf16> -> vector<16x128xbf16>
    %c-1_i32 = arith.constant -1 : i32
    %14 = vector.broadcast %c-1_i32 : i32 to vector<1x128xi32>
    %15 = arith.addi %3, %14 : vector<1x128xi32>
    %c0_i32 = arith.constant 0 : i32
    %16 = vector.broadcast %c0_i32 : i32 to vector<1x128xi32>
    %17 = arith.cmpi sge, %15, %16 : vector<1x128xi32>
    %c-1_i32_7 = arith.constant -1 : i32
    %18 = vector.broadcast %c-1_i32_7 : i32 to vector<1x128xi32>
    %19 = arith.addi %3, %18 : vector<1x128xi32>
    %c8_i32 = arith.constant 8 : i32
    %20 = vector.broadcast %c8_i32 : i32 to vector<1x128xi32>
    %21 = arith.cmpi slt, %19, %20 : vector<1x128xi32>
    %22 = arith.andi %17, %21 : vector<1x128xi1>
    %c-1_i32_8 = arith.constant -1 : i32
    %23 = vector.broadcast %c-1_i32_8 : i32 to vector<1x128xi32>
    %24 = arith.addi %7, %23 : vector<1x128xi32>
    %c0_i32_9 = arith.constant 0 : i32
    %25 = vector.broadcast %c0_i32_9 : i32 to vector<1x128xi32>
    %26 = arith.cmpi sge, %24, %25 : vector<1x128xi32>
    %27 = arith.andi %22, %26 : vector<1x128xi1>
    %c-1_i32_10 = arith.constant -1 : i32
    %28 = vector.broadcast %c-1_i32_10 : i32 to vector<1x128xi32>
    %29 = arith.addi %7, %28 : vector<1x128xi32>
    %c8_i32_11 = arith.constant 8 : i32
    %30 = vector.broadcast %c8_i32_11 : i32 to vector<1x128xi32>
    %31 = arith.cmpi slt, %29, %30 : vector<1x128xi32>
    %32 = arith.andi %27, %31 : vector<1x128xi1>
    %33 = arith.extui %32 : vector<1x128xi1> to vector<1x128xi32>
    %34 = arith.sitofp %33 : vector<1x128xi32> to vector<1x128xf32>
    %35 = arith.truncf %34 : vector<1x128xf32> to vector<1x128xbf16>
    %36 = vector.broadcast %35 : vector<1x128xbf16> to vector<16x128xbf16>
    %37 = arith.mulf %13, %36 : vector<16x128xbf16>
    %cst_12 = arith.constant dense<0.000000e+00> : vector<8x128xf32>
    %38 = tpu.matmul %10, %37, %cst_12 {dimension_numbers = #tpu.dot_dimension_numbers<[1], [0], [0], [1], [0, 0, 1, 1], [], []>} : vector<8x16xbf16>, vector<16x128xbf16>, vector<8x128xf32> -> vector<8x128xf32>
    %39 = arith.addf %8, %38 : vector<8x128xf32>
    %c0_13 = arith.constant 0 : index
    %c1 = arith.constant 1 : index
    %c0_14 = arith.constant 0 : index
    %c0_15 = arith.constant 0 : index
    %40 = vector.load %arg1[%c0_13, %c1, %c0_14, %c0_15] : memref<4x4x8x16xbf16, #tpu.memory_space<vmem>>, vector<1x1x8x16xbf16>
    %41 = vector.shape_cast %40 : vector<1x1x8x16xbf16> to vector<8x16xbf16>
    %cst_16 = arith.constant 0.000000e+00 : bf16
    %42 = vector.broadcast %cst_16 : bf16 to vector<16x8xbf16>
    %43 = vector.extract_strided_slice %0 {offsets = [0, 0], sizes = [16, 120], strides = [1, 1]} : vector<16x128xbf16> to vector<16x120xbf16>
    %44 = tpu.concatenate %42, %43 in 1 : vector<16x8xbf16>, vector<16x120xbf16> -> vector<16x128xbf16>
    %c0_i32_17 = arith.constant 0 : i32
    %45 = vector.broadcast %c0_i32_17 : i32 to vector<1x128xi32>
    %46 = arith.addi %3, %45 : vector<1x128xi32>
    %c0_i32_18 = arith.constant 0 : i32
    %47 = vector.broadcast %c0_i32_18 : i32 to vector<1x128xi32>
    %48 = arith.cmpi sge, %46, %47 : vector<1x128xi32>
    %c0_i32_19 = arith.constant 0 : i32
    %49 = vector.broadcast %c0_i32_19 : i32 to vector<1x128xi32>
    %50 = arith.addi %3, %49 : vector<1x128xi32>
    %c8_i32_20 = arith.constant 8 : i32
    %51 = vector.broadcast %c8_i32_20 : i32 to vector<1x128xi32>
    %52 = arith.cmpi slt, %50, %51 : vector<1x128xi32>
    %53 = arith.andi %48, %52 : vector<1x128xi1>
    %c-1_i32_21 = arith.constant -1 : i32
    %54 = vector.broadcast %c-1_i32_21 : i32 to vector<1x128xi32>
    %55 = arith.addi %7, %54 : vector<1x128xi32>
    %c0_i32_22 = arith.constant 0 : i32
    %56 = vector.broadcast %c0_i32_22 : i32 to vector<1x128xi32>
    %57 = arith.cmpi sge, %55, %56 : vector<1x128xi32>
    %58 = arith.andi %53, %57 : vector<1x128xi1>
    %c-1_i32_23 = arith.constant -1 : i32
    %59 = vector.broadcast %c-1_i32_23 : i32 to vector<1x128xi32>
    %60 = arith.addi %7, %59 : vector<1x128xi32>
    %c8_i32_24 = arith.constant 8 : i32
    %61 = vector.broadcast %c8_i32_24 : i32 to vector<1x128xi32>
    %62 = arith.cmpi slt, %60, %61 : vector<1x128xi32>
    %63 = arith.andi %58, %62 : vector<1x128xi1>
    %64 = arith.extui %63 : vector<1x128xi1> to vector<1x128xi32>
    %65 = arith.sitofp %64 : vector<1x128xi32> to vector<1x128xf32>
    %66 = arith.truncf %65 : vector<1x128xf32> to vector<1x128xbf16>
    %67 = vector.broadcast %66 : vector<1x128xbf16> to vector<16x128xbf16>
    %68 = arith.mulf %44, %67 : vector<16x128xbf16>
    %cst_25 = arith.constant dense<0.000000e+00> : vector<8x128xf32>
    %69 = tpu.matmul %41, %68, %cst_25 {dimension_numbers = #tpu.dot_dimension_numbers<[1], [0], [0], [1], [0, 0, 1, 1], [], []>} : vector<8x16xbf16>, vector<16x128xbf16>, vector<8x128xf32> -> vector<8x128xf32>
    %70 = arith.addf %39, %69 : vector<8x128xf32>
    %c0_26 = arith.constant 0 : index
    %c2 = arith.constant 2 : index
    %c0_27 = arith.constant 0 : index
    %c0_28 = arith.constant 0 : index
    %71 = vector.load %arg1[%c0_26, %c2, %c0_27, %c0_28] : memref<4x4x8x16xbf16, #tpu.memory_space<vmem>>, vector<1x1x8x16xbf16>
    %72 = vector.shape_cast %71 : vector<1x1x8x16xbf16> to vector<8x16xbf16>
    %cst_29 = arith.constant 0.000000e+00 : bf16
    %73 = vector.broadcast %cst_29 : bf16 to vector<16x1xbf16>
    %74 = vector.extract_strided_slice %0 {offsets = [0, 0], sizes = [16, 127], strides = [1, 1]} : vector<16x128xbf16> to vector<16x127xbf16>
    %75 = tpu.concatenate %73, %74 in 1 : vector<16x1xbf16>, vector<16x127xbf16> -> vector<16x128xbf16>
    %c-1_i32_30 = arith.constant -1 : i32
    %76 = vector.broadcast %c-1_i32_30 : i32 to vector<1x128xi32>
    %77 = arith.addi %3, %76 : vector<1x128xi32>
    %c0_i32_31 = arith.constant 0 : i32
    %78 = vector.broadcast %c0_i32_31 : i32 to vector<1x128xi32>
    %79 = arith.cmpi sge, %77, %78 : vector<1x128xi32>
    %c-1_i32_32 = arith.constant -1 : i32
    %80 = vector.broadcast %c-1_i32_32 : i32 to vector<1x128xi32>
    %81 = arith.addi %3, %80 : vector<1x128xi32>
    %c8_i32_33 = arith.constant 8 : i32
    %82 = vector.broadcast %c8_i32_33 : i32 to vector<1x128xi32>
    %83 = arith.cmpi slt, %81, %82 : vector<1x128xi32>
    %84 = arith.andi %79, %83 : vector<1x128xi1>
    %c0_i32_34 = arith.constant 0 : i32
    %85 = vector.broadcast %c0_i32_34 : i32 to vector<1x128xi32>
    %86 = arith.addi %7, %85 : vector<1x128xi32>
    %c0_i32_35 = arith.constant 0 : i32
    %87 = vector.broadcast %c0_i32_35 : i32 to vector<1x128xi32>
    %88 = arith.cmpi sge, %86, %87 : vector<1x128xi32>
    %89 = arith.andi %84, %88 : vector<1x128xi1>
    %c0_i32_36 = arith.constant 0 : i32
    %90 = vector.broadcast %c0_i32_36 : i32 to vector<1x128xi32>
    %91 = arith.addi %7, %90 : vector<1x128xi32>
    %c8_i32_37 = arith.constant 8 : i32
    %92 = vector.broadcast %c8_i32_37 : i32 to vector<1x128xi32>
    %93 = arith.cmpi slt, %91, %92 : vector<1x128xi32>
    %94 = arith.andi %89, %93 : vector<1x128xi1>
    %95 = arith.extui %94 : vector<1x128xi1> to vector<1x128xi32>
    %96 = arith.sitofp %95 : vector<1x128xi32> to vector<1x128xf32>
    %97 = arith.truncf %96 : vector<1x128xf32> to vector<1x128xbf16>
    %98 = vector.broadcast %97 : vector<1x128xbf16> to vector<16x128xbf16>
    %99 = arith.mulf %75, %98 : vector<16x128xbf16>
    %cst_38 = arith.constant dense<0.000000e+00> : vector<8x128xf32>
    %100 = tpu.matmul %72, %99, %cst_38 {dimension_numbers = #tpu.dot_dimension_numbers<[1], [0], [0], [1], [0, 0, 1, 1], [], []>} : vector<8x16xbf16>, vector<16x128xbf16>, vector<8x128xf32> -> vector<8x128xf32>
    %101 = arith.addf %70, %100 : vector<8x128xf32>
    %c0_39 = arith.constant 0 : index
    %c3 = arith.constant 3 : index
    %c0_40 = arith.constant 0 : index
    %c0_41 = arith.constant 0 : index
    %102 = vector.load %arg1[%c0_39, %c3, %c0_40, %c0_41] : memref<4x4x8x16xbf16, #tpu.memory_space<vmem>>, vector<1x1x8x16xbf16>
    %103 = vector.shape_cast %102 : vector<1x1x8x16xbf16> to vector<8x16xbf16>
    %cst_42 = arith.constant dense<0.000000e+00> : vector<8x128xf32>
    %104 = tpu.matmul %103, %0, %cst_42 {dimension_numbers = #tpu.dot_dimension_numbers<[1], [0], [0], [1], [0, 0, 1, 1], [], []>} : vector<8x16xbf16>, vector<16x128xbf16>, vector<8x128xf32> -> vector<8x128xf32>
    %105 = arith.addf %101, %104 : vector<8x128xf32>
    %cst_43 = arith.constant 0.000000e+00 : f32
    %106 = vector.broadcast %cst_43 : f32 to vector<8x128xf32>
    %c1_44 = arith.constant 1 : index
    %c0_45 = arith.constant 0 : index
    %c0_46 = arith.constant 0 : index
    %c0_47 = arith.constant 0 : index
    %107 = vector.load %arg1[%c1_44, %c0_45, %c0_46, %c0_47] : memref<4x4x8x16xbf16, #tpu.memory_space<vmem>>, vector<1x1x8x16xbf16>
    %108 = vector.shape_cast %107 : vector<1x1x8x16xbf16> to vector<8x16xbf16>
    %cst_48 = arith.constant dense<0.000000e+00> : vector<8x128xf32>
    %109 = tpu.matmul %108, %68, %cst_48 {dimension_numbers = #tpu.dot_dimension_numbers<[1], [0], [0], [1], [0, 0, 1, 1], [], []>} : vector<8x16xbf16>, vector<16x128xbf16>, vector<8x128xf32> -> vector<8x128xf32>
    %110 = arith.addf %106, %109 : vector<8x128xf32>
    %c1_49 = arith.constant 1 : index
    %c1_50 = arith.constant 1 : index
    %c0_51 = arith.constant 0 : index
    %c0_52 = arith.constant 0 : index
    %111 = vector.load %arg1[%c1_49, %c1_50, %c0_51, %c0_52] : memref<4x4x8x16xbf16, #tpu.memory_space<vmem>>, vector<1x1x8x16xbf16>
    %112 = vector.shape_cast %111 : vector<1x1x8x16xbf16> to vector<8x16xbf16>
    %cst_53 = arith.constant 0.000000e+00 : bf16
    %113 = vector.broadcast %cst_53 : bf16 to vector<16x7xbf16>
    %114 = vector.extract_strided_slice %0 {offsets = [0, 0], sizes = [16, 121], strides = [1, 1]} : vector<16x128xbf16> to vector<16x121xbf16>
    %115 = tpu.concatenate %113, %114 in 1 : vector<16x7xbf16>, vector<16x121xbf16> -> vector<16x128xbf16>
    %c1_i32 = arith.constant 1 : i32
    %116 = vector.broadcast %c1_i32 : i32 to vector<1x128xi32>
    %117 = arith.addi %3, %116 : vector<1x128xi32>
    %c0_i32_54 = arith.constant 0 : i32
    %118 = vector.broadcast %c0_i32_54 : i32 to vector<1x128xi32>
    %119 = arith.cmpi sge, %117, %118 : vector<1x128xi32>
    %c1_i32_55 = arith.constant 1 : i32
    %120 = vector.broadcast %c1_i32_55 : i32 to vector<1x128xi32>
    %121 = arith.addi %3, %120 : vector<1x128xi32>
    %c8_i32_56 = arith.constant 8 : i32
    %122 = vector.broadcast %c8_i32_56 : i32 to vector<1x128xi32>
    %123 = arith.cmpi slt, %121, %122 : vector<1x128xi32>
    %124 = arith.andi %119, %123 : vector<1x128xi1>
    %c-1_i32_57 = arith.constant -1 : i32
    %125 = vector.broadcast %c-1_i32_57 : i32 to vector<1x128xi32>
    %126 = arith.addi %7, %125 : vector<1x128xi32>
    %c0_i32_58 = arith.constant 0 : i32
    %127 = vector.broadcast %c0_i32_58 : i32 to vector<1x128xi32>
    %128 = arith.cmpi sge, %126, %127 : vector<1x128xi32>
    %129 = arith.andi %124, %128 : vector<1x128xi1>
    %c-1_i32_59 = arith.constant -1 : i32
    %130 = vector.broadcast %c-1_i32_59 : i32 to vector<1x128xi32>
    %131 = arith.addi %7, %130 : vector<1x128xi32>
    %c8_i32_60 = arith.constant 8 : i32
    %132 = vector.broadcast %c8_i32_60 : i32 to vector<1x128xi32>
    %133 = arith.cmpi slt, %131, %132 : vector<1x128xi32>
    %134 = arith.andi %129, %133 : vector<1x128xi1>
    %135 = arith.extui %134 : vector<1x128xi1> to vector<1x128xi32>
    %136 = arith.sitofp %135 : vector<1x128xi32> to vector<1x128xf32>
    %137 = arith.truncf %136 : vector<1x128xf32> to vector<1x128xbf16>
    %138 = vector.broadcast %137 : vector<1x128xbf16> to vector<16x128xbf16>
    %139 = arith.mulf %115, %138 : vector<16x128xbf16>
    %cst_61 = arith.constant dense<0.000000e+00> : vector<8x128xf32>
    %140 = tpu.matmul %112, %139, %cst_61 {dimension_numbers = #tpu.dot_dimension_numbers<[1], [0], [0], [1], [0, 0, 1, 1], [], []>} : vector<8x16xbf16>, vector<16x128xbf16>, vector<8x128xf32> -> vector<8x128xf32>
    %141 = arith.addf %110, %140 : vector<8x128xf32>
    %c1_62 = arith.constant 1 : index
    %c2_63 = arith.constant 2 : index
    %c0_64 = arith.constant 0 : index
    %c0_65 = arith.constant 0 : index
    %142 = vector.load %arg1[%c1_62, %c2_63, %c0_64, %c0_65] : memref<4x4x8x16xbf16, #tpu.memory_space<vmem>>, vector<1x1x8x16xbf16>
    %143 = vector.shape_cast %142 : vector<1x1x8x16xbf16> to vector<8x16xbf16>
    %cst_66 = arith.constant dense<0.000000e+00> : vector<8x128xf32>
    %144 = tpu.matmul %143, %0, %cst_66 {dimension_numbers = #tpu.dot_dimension_numbers<[1], [0], [0], [1], [0, 0, 1, 1], [], []>} : vector<8x16xbf16>, vector<16x128xbf16>, vector<8x128xf32> -> vector<8x128xf32>
    %145 = arith.addf %141, %144 : vector<8x128xf32>
    %c1_67 = arith.constant 1 : index
    %c3_68 = arith.constant 3 : index
    %c0_69 = arith.constant 0 : index
    %c0_70 = arith.constant 0 : index
    %146 = vector.load %arg1[%c1_67, %c3_68, %c0_69, %c0_70] : memref<4x4x8x16xbf16, #tpu.memory_space<vmem>>, vector<1x1x8x16xbf16>
    %147 = vector.shape_cast %146 : vector<1x1x8x16xbf16> to vector<8x16xbf16>
    %148 = vector.extract_strided_slice %0 {offsets = [0, 1], sizes = [16, 127], strides = [1, 1]} : vector<16x128xbf16> to vector<16x127xbf16>
    %cst_71 = arith.constant 0.000000e+00 : bf16
    %149 = vector.broadcast %cst_71 : bf16 to vector<16x1xbf16>
    %150 = tpu.concatenate %148, %149 in 1 : vector<16x127xbf16>, vector<16x1xbf16> -> vector<16x128xbf16>
    %c1_i32_72 = arith.constant 1 : i32
    %151 = vector.broadcast %c1_i32_72 : i32 to vector<1x128xi32>
    %152 = arith.addi %3, %151 : vector<1x128xi32>
    %c0_i32_73 = arith.constant 0 : i32
    %153 = vector.broadcast %c0_i32_73 : i32 to vector<1x128xi32>
    %154 = arith.cmpi sge, %152, %153 : vector<1x128xi32>
    %c1_i32_74 = arith.constant 1 : i32
    %155 = vector.broadcast %c1_i32_74 : i32 to vector<1x128xi32>
    %156 = arith.addi %3, %155 : vector<1x128xi32>
    %c8_i32_75 = arith.constant 8 : i32
    %157 = vector.broadcast %c8_i32_75 : i32 to vector<1x128xi32>
    %158 = arith.cmpi slt, %156, %157 : vector<1x128xi32>
    %159 = arith.andi %154, %158 : vector<1x128xi1>
    %c0_i32_76 = arith.constant 0 : i32
    %160 = vector.broadcast %c0_i32_76 : i32 to vector<1x128xi32>
    %161 = arith.addi %7, %160 : vector<1x128xi32>
    %c0_i32_77 = arith.constant 0 : i32
    %162 = vector.broadcast %c0_i32_77 : i32 to vector<1x128xi32>
    %163 = arith.cmpi sge, %161, %162 : vector<1x128xi32>
    %164 = arith.andi %159, %163 : vector<1x128xi1>
    %c0_i32_78 = arith.constant 0 : i32
    %165 = vector.broadcast %c0_i32_78 : i32 to vector<1x128xi32>
    %166 = arith.addi %7, %165 : vector<1x128xi32>
    %c8_i32_79 = arith.constant 8 : i32
    %167 = vector.broadcast %c8_i32_79 : i32 to vector<1x128xi32>
    %168 = arith.cmpi slt, %166, %167 : vector<1x128xi32>
    %169 = arith.andi %164, %168 : vector<1x128xi1>
    %170 = arith.extui %169 : vector<1x128xi1> to vector<1x128xi32>
    %171 = arith.sitofp %170 : vector<1x128xi32> to vector<1x128xf32>
    %172 = arith.truncf %171 : vector<1x128xf32> to vector<1x128xbf16>
    %173 = vector.broadcast %172 : vector<1x128xbf16> to vector<16x128xbf16>
    %174 = arith.mulf %150, %173 : vector<16x128xbf16>
    %cst_80 = arith.constant dense<0.000000e+00> : vector<8x128xf32>
    %175 = tpu.matmul %147, %174, %cst_80 {dimension_numbers = #tpu.dot_dimension_numbers<[1], [0], [0], [1], [0, 0, 1, 1], [], []>} : vector<8x16xbf16>, vector<16x128xbf16>, vector<8x128xf32> -> vector<8x128xf32>
    %176 = arith.addf %145, %175 : vector<8x128xf32>
    %cst_81 = arith.constant 0.000000e+00 : f32
    %177 = vector.broadcast %cst_81 : f32 to vector<8x128xf32>
    %c2_82 = arith.constant 2 : index
    %c0_83 = arith.constant 0 : index
    %c0_84 = arith.constant 0 : index
    %c0_85 = arith.constant 0 : index
    %178 = vector.load %arg1[%c2_82, %c0_83, %c0_84, %c0_85] : memref<4x4x8x16xbf16, #tpu.memory_space<vmem>>, vector<1x1x8x16xbf16>
    %179 = vector.shape_cast %178 : vector<1x1x8x16xbf16> to vector<8x16xbf16>
    %cst_86 = arith.constant dense<0.000000e+00> : vector<8x128xf32>
    %180 = tpu.matmul %179, %99, %cst_86 {dimension_numbers = #tpu.dot_dimension_numbers<[1], [0], [0], [1], [0, 0, 1, 1], [], []>} : vector<8x16xbf16>, vector<16x128xbf16>, vector<8x128xf32> -> vector<8x128xf32>
    %181 = arith.addf %177, %180 : vector<8x128xf32>
    %c2_87 = arith.constant 2 : index
    %c1_88 = arith.constant 1 : index
    %c0_89 = arith.constant 0 : index
    %c0_90 = arith.constant 0 : index
    %182 = vector.load %arg1[%c2_87, %c1_88, %c0_89, %c0_90] : memref<4x4x8x16xbf16, #tpu.memory_space<vmem>>, vector<1x1x8x16xbf16>
    %183 = vector.shape_cast %182 : vector<1x1x8x16xbf16> to vector<8x16xbf16>
    %cst_91 = arith.constant dense<0.000000e+00> : vector<8x128xf32>
    %184 = tpu.matmul %183, %0, %cst_91 {dimension_numbers = #tpu.dot_dimension_numbers<[1], [0], [0], [1], [0, 0, 1, 1], [], []>} : vector<8x16xbf16>, vector<16x128xbf16>, vector<8x128xf32> -> vector<8x128xf32>
    %185 = arith.addf %181, %184 : vector<8x128xf32>
    %c2_92 = arith.constant 2 : index
    %c2_93 = arith.constant 2 : index
    %c0_94 = arith.constant 0 : index
    %c0_95 = arith.constant 0 : index
    %186 = vector.load %arg1[%c2_92, %c2_93, %c0_94, %c0_95] : memref<4x4x8x16xbf16, #tpu.memory_space<vmem>>, vector<1x1x8x16xbf16>
    %187 = vector.shape_cast %186 : vector<1x1x8x16xbf16> to vector<8x16xbf16>
    %188 = vector.extract_strided_slice %0 {offsets = [0, 7], sizes = [16, 121], strides = [1, 1]} : vector<16x128xbf16> to vector<16x121xbf16>
    %cst_96 = arith.constant 0.000000e+00 : bf16
    %189 = vector.broadcast %cst_96 : bf16 to vector<16x7xbf16>
    %190 = tpu.concatenate %188, %189 in 1 : vector<16x121xbf16>, vector<16x7xbf16> -> vector<16x128xbf16>
    %c-1_i32_97 = arith.constant -1 : i32
    %191 = vector.broadcast %c-1_i32_97 : i32 to vector<1x128xi32>
    %192 = arith.addi %3, %191 : vector<1x128xi32>
    %c0_i32_98 = arith.constant 0 : i32
    %193 = vector.broadcast %c0_i32_98 : i32 to vector<1x128xi32>
    %194 = arith.cmpi sge, %192, %193 : vector<1x128xi32>
    %c-1_i32_99 = arith.constant -1 : i32
    %195 = vector.broadcast %c-1_i32_99 : i32 to vector<1x128xi32>
    %196 = arith.addi %3, %195 : vector<1x128xi32>
    %c8_i32_100 = arith.constant 8 : i32
    %197 = vector.broadcast %c8_i32_100 : i32 to vector<1x128xi32>
    %198 = arith.cmpi slt, %196, %197 : vector<1x128xi32>
    %199 = arith.andi %194, %198 : vector<1x128xi1>
    %c1_i32_101 = arith.constant 1 : i32
    %200 = vector.broadcast %c1_i32_101 : i32 to vector<1x128xi32>
    %201 = arith.addi %7, %200 : vector<1x128xi32>
    %c0_i32_102 = arith.constant 0 : i32
    %202 = vector.broadcast %c0_i32_102 : i32 to vector<1x128xi32>
    %203 = arith.cmpi sge, %201, %202 : vector<1x128xi32>
    %204 = arith.andi %199, %203 : vector<1x128xi1>
    %c1_i32_103 = arith.constant 1 : i32
    %205 = vector.broadcast %c1_i32_103 : i32 to vector<1x128xi32>
    %206 = arith.addi %7, %205 : vector<1x128xi32>
    %c8_i32_104 = arith.constant 8 : i32
    %207 = vector.broadcast %c8_i32_104 : i32 to vector<1x128xi32>
    %208 = arith.cmpi slt, %206, %207 : vector<1x128xi32>
    %209 = arith.andi %204, %208 : vector<1x128xi1>
    %210 = arith.extui %209 : vector<1x128xi1> to vector<1x128xi32>
    %211 = arith.sitofp %210 : vector<1x128xi32> to vector<1x128xf32>
    %212 = arith.truncf %211 : vector<1x128xf32> to vector<1x128xbf16>
    %213 = vector.broadcast %212 : vector<1x128xbf16> to vector<16x128xbf16>
    %214 = arith.mulf %190, %213 : vector<16x128xbf16>
    %cst_105 = arith.constant dense<0.000000e+00> : vector<8x128xf32>
    %215 = tpu.matmul %187, %214, %cst_105 {dimension_numbers = #tpu.dot_dimension_numbers<[1], [0], [0], [1], [0, 0, 1, 1], [], []>} : vector<8x16xbf16>, vector<16x128xbf16>, vector<8x128xf32> -> vector<8x128xf32>
    %216 = arith.addf %185, %215 : vector<8x128xf32>
    %c2_106 = arith.constant 2 : index
    %c3_107 = arith.constant 3 : index
    %c0_108 = arith.constant 0 : index
    %c0_109 = arith.constant 0 : index
    %217 = vector.load %arg1[%c2_106, %c3_107, %c0_108, %c0_109] : memref<4x4x8x16xbf16, #tpu.memory_space<vmem>>, vector<1x1x8x16xbf16>
    %218 = vector.shape_cast %217 : vector<1x1x8x16xbf16> to vector<8x16xbf16>
    %219 = vector.extract_strided_slice %0 {offsets = [0, 8], sizes = [16, 120], strides = [1, 1]} : vector<16x128xbf16> to vector<16x120xbf16>
    %cst_110 = arith.constant 0.000000e+00 : bf16
    %220 = vector.broadcast %cst_110 : bf16 to vector<16x8xbf16>
    %221 = tpu.concatenate %219, %220 in 1 : vector<16x120xbf16>, vector<16x8xbf16> -> vector<16x128xbf16>
    %c0_i32_111 = arith.constant 0 : i32
    %222 = vector.broadcast %c0_i32_111 : i32 to vector<1x128xi32>
    %223 = arith.addi %3, %222 : vector<1x128xi32>
    %c0_i32_112 = arith.constant 0 : i32
    %224 = vector.broadcast %c0_i32_112 : i32 to vector<1x128xi32>
    %225 = arith.cmpi sge, %223, %224 : vector<1x128xi32>
    %c0_i32_113 = arith.constant 0 : i32
    %226 = vector.broadcast %c0_i32_113 : i32 to vector<1x128xi32>
    %227 = arith.addi %3, %226 : vector<1x128xi32>
    %c8_i32_114 = arith.constant 8 : i32
    %228 = vector.broadcast %c8_i32_114 : i32 to vector<1x128xi32>
    %229 = arith.cmpi slt, %227, %228 : vector<1x128xi32>
    %230 = arith.andi %225, %229 : vector<1x128xi1>
    %c1_i32_115 = arith.constant 1 : i32
    %231 = vector.broadcast %c1_i32_115 : i32 to vector<1x128xi32>
    %232 = arith.addi %7, %231 : vector<1x128xi32>
    %c0_i32_116 = arith.constant 0 : i32
    %233 = vector.broadcast %c0_i32_116 : i32 to vector<1x128xi32>
    %234 = arith.cmpi sge, %232, %233 : vector<1x128xi32>
    %235 = arith.andi %230, %234 : vector<1x128xi1>
    %c1_i32_117 = arith.constant 1 : i32
    %236 = vector.broadcast %c1_i32_117 : i32 to vector<1x128xi32>
    %237 = arith.addi %7, %236 : vector<1x128xi32>
    %c8_i32_118 = arith.constant 8 : i32
    %238 = vector.broadcast %c8_i32_118 : i32 to vector<1x128xi32>
    %239 = arith.cmpi slt, %237, %238 : vector<1x128xi32>
    %240 = arith.andi %235, %239 : vector<1x128xi1>
    %241 = arith.extui %240 : vector<1x128xi1> to vector<1x128xi32>
    %242 = arith.sitofp %241 : vector<1x128xi32> to vector<1x128xf32>
    %243 = arith.truncf %242 : vector<1x128xf32> to vector<1x128xbf16>
    %244 = vector.broadcast %243 : vector<1x128xbf16> to vector<16x128xbf16>
    %245 = arith.mulf %221, %244 : vector<16x128xbf16>
    %cst_119 = arith.constant dense<0.000000e+00> : vector<8x128xf32>
    %246 = tpu.matmul %218, %245, %cst_119 {dimension_numbers = #tpu.dot_dimension_numbers<[1], [0], [0], [1], [0, 0, 1, 1], [], []>} : vector<8x16xbf16>, vector<16x128xbf16>, vector<8x128xf32> -> vector<8x128xf32>
    %247 = arith.addf %216, %246 : vector<8x128xf32>
    %cst_120 = arith.constant 0.000000e+00 : f32
    %248 = vector.broadcast %cst_120 : f32 to vector<8x128xf32>
    %c3_121 = arith.constant 3 : index
    %c0_122 = arith.constant 0 : index
    %c0_123 = arith.constant 0 : index
    %c0_124 = arith.constant 0 : index
    %249 = vector.load %arg1[%c3_121, %c0_122, %c0_123, %c0_124] : memref<4x4x8x16xbf16, #tpu.memory_space<vmem>>, vector<1x1x8x16xbf16>
    %250 = vector.shape_cast %249 : vector<1x1x8x16xbf16> to vector<8x16xbf16>
    %cst_125 = arith.constant dense<0.000000e+00> : vector<8x128xf32>
    %251 = tpu.matmul %250, %0, %cst_125 {dimension_numbers = #tpu.dot_dimension_numbers<[1], [0], [0], [1], [0, 0, 1, 1], [], []>} : vector<8x16xbf16>, vector<16x128xbf16>, vector<8x128xf32> -> vector<8x128xf32>
    %252 = arith.addf %248, %251 : vector<8x128xf32>
    %c3_126 = arith.constant 3 : index
    %c1_127 = arith.constant 1 : index
    %c0_128 = arith.constant 0 : index
    %c0_129 = arith.constant 0 : index
    %253 = vector.load %arg1[%c3_126, %c1_127, %c0_128, %c0_129] : memref<4x4x8x16xbf16, #tpu.memory_space<vmem>>, vector<1x1x8x16xbf16>
    %254 = vector.shape_cast %253 : vector<1x1x8x16xbf16> to vector<8x16xbf16>
    %cst_130 = arith.constant dense<0.000000e+00> : vector<8x128xf32>
    %255 = tpu.matmul %254, %174, %cst_130 {dimension_numbers = #tpu.dot_dimension_numbers<[1], [0], [0], [1], [0, 0, 1, 1], [], []>} : vector<8x16xbf16>, vector<16x128xbf16>, vector<8x128xf32> -> vector<8x128xf32>
    %256 = arith.addf %252, %255 : vector<8x128xf32>
    %c3_131 = arith.constant 3 : index
    %c2_132 = arith.constant 2 : index
    %c0_133 = arith.constant 0 : index
    %c0_134 = arith.constant 0 : index
    %257 = vector.load %arg1[%c3_131, %c2_132, %c0_133, %c0_134] : memref<4x4x8x16xbf16, #tpu.memory_space<vmem>>, vector<1x1x8x16xbf16>
    %258 = vector.shape_cast %257 : vector<1x1x8x16xbf16> to vector<8x16xbf16>
    %cst_135 = arith.constant dense<0.000000e+00> : vector<8x128xf32>
    %259 = tpu.matmul %258, %245, %cst_135 {dimension_numbers = #tpu.dot_dimension_numbers<[1], [0], [0], [1], [0, 0, 1, 1], [], []>} : vector<8x16xbf16>, vector<16x128xbf16>, vector<8x128xf32> -> vector<8x128xf32>
    %260 = arith.addf %256, %259 : vector<8x128xf32>
    %c3_136 = arith.constant 3 : index
    %c3_137 = arith.constant 3 : index
    %c0_138 = arith.constant 0 : index
    %c0_139 = arith.constant 0 : index
    %261 = vector.load %arg1[%c3_136, %c3_137, %c0_138, %c0_139] : memref<4x4x8x16xbf16, #tpu.memory_space<vmem>>, vector<1x1x8x16xbf16>
    %262 = vector.shape_cast %261 : vector<1x1x8x16xbf16> to vector<8x16xbf16>
    %263 = vector.extract_strided_slice %0 {offsets = [0, 9], sizes = [16, 119], strides = [1, 1]} : vector<16x128xbf16> to vector<16x119xbf16>
    %cst_140 = arith.constant 0.000000e+00 : bf16
    %264 = vector.broadcast %cst_140 : bf16 to vector<16x9xbf16>
    %265 = tpu.concatenate %263, %264 in 1 : vector<16x119xbf16>, vector<16x9xbf16> -> vector<16x128xbf16>
    %c1_i32_141 = arith.constant 1 : i32
    %266 = vector.broadcast %c1_i32_141 : i32 to vector<1x128xi32>
    %267 = arith.addi %3, %266 : vector<1x128xi32>
    %c0_i32_142 = arith.constant 0 : i32
    %268 = vector.broadcast %c0_i32_142 : i32 to vector<1x128xi32>
    %269 = arith.cmpi sge, %267, %268 : vector<1x128xi32>
    %c1_i32_143 = arith.constant 1 : i32
    %270 = vector.broadcast %c1_i32_143 : i32 to vector<1x128xi32>
    %271 = arith.addi %3, %270 : vector<1x128xi32>
    %c8_i32_144 = arith.constant 8 : i32
    %272 = vector.broadcast %c8_i32_144 : i32 to vector<1x128xi32>
    %273 = arith.cmpi slt, %271, %272 : vector<1x128xi32>
    %274 = arith.andi %269, %273 : vector<1x128xi1>
    %c1_i32_145 = arith.constant 1 : i32
    %275 = vector.broadcast %c1_i32_145 : i32 to vector<1x128xi32>
    %276 = arith.addi %7, %275 : vector<1x128xi32>
    %c0_i32_146 = arith.constant 0 : i32
    %277 = vector.broadcast %c0_i32_146 : i32 to vector<1x128xi32>
    %278 = arith.cmpi sge, %276, %277 : vector<1x128xi32>
    %279 = arith.andi %274, %278 : vector<1x128xi1>
    %c1_i32_147 = arith.constant 1 : i32
    %280 = vector.broadcast %c1_i32_147 : i32 to vector<1x128xi32>
    %281 = arith.addi %7, %280 : vector<1x128xi32>
    %c8_i32_148 = arith.constant 8 : i32
    %282 = vector.broadcast %c8_i32_148 : i32 to vector<1x128xi32>
    %283 = arith.cmpi slt, %281, %282 : vector<1x128xi32>
    %284 = arith.andi %279, %283 : vector<1x128xi1>
    %285 = arith.extui %284 : vector<1x128xi1> to vector<1x128xi32>
    %286 = arith.sitofp %285 : vector<1x128xi32> to vector<1x128xf32>
    %287 = arith.truncf %286 : vector<1x128xf32> to vector<1x128xbf16>
    %288 = vector.broadcast %287 : vector<1x128xbf16> to vector<16x128xbf16>
    %289 = arith.mulf %265, %288 : vector<16x128xbf16>
    %cst_149 = arith.constant dense<0.000000e+00> : vector<8x128xf32>
    %290 = tpu.matmul %262, %289, %cst_149 {dimension_numbers = #tpu.dot_dimension_numbers<[1], [0], [0], [1], [0, 0, 1, 1], [], []>} : vector<8x16xbf16>, vector<16x128xbf16>, vector<8x128xf32> -> vector<8x128xf32>
    %291 = arith.addf %260, %290 : vector<8x128xf32>
    %cst_150 = arith.constant 0.000000e+00 : f32
    %292 = vector.broadcast %cst_150 : f32 to vector<8x1xf32>
    %cst_151 = arith.constant 0.000000e+00 : f32
    %293 = vector.broadcast %cst_151 : f32 to vector<8x1xf32>
    %cst_152 = arith.constant dense<0.000000e+00> : vector<8xf32>
    %294 = vector.multi_reduction <add>, %105, %cst_152 [1] : vector<8x128xf32> to vector<8xf32>
    %295 = vector.shape_cast %294 : vector<8xf32> to vector<8x1xf32>
    %296 = arith.addf %292, %295 : vector<8x1xf32>
    %297 = arith.mulf %105, %105 : vector<8x128xf32>
    %cst_153 = arith.constant dense<0.000000e+00> : vector<8xf32>
    %298 = vector.multi_reduction <add>, %297, %cst_153 [1] : vector<8x128xf32> to vector<8xf32>
    %299 = vector.shape_cast %298 : vector<8xf32> to vector<8x1xf32>
    %300 = arith.addf %293, %299 : vector<8x1xf32>
    %cst_154 = arith.constant dense<0.000000e+00> : vector<8xf32>
    %301 = vector.multi_reduction <add>, %176, %cst_154 [1] : vector<8x128xf32> to vector<8xf32>
    %302 = vector.shape_cast %301 : vector<8xf32> to vector<8x1xf32>
    %303 = arith.addf %296, %302 : vector<8x1xf32>
    %304 = arith.mulf %176, %176 : vector<8x128xf32>
    %cst_155 = arith.constant dense<0.000000e+00> : vector<8xf32>
    %305 = vector.multi_reduction <add>, %304, %cst_155 [1] : vector<8x128xf32> to vector<8xf32>
    %306 = vector.shape_cast %305 : vector<8xf32> to vector<8x1xf32>
    %307 = arith.addf %300, %306 : vector<8x1xf32>
    %cst_156 = arith.constant dense<0.000000e+00> : vector<8xf32>
    %308 = vector.multi_reduction <add>, %247, %cst_156 [1] : vector<8x128xf32> to vector<8xf32>
    %309 = vector.shape_cast %308 : vector<8xf32> to vector<8x1xf32>
    %310 = arith.addf %303, %309 : vector<8x1xf32>
    %311 = arith.mulf %247, %247 : vector<8x128xf32>
    %cst_157 = arith.constant dense<0.000000e+00> : vector<8xf32>
    %312 = vector.multi_reduction <add>, %311, %cst_157 [1] : vector<8x128xf32> to vector<8xf32>
    %313 = vector.shape_cast %312 : vector<8xf32> to vector<8x1xf32>
    %314 = arith.addf %307, %313 : vector<8x1xf32>
    %cst_158 = arith.constant dense<0.000000e+00> : vector<8xf32>
    %315 = vector.multi_reduction <add>, %291, %cst_158 [1] : vector<8x128xf32> to vector<8xf32>
    %316 = vector.shape_cast %315 : vector<8xf32> to vector<8x1xf32>
    %317 = arith.addf %310, %316 : vector<8x1xf32>
    %318 = arith.mulf %291, %291 : vector<8x128xf32>
    %cst_159 = arith.constant dense<0.000000e+00> : vector<8xf32>
    %319 = vector.multi_reduction <add>, %318, %cst_159 [1] : vector<8x128xf32> to vector<8xf32>
    %320 = vector.shape_cast %319 : vector<8xf32> to vector<8x1xf32>
    %321 = arith.addf %314, %320 : vector<8x1xf32>
    %cst_160 = arith.constant 5.120000e+02 : f32
    %322 = vector.broadcast %cst_160 : f32 to vector<8x1xf32>
    %323 = arith.divf %317, %322 : vector<8x1xf32>
    %cst_161 = arith.constant 5.120000e+02 : f32
    %324 = vector.broadcast %cst_161 : f32 to vector<8x1xf32>
    %325 = arith.divf %321, %324 : vector<8x1xf32>
    %326 = arith.mulf %323, %323 : vector<8x1xf32>
    %327 = arith.subf %325, %326 : vector<8x1xf32>
    %cst_162 = arith.constant 9.99999974E-6 : f32
    %328 = vector.broadcast %cst_162 : f32 to vector<8x1xf32>
    %329 = arith.addf %327, %328 : vector<8x1xf32>
    %330 = math.rsqrt %329 : vector<8x1xf32>
    %c0_163 = arith.constant 0 : index
    %c0_164 = arith.constant 0 : index
    %331 = vector.load %arg2[%c0_163, %c0_164] : memref<8x1xf32, #tpu.memory_space<vmem>>, vector<8x1xf32>
    %332 = arith.mulf %330, %331 : vector<8x1xf32>
    %c0_165 = arith.constant 0 : index
    %c0_166 = arith.constant 0 : index
    %333 = vector.load %arg3[%c0_165, %c0_166] : memref<8x1xf32, #tpu.memory_space<vmem>>, vector<8x1xf32>
    %334 = arith.mulf %323, %332 : vector<8x1xf32>
    %335 = arith.subf %333, %334 : vector<8x1xf32>
    %336 = vector.broadcast %332 : vector<8x1xf32> to vector<8x128xf32>
    %337 = arith.mulf %105, %336 : vector<8x128xf32>
    %338 = vector.broadcast %335 : vector<8x1xf32> to vector<8x128xf32>
    %339 = arith.addf %337, %338 : vector<8x128xf32>
    %340 = vector.broadcast %332 : vector<8x1xf32> to vector<8x128xf32>
    %341 = arith.mulf %176, %340 : vector<8x128xf32>
    %342 = vector.broadcast %335 : vector<8x1xf32> to vector<8x128xf32>
    %343 = arith.addf %341, %342 : vector<8x128xf32>
    %344 = vector.broadcast %332 : vector<8x1xf32> to vector<8x128xf32>
    %345 = arith.mulf %247, %344 : vector<8x128xf32>
    %346 = vector.broadcast %335 : vector<8x1xf32> to vector<8x128xf32>
    %347 = arith.addf %345, %346 : vector<8x128xf32>
    %348 = vector.broadcast %332 : vector<8x1xf32> to vector<8x128xf32>
    %349 = arith.mulf %291, %348 : vector<8x128xf32>
    %350 = vector.broadcast %335 : vector<8x1xf32> to vector<8x128xf32>
    %351 = arith.addf %349, %350 : vector<8x128xf32>
    %cst_167 = arith.constant 0.000000e+00 : f32
    %352 = vector.broadcast %cst_167 : f32 to vector<8x128xf32>
    %353 = arith.maximumf %339, %352 : vector<8x128xf32>
    %c0_168 = arith.constant 0 : index
    %c0_169 = arith.constant 0 : index
    %c0_170 = arith.constant 0 : index
    %354 = vector.load %arg4[%c0_168, %c0_169, %c0_170] : memref<4x8x128xf32, #tpu.memory_space<vmem>>, vector<1x8x128xf32>
    %355 = vector.shape_cast %354 : vector<1x8x128xf32> to vector<8x128xf32>
    %356 = vector.shape_cast %353 : vector<8x128xf32> to vector<1x8x128xf32>
    tpu.vector_store %arg4[%c0_168, %c0_169, %c0_170], %356 {strides = array<i32>} : memref<4x8x128xf32, #tpu.memory_space<vmem>>, vector<1x8x128xf32>,
    %cst_171 = arith.constant 0.000000e+00 : f32
    %357 = vector.broadcast %cst_171 : f32 to vector<8x128xf32>
    %358 = arith.maximumf %343, %357 : vector<8x128xf32>
    %c1_172 = arith.constant 1 : index
    %c0_173 = arith.constant 0 : index
    %c0_174 = arith.constant 0 : index
    %359 = vector.load %arg4[%c1_172, %c0_173, %c0_174] : memref<4x8x128xf32, #tpu.memory_space<vmem>>, vector<1x8x128xf32>
    %360 = vector.shape_cast %359 : vector<1x8x128xf32> to vector<8x128xf32>
    %361 = vector.shape_cast %358 : vector<8x128xf32> to vector<1x8x128xf32>
    tpu.vector_store %arg4[%c1_172, %c0_173, %c0_174], %361 {strides = array<i32>} : memref<4x8x128xf32, #tpu.memory_space<vmem>>, vector<1x8x128xf32>,
    %cst_175 = arith.constant 0.000000e+00 : f32
    %362 = vector.broadcast %cst_175 : f32 to vector<8x128xf32>
    %363 = arith.maximumf %347, %362 : vector<8x128xf32>
    %c2_176 = arith.constant 2 : index
    %c0_177 = arith.constant 0 : index
    %c0_178 = arith.constant 0 : index
    %364 = vector.load %arg4[%c2_176, %c0_177, %c0_178] : memref<4x8x128xf32, #tpu.memory_space<vmem>>, vector<1x8x128xf32>
    %365 = vector.shape_cast %364 : vector<1x8x128xf32> to vector<8x128xf32>
    %366 = vector.shape_cast %363 : vector<8x128xf32> to vector<1x8x128xf32>
    tpu.vector_store %arg4[%c2_176, %c0_177, %c0_178], %366 {strides = array<i32>} : memref<4x8x128xf32, #tpu.memory_space<vmem>>, vector<1x8x128xf32>,
    %cst_179 = arith.constant 0.000000e+00 : f32
    %367 = vector.broadcast %cst_179 : f32 to vector<8x128xf32>
    %368 = arith.maximumf %351, %367 : vector<8x128xf32>
    %c3_180 = arith.constant 3 : index
    %c0_181 = arith.constant 0 : index
    %c0_182 = arith.constant 0 : index
    %369 = vector.load %arg4[%c3_180, %c0_181, %c0_182] : memref<4x8x128xf32, #tpu.memory_space<vmem>>, vector<1x8x128xf32>
    %370 = vector.shape_cast %369 : vector<1x8x128xf32> to vector<8x128xf32>
    %371 = vector.shape_cast %368 : vector<8x128xf32> to vector<1x8x128xf32>
    tpu.vector_store %arg4[%c3_180, %c0_181, %c0_182], %371 {strides = array<i32>} : memref<4x8x128xf32, #tpu.memory_space<vmem>>, vector<1x8x128xf32>,
    return
  }
}

module attributes {stable_mosaic.version = 11 : i64} {
  func.func @_convt_phase_kernel(%arg0: i32, %arg1: memref<8x256xbf16, #tpu.memory_space<vmem>>, %arg2: memref<4x4x100x8xbf16, #tpu.memory_space<vmem>>, %arg3: memref<4x100x256xf32, #tpu.memory_space<vmem>>) attributes {dimension_semantics = [#tpu.dimension_semantics<parallel>], iteration_bounds = array<i64: 2>, scalar_prefetch = 0 : i64, scratch_operands = 0 : i64, tpu.core_type = #tpu.core_type<tc>, window_params = [{transform_indices = @transform_0, window_bounds = array<i64: 8, 256>}, {pipeline_mode = #tpu.pipeline_mode<synchronous>, transform_indices = @transform_1, window_bounds = array<i64: 4, 4, 100, 8>}, {transform_indices = @transform_2, window_bounds = array<i64: 4, 100, 256>}]} {
    %c0 = arith.constant 0 : index
    %c0_0 = arith.constant 0 : index
    %0 = vector.load %arg1[%c0, %c0_0] : memref<8x256xbf16, #tpu.memory_space<vmem>>, vector<8x256xbf16>
    %1 = tpu.iota {dimensions = array<i32: 1>} : vector<1x256xi32>
    %c15_i32 = arith.constant 15 : i32
    %2 = vector.broadcast %c15_i32 : i32 to vector<1x256xi32>
    %3 = arith.andi %1, %2 : vector<1x256xi32>
    %c4_i32 = arith.constant 4 : i32
    %4 = vector.broadcast %c4_i32 : i32 to vector<1x256xi32>
    %5 = arith.shrsi %1, %4 : vector<1x256xi32>
    %c15_i32_1 = arith.constant 15 : i32
    %6 = vector.broadcast %c15_i32_1 : i32 to vector<1x256xi32>
    %7 = arith.andi %5, %6 : vector<1x256xi32>
    %cst = arith.constant 0.000000e+00 : f32
    %8 = vector.broadcast %cst : f32 to vector<100x256xf32>
    %c0_2 = arith.constant 0 : index
    %c0_3 = arith.constant 0 : index
    %c0_4 = arith.constant 0 : index
    %c0_5 = arith.constant 0 : index
    %9 = vector.load %arg2[%c0_2, %c0_3, %c0_4, %c0_5] : memref<4x4x100x8xbf16, #tpu.memory_space<vmem>>, vector<1x1x100x8xbf16>
    %10 = vector.shape_cast %9 : vector<1x1x100x8xbf16> to vector<100x8xbf16>
    %cst_6 = arith.constant 0.000000e+00 : bf16
    %11 = vector.broadcast %cst_6 : bf16 to vector<8x17xbf16>
    %12 = vector.extract_strided_slice %0 {offsets = [0, 0], sizes = [8, 239], strides = [1, 1]} : vector<8x256xbf16> to vector<8x239xbf16>
    %13 = tpu.concatenate %11, %12 in 1 : vector<8x17xbf16>, vector<8x239xbf16> -> vector<8x256xbf16>
    %c-1_i32 = arith.constant -1 : i32
    %14 = vector.broadcast %c-1_i32 : i32 to vector<1x256xi32>
    %15 = arith.addi %3, %14 : vector<1x256xi32>
    %c0_i32 = arith.constant 0 : i32
    %16 = vector.broadcast %c0_i32 : i32 to vector<1x256xi32>
    %17 = arith.cmpi sge, %15, %16 : vector<1x256xi32>
    %c-1_i32_7 = arith.constant -1 : i32
    %18 = vector.broadcast %c-1_i32_7 : i32 to vector<1x256xi32>
    %19 = arith.addi %3, %18 : vector<1x256xi32>
    %c16_i32 = arith.constant 16 : i32
    %20 = vector.broadcast %c16_i32 : i32 to vector<1x256xi32>
    %21 = arith.cmpi slt, %19, %20 : vector<1x256xi32>
    %22 = arith.andi %17, %21 : vector<1x256xi1>
    %c-1_i32_8 = arith.constant -1 : i32
    %23 = vector.broadcast %c-1_i32_8 : i32 to vector<1x256xi32>
    %24 = arith.addi %7, %23 : vector<1x256xi32>
    %c0_i32_9 = arith.constant 0 : i32
    %25 = vector.broadcast %c0_i32_9 : i32 to vector<1x256xi32>
    %26 = arith.cmpi sge, %24, %25 : vector<1x256xi32>
    %27 = arith.andi %22, %26 : vector<1x256xi1>
    %c-1_i32_10 = arith.constant -1 : i32
    %28 = vector.broadcast %c-1_i32_10 : i32 to vector<1x256xi32>
    %29 = arith.addi %7, %28 : vector<1x256xi32>
    %c16_i32_11 = arith.constant 16 : i32
    %30 = vector.broadcast %c16_i32_11 : i32 to vector<1x256xi32>
    %31 = arith.cmpi slt, %29, %30 : vector<1x256xi32>
    %32 = arith.andi %27, %31 : vector<1x256xi1>
    %33 = arith.extui %32 : vector<1x256xi1> to vector<1x256xi32>
    %34 = arith.sitofp %33 : vector<1x256xi32> to vector<1x256xf32>
    %35 = arith.truncf %34 : vector<1x256xf32> to vector<1x256xbf16>
    %36 = vector.broadcast %35 : vector<1x256xbf16> to vector<8x256xbf16>
    %37 = arith.mulf %13, %36 : vector<8x256xbf16>
    %cst_12 = arith.constant dense<0.000000e+00> : vector<100x256xf32>
    %38 = tpu.matmul %10, %37, %cst_12 {dimension_numbers = #tpu.dot_dimension_numbers<[1], [0], [0], [1], [0, 0, 1, 1], [], []>} : vector<100x8xbf16>, vector<8x256xbf16>, vector<100x256xf32> -> vector<100x256xf32>
    %39 = arith.addf %8, %38 : vector<100x256xf32>
    %c0_13 = arith.constant 0 : index
    %c1 = arith.constant 1 : index
    %c0_14 = arith.constant 0 : index
    %c0_15 = arith.constant 0 : index
    %40 = vector.load %arg2[%c0_13, %c1, %c0_14, %c0_15] : memref<4x4x100x8xbf16, #tpu.memory_space<vmem>>, vector<1x1x100x8xbf16>
    %41 = vector.shape_cast %40 : vector<1x1x100x8xbf16> to vector<100x8xbf16>
    %cst_16 = arith.constant 0.000000e+00 : bf16
    %42 = vector.broadcast %cst_16 : bf16 to vector<8x16xbf16>
    %43 = vector.extract_strided_slice %0 {offsets = [0, 0], sizes = [8, 240], strides = [1, 1]} : vector<8x256xbf16> to vector<8x240xbf16>
    %44 = tpu.concatenate %42, %43 in 1 : vector<8x16xbf16>, vector<8x240xbf16> -> vector<8x256xbf16>
    %c0_i32_17 = arith.constant 0 : i32
    %45 = vector.broadcast %c0_i32_17 : i32 to vector<1x256xi32>
    %46 = arith.addi %3, %45 : vector<1x256xi32>
    %c0_i32_18 = arith.constant 0 : i32
    %47 = vector.broadcast %c0_i32_18 : i32 to vector<1x256xi32>
    %48 = arith.cmpi sge, %46, %47 : vector<1x256xi32>
    %c0_i32_19 = arith.constant 0 : i32
    %49 = vector.broadcast %c0_i32_19 : i32 to vector<1x256xi32>
    %50 = arith.addi %3, %49 : vector<1x256xi32>
    %c16_i32_20 = arith.constant 16 : i32
    %51 = vector.broadcast %c16_i32_20 : i32 to vector<1x256xi32>
    %52 = arith.cmpi slt, %50, %51 : vector<1x256xi32>
    %53 = arith.andi %48, %52 : vector<1x256xi1>
    %c-1_i32_21 = arith.constant -1 : i32
    %54 = vector.broadcast %c-1_i32_21 : i32 to vector<1x256xi32>
    %55 = arith.addi %7, %54 : vector<1x256xi32>
    %c0_i32_22 = arith.constant 0 : i32
    %56 = vector.broadcast %c0_i32_22 : i32 to vector<1x256xi32>
    %57 = arith.cmpi sge, %55, %56 : vector<1x256xi32>
    %58 = arith.andi %53, %57 : vector<1x256xi1>
    %c-1_i32_23 = arith.constant -1 : i32
    %59 = vector.broadcast %c-1_i32_23 : i32 to vector<1x256xi32>
    %60 = arith.addi %7, %59 : vector<1x256xi32>
    %c16_i32_24 = arith.constant 16 : i32
    %61 = vector.broadcast %c16_i32_24 : i32 to vector<1x256xi32>
    %62 = arith.cmpi slt, %60, %61 : vector<1x256xi32>
    %63 = arith.andi %58, %62 : vector<1x256xi1>
    %64 = arith.extui %63 : vector<1x256xi1> to vector<1x256xi32>
    %65 = arith.sitofp %64 : vector<1x256xi32> to vector<1x256xf32>
    %66 = arith.truncf %65 : vector<1x256xf32> to vector<1x256xbf16>
    %67 = vector.broadcast %66 : vector<1x256xbf16> to vector<8x256xbf16>
    %68 = arith.mulf %44, %67 : vector<8x256xbf16>
    %cst_25 = arith.constant dense<0.000000e+00> : vector<100x256xf32>
    %69 = tpu.matmul %41, %68, %cst_25 {dimension_numbers = #tpu.dot_dimension_numbers<[1], [0], [0], [1], [0, 0, 1, 1], [], []>} : vector<100x8xbf16>, vector<8x256xbf16>, vector<100x256xf32> -> vector<100x256xf32>
    %70 = arith.addf %39, %69 : vector<100x256xf32>
    %c0_26 = arith.constant 0 : index
    %c2 = arith.constant 2 : index
    %c0_27 = arith.constant 0 : index
    %c0_28 = arith.constant 0 : index
    %71 = vector.load %arg2[%c0_26, %c2, %c0_27, %c0_28] : memref<4x4x100x8xbf16, #tpu.memory_space<vmem>>, vector<1x1x100x8xbf16>
    %72 = vector.shape_cast %71 : vector<1x1x100x8xbf16> to vector<100x8xbf16>
    %cst_29 = arith.constant 0.000000e+00 : bf16
    %73 = vector.broadcast %cst_29 : bf16 to vector<8x1xbf16>
    %74 = vector.extract_strided_slice %0 {offsets = [0, 0], sizes = [8, 255], strides = [1, 1]} : vector<8x256xbf16> to vector<8x255xbf16>
    %75 = tpu.concatenate %73, %74 in 1 : vector<8x1xbf16>, vector<8x255xbf16> -> vector<8x256xbf16>
    %c-1_i32_30 = arith.constant -1 : i32
    %76 = vector.broadcast %c-1_i32_30 : i32 to vector<1x256xi32>
    %77 = arith.addi %3, %76 : vector<1x256xi32>
    %c0_i32_31 = arith.constant 0 : i32
    %78 = vector.broadcast %c0_i32_31 : i32 to vector<1x256xi32>
    %79 = arith.cmpi sge, %77, %78 : vector<1x256xi32>
    %c-1_i32_32 = arith.constant -1 : i32
    %80 = vector.broadcast %c-1_i32_32 : i32 to vector<1x256xi32>
    %81 = arith.addi %3, %80 : vector<1x256xi32>
    %c16_i32_33 = arith.constant 16 : i32
    %82 = vector.broadcast %c16_i32_33 : i32 to vector<1x256xi32>
    %83 = arith.cmpi slt, %81, %82 : vector<1x256xi32>
    %84 = arith.andi %79, %83 : vector<1x256xi1>
    %c0_i32_34 = arith.constant 0 : i32
    %85 = vector.broadcast %c0_i32_34 : i32 to vector<1x256xi32>
    %86 = arith.addi %7, %85 : vector<1x256xi32>
    %c0_i32_35 = arith.constant 0 : i32
    %87 = vector.broadcast %c0_i32_35 : i32 to vector<1x256xi32>
    %88 = arith.cmpi sge, %86, %87 : vector<1x256xi32>
    %89 = arith.andi %84, %88 : vector<1x256xi1>
    %c0_i32_36 = arith.constant 0 : i32
    %90 = vector.broadcast %c0_i32_36 : i32 to vector<1x256xi32>
    %91 = arith.addi %7, %90 : vector<1x256xi32>
    %c16_i32_37 = arith.constant 16 : i32
    %92 = vector.broadcast %c16_i32_37 : i32 to vector<1x256xi32>
    %93 = arith.cmpi slt, %91, %92 : vector<1x256xi32>
    %94 = arith.andi %89, %93 : vector<1x256xi1>
    %95 = arith.extui %94 : vector<1x256xi1> to vector<1x256xi32>
    %96 = arith.sitofp %95 : vector<1x256xi32> to vector<1x256xf32>
    %97 = arith.truncf %96 : vector<1x256xf32> to vector<1x256xbf16>
    %98 = vector.broadcast %97 : vector<1x256xbf16> to vector<8x256xbf16>
    %99 = arith.mulf %75, %98 : vector<8x256xbf16>
    %cst_38 = arith.constant dense<0.000000e+00> : vector<100x256xf32>
    %100 = tpu.matmul %72, %99, %cst_38 {dimension_numbers = #tpu.dot_dimension_numbers<[1], [0], [0], [1], [0, 0, 1, 1], [], []>} : vector<100x8xbf16>, vector<8x256xbf16>, vector<100x256xf32> -> vector<100x256xf32>
    %101 = arith.addf %70, %100 : vector<100x256xf32>
    %c0_39 = arith.constant 0 : index
    %c3 = arith.constant 3 : index
    %c0_40 = arith.constant 0 : index
    %c0_41 = arith.constant 0 : index
    %102 = vector.load %arg2[%c0_39, %c3, %c0_40, %c0_41] : memref<4x4x100x8xbf16, #tpu.memory_space<vmem>>, vector<1x1x100x8xbf16>
    %103 = vector.shape_cast %102 : vector<1x1x100x8xbf16> to vector<100x8xbf16>
    %cst_42 = arith.constant dense<0.000000e+00> : vector<100x256xf32>
    %104 = tpu.matmul %103, %0, %cst_42 {dimension_numbers = #tpu.dot_dimension_numbers<[1], [0], [0], [1], [0, 0, 1, 1], [], []>} : vector<100x8xbf16>, vector<8x256xbf16>, vector<100x256xf32> -> vector<100x256xf32>
    %105 = arith.addf %101, %104 : vector<100x256xf32>
    %cst_43 = arith.constant 0.000000e+00 : f32
    %106 = vector.broadcast %cst_43 : f32 to vector<100x256xf32>
    %c1_44 = arith.constant 1 : index
    %c0_45 = arith.constant 0 : index
    %c0_46 = arith.constant 0 : index
    %c0_47 = arith.constant 0 : index
    %107 = vector.load %arg2[%c1_44, %c0_45, %c0_46, %c0_47] : memref<4x4x100x8xbf16, #tpu.memory_space<vmem>>, vector<1x1x100x8xbf16>
    %108 = vector.shape_cast %107 : vector<1x1x100x8xbf16> to vector<100x8xbf16>
    %cst_48 = arith.constant dense<0.000000e+00> : vector<100x256xf32>
    %109 = tpu.matmul %108, %68, %cst_48 {dimension_numbers = #tpu.dot_dimension_numbers<[1], [0], [0], [1], [0, 0, 1, 1], [], []>} : vector<100x8xbf16>, vector<8x256xbf16>, vector<100x256xf32> -> vector<100x256xf32>
    %110 = arith.addf %106, %109 : vector<100x256xf32>
    %c1_49 = arith.constant 1 : index
    %c1_50 = arith.constant 1 : index
    %c0_51 = arith.constant 0 : index
    %c0_52 = arith.constant 0 : index
    %111 = vector.load %arg2[%c1_49, %c1_50, %c0_51, %c0_52] : memref<4x4x100x8xbf16, #tpu.memory_space<vmem>>, vector<1x1x100x8xbf16>
    %112 = vector.shape_cast %111 : vector<1x1x100x8xbf16> to vector<100x8xbf16>
    %cst_53 = arith.constant 0.000000e+00 : bf16
    %113 = vector.broadcast %cst_53 : bf16 to vector<8x15xbf16>
    %114 = vector.extract_strided_slice %0 {offsets = [0, 0], sizes = [8, 241], strides = [1, 1]} : vector<8x256xbf16> to vector<8x241xbf16>
    %115 = tpu.concatenate %113, %114 in 1 : vector<8x15xbf16>, vector<8x241xbf16> -> vector<8x256xbf16>
    %c1_i32 = arith.constant 1 : i32
    %116 = vector.broadcast %c1_i32 : i32 to vector<1x256xi32>
    %117 = arith.addi %3, %116 : vector<1x256xi32>
    %c0_i32_54 = arith.constant 0 : i32
    %118 = vector.broadcast %c0_i32_54 : i32 to vector<1x256xi32>
    %119 = arith.cmpi sge, %117, %118 : vector<1x256xi32>
    %c1_i32_55 = arith.constant 1 : i32
    %120 = vector.broadcast %c1_i32_55 : i32 to vector<1x256xi32>
    %121 = arith.addi %3, %120 : vector<1x256xi32>
    %c16_i32_56 = arith.constant 16 : i32
    %122 = vector.broadcast %c16_i32_56 : i32 to vector<1x256xi32>
    %123 = arith.cmpi slt, %121, %122 : vector<1x256xi32>
    %124 = arith.andi %119, %123 : vector<1x256xi1>
    %c-1_i32_57 = arith.constant -1 : i32
    %125 = vector.broadcast %c-1_i32_57 : i32 to vector<1x256xi32>
    %126 = arith.addi %7, %125 : vector<1x256xi32>
    %c0_i32_58 = arith.constant 0 : i32
    %127 = vector.broadcast %c0_i32_58 : i32 to vector<1x256xi32>
    %128 = arith.cmpi sge, %126, %127 : vector<1x256xi32>
    %129 = arith.andi %124, %128 : vector<1x256xi1>
    %c-1_i32_59 = arith.constant -1 : i32
    %130 = vector.broadcast %c-1_i32_59 : i32 to vector<1x256xi32>
    %131 = arith.addi %7, %130 : vector<1x256xi32>
    %c16_i32_60 = arith.constant 16 : i32
    %132 = vector.broadcast %c16_i32_60 : i32 to vector<1x256xi32>
    %133 = arith.cmpi slt, %131, %132 : vector<1x256xi32>
    %134 = arith.andi %129, %133 : vector<1x256xi1>
    %135 = arith.extui %134 : vector<1x256xi1> to vector<1x256xi32>
    %136 = arith.sitofp %135 : vector<1x256xi32> to vector<1x256xf32>
    %137 = arith.truncf %136 : vector<1x256xf32> to vector<1x256xbf16>
    %138 = vector.broadcast %137 : vector<1x256xbf16> to vector<8x256xbf16>
    %139 = arith.mulf %115, %138 : vector<8x256xbf16>
    %cst_61 = arith.constant dense<0.000000e+00> : vector<100x256xf32>
    %140 = tpu.matmul %112, %139, %cst_61 {dimension_numbers = #tpu.dot_dimension_numbers<[1], [0], [0], [1], [0, 0, 1, 1], [], []>} : vector<100x8xbf16>, vector<8x256xbf16>, vector<100x256xf32> -> vector<100x256xf32>
    %141 = arith.addf %110, %140 : vector<100x256xf32>
    %c1_62 = arith.constant 1 : index
    %c2_63 = arith.constant 2 : index
    %c0_64 = arith.constant 0 : index
    %c0_65 = arith.constant 0 : index
    %142 = vector.load %arg2[%c1_62, %c2_63, %c0_64, %c0_65] : memref<4x4x100x8xbf16, #tpu.memory_space<vmem>>, vector<1x1x100x8xbf16>
    %143 = vector.shape_cast %142 : vector<1x1x100x8xbf16> to vector<100x8xbf16>
    %cst_66 = arith.constant dense<0.000000e+00> : vector<100x256xf32>
    %144 = tpu.matmul %143, %0, %cst_66 {dimension_numbers = #tpu.dot_dimension_numbers<[1], [0], [0], [1], [0, 0, 1, 1], [], []>} : vector<100x8xbf16>, vector<8x256xbf16>, vector<100x256xf32> -> vector<100x256xf32>
    %145 = arith.addf %141, %144 : vector<100x256xf32>
    %c1_67 = arith.constant 1 : index
    %c3_68 = arith.constant 3 : index
    %c0_69 = arith.constant 0 : index
    %c0_70 = arith.constant 0 : index
    %146 = vector.load %arg2[%c1_67, %c3_68, %c0_69, %c0_70] : memref<4x4x100x8xbf16, #tpu.memory_space<vmem>>, vector<1x1x100x8xbf16>
    %147 = vector.shape_cast %146 : vector<1x1x100x8xbf16> to vector<100x8xbf16>
    %148 = vector.extract_strided_slice %0 {offsets = [0, 1], sizes = [8, 255], strides = [1, 1]} : vector<8x256xbf16> to vector<8x255xbf16>
    %cst_71 = arith.constant 0.000000e+00 : bf16
    %149 = vector.broadcast %cst_71 : bf16 to vector<8x1xbf16>
    %150 = tpu.concatenate %148, %149 in 1 : vector<8x255xbf16>, vector<8x1xbf16> -> vector<8x256xbf16>
    %c1_i32_72 = arith.constant 1 : i32
    %151 = vector.broadcast %c1_i32_72 : i32 to vector<1x256xi32>
    %152 = arith.addi %3, %151 : vector<1x256xi32>
    %c0_i32_73 = arith.constant 0 : i32
    %153 = vector.broadcast %c0_i32_73 : i32 to vector<1x256xi32>
    %154 = arith.cmpi sge, %152, %153 : vector<1x256xi32>
    %c1_i32_74 = arith.constant 1 : i32
    %155 = vector.broadcast %c1_i32_74 : i32 to vector<1x256xi32>
    %156 = arith.addi %3, %155 : vector<1x256xi32>
    %c16_i32_75 = arith.constant 16 : i32
    %157 = vector.broadcast %c16_i32_75 : i32 to vector<1x256xi32>
    %158 = arith.cmpi slt, %156, %157 : vector<1x256xi32>
    %159 = arith.andi %154, %158 : vector<1x256xi1>
    %c0_i32_76 = arith.constant 0 : i32
    %160 = vector.broadcast %c0_i32_76 : i32 to vector<1x256xi32>
    %161 = arith.addi %7, %160 : vector<1x256xi32>
    %c0_i32_77 = arith.constant 0 : i32
    %162 = vector.broadcast %c0_i32_77 : i32 to vector<1x256xi32>
    %163 = arith.cmpi sge, %161, %162 : vector<1x256xi32>
    %164 = arith.andi %159, %163 : vector<1x256xi1>
    %c0_i32_78 = arith.constant 0 : i32
    %165 = vector.broadcast %c0_i32_78 : i32 to vector<1x256xi32>
    %166 = arith.addi %7, %165 : vector<1x256xi32>
    %c16_i32_79 = arith.constant 16 : i32
    %167 = vector.broadcast %c16_i32_79 : i32 to vector<1x256xi32>
    %168 = arith.cmpi slt, %166, %167 : vector<1x256xi32>
    %169 = arith.andi %164, %168 : vector<1x256xi1>
    %170 = arith.extui %169 : vector<1x256xi1> to vector<1x256xi32>
    %171 = arith.sitofp %170 : vector<1x256xi32> to vector<1x256xf32>
    %172 = arith.truncf %171 : vector<1x256xf32> to vector<1x256xbf16>
    %173 = vector.broadcast %172 : vector<1x256xbf16> to vector<8x256xbf16>
    %174 = arith.mulf %150, %173 : vector<8x256xbf16>
    %cst_80 = arith.constant dense<0.000000e+00> : vector<100x256xf32>
    %175 = tpu.matmul %147, %174, %cst_80 {dimension_numbers = #tpu.dot_dimension_numbers<[1], [0], [0], [1], [0, 0, 1, 1], [], []>} : vector<100x8xbf16>, vector<8x256xbf16>, vector<100x256xf32> -> vector<100x256xf32>
    %176 = arith.addf %145, %175 : vector<100x256xf32>
    %cst_81 = arith.constant 0.000000e+00 : f32
    %177 = vector.broadcast %cst_81 : f32 to vector<100x256xf32>
    %c2_82 = arith.constant 2 : index
    %c0_83 = arith.constant 0 : index
    %c0_84 = arith.constant 0 : index
    %c0_85 = arith.constant 0 : index
    %178 = vector.load %arg2[%c2_82, %c0_83, %c0_84, %c0_85] : memref<4x4x100x8xbf16, #tpu.memory_space<vmem>>, vector<1x1x100x8xbf16>
    %179 = vector.shape_cast %178 : vector<1x1x100x8xbf16> to vector<100x8xbf16>
    %cst_86 = arith.constant dense<0.000000e+00> : vector<100x256xf32>
    %180 = tpu.matmul %179, %99, %cst_86 {dimension_numbers = #tpu.dot_dimension_numbers<[1], [0], [0], [1], [0, 0, 1, 1], [], []>} : vector<100x8xbf16>, vector<8x256xbf16>, vector<100x256xf32> -> vector<100x256xf32>
    %181 = arith.addf %177, %180 : vector<100x256xf32>
    %c2_87 = arith.constant 2 : index
    %c1_88 = arith.constant 1 : index
    %c0_89 = arith.constant 0 : index
    %c0_90 = arith.constant 0 : index
    %182 = vector.load %arg2[%c2_87, %c1_88, %c0_89, %c0_90] : memref<4x4x100x8xbf16, #tpu.memory_space<vmem>>, vector<1x1x100x8xbf16>
    %183 = vector.shape_cast %182 : vector<1x1x100x8xbf16> to vector<100x8xbf16>
    %cst_91 = arith.constant dense<0.000000e+00> : vector<100x256xf32>
    %184 = tpu.matmul %183, %0, %cst_91 {dimension_numbers = #tpu.dot_dimension_numbers<[1], [0], [0], [1], [0, 0, 1, 1], [], []>} : vector<100x8xbf16>, vector<8x256xbf16>, vector<100x256xf32> -> vector<100x256xf32>
    %185 = arith.addf %181, %184 : vector<100x256xf32>
    %c2_92 = arith.constant 2 : index
    %c2_93 = arith.constant 2 : index
    %c0_94 = arith.constant 0 : index
    %c0_95 = arith.constant 0 : index
    %186 = vector.load %arg2[%c2_92, %c2_93, %c0_94, %c0_95] : memref<4x4x100x8xbf16, #tpu.memory_space<vmem>>, vector<1x1x100x8xbf16>
    %187 = vector.shape_cast %186 : vector<1x1x100x8xbf16> to vector<100x8xbf16>
    %188 = vector.extract_strided_slice %0 {offsets = [0, 15], sizes = [8, 241], strides = [1, 1]} : vector<8x256xbf16> to vector<8x241xbf16>
    %cst_96 = arith.constant 0.000000e+00 : bf16
    %189 = vector.broadcast %cst_96 : bf16 to vector<8x15xbf16>
    %190 = tpu.concatenate %188, %189 in 1 : vector<8x241xbf16>, vector<8x15xbf16> -> vector<8x256xbf16>
    %c-1_i32_97 = arith.constant -1 : i32
    %191 = vector.broadcast %c-1_i32_97 : i32 to vector<1x256xi32>
    %192 = arith.addi %3, %191 : vector<1x256xi32>
    %c0_i32_98 = arith.constant 0 : i32
    %193 = vector.broadcast %c0_i32_98 : i32 to vector<1x256xi32>
    %194 = arith.cmpi sge, %192, %193 : vector<1x256xi32>
    %c-1_i32_99 = arith.constant -1 : i32
    %195 = vector.broadcast %c-1_i32_99 : i32 to vector<1x256xi32>
    %196 = arith.addi %3, %195 : vector<1x256xi32>
    %c16_i32_100 = arith.constant 16 : i32
    %197 = vector.broadcast %c16_i32_100 : i32 to vector<1x256xi32>
    %198 = arith.cmpi slt, %196, %197 : vector<1x256xi32>
    %199 = arith.andi %194, %198 : vector<1x256xi1>
    %c1_i32_101 = arith.constant 1 : i32
    %200 = vector.broadcast %c1_i32_101 : i32 to vector<1x256xi32>
    %201 = arith.addi %7, %200 : vector<1x256xi32>
    %c0_i32_102 = arith.constant 0 : i32
    %202 = vector.broadcast %c0_i32_102 : i32 to vector<1x256xi32>
    %203 = arith.cmpi sge, %201, %202 : vector<1x256xi32>
    %204 = arith.andi %199, %203 : vector<1x256xi1>
    %c1_i32_103 = arith.constant 1 : i32
    %205 = vector.broadcast %c1_i32_103 : i32 to vector<1x256xi32>
    %206 = arith.addi %7, %205 : vector<1x256xi32>
    %c16_i32_104 = arith.constant 16 : i32
    %207 = vector.broadcast %c16_i32_104 : i32 to vector<1x256xi32>
    %208 = arith.cmpi slt, %206, %207 : vector<1x256xi32>
    %209 = arith.andi %204, %208 : vector<1x256xi1>
    %210 = arith.extui %209 : vector<1x256xi1> to vector<1x256xi32>
    %211 = arith.sitofp %210 : vector<1x256xi32> to vector<1x256xf32>
    %212 = arith.truncf %211 : vector<1x256xf32> to vector<1x256xbf16>
    %213 = vector.broadcast %212 : vector<1x256xbf16> to vector<8x256xbf16>
    %214 = arith.mulf %190, %213 : vector<8x256xbf16>
    %cst_105 = arith.constant dense<0.000000e+00> : vector<100x256xf32>
    %215 = tpu.matmul %187, %214, %cst_105 {dimension_numbers = #tpu.dot_dimension_numbers<[1], [0], [0], [1], [0, 0, 1, 1], [], []>} : vector<100x8xbf16>, vector<8x256xbf16>, vector<100x256xf32> -> vector<100x256xf32>
    %216 = arith.addf %185, %215 : vector<100x256xf32>
    %c2_106 = arith.constant 2 : index
    %c3_107 = arith.constant 3 : index
    %c0_108 = arith.constant 0 : index
    %c0_109 = arith.constant 0 : index
    %217 = vector.load %arg2[%c2_106, %c3_107, %c0_108, %c0_109] : memref<4x4x100x8xbf16, #tpu.memory_space<vmem>>, vector<1x1x100x8xbf16>
    %218 = vector.shape_cast %217 : vector<1x1x100x8xbf16> to vector<100x8xbf16>
    %219 = vector.extract_strided_slice %0 {offsets = [0, 16], sizes = [8, 240], strides = [1, 1]} : vector<8x256xbf16> to vector<8x240xbf16>
    %cst_110 = arith.constant 0.000000e+00 : bf16
    %220 = vector.broadcast %cst_110 : bf16 to vector<8x16xbf16>
    %221 = tpu.concatenate %219, %220 in 1 : vector<8x240xbf16>, vector<8x16xbf16> -> vector<8x256xbf16>
    %c0_i32_111 = arith.constant 0 : i32
    %222 = vector.broadcast %c0_i32_111 : i32 to vector<1x256xi32>
    %223 = arith.addi %3, %222 : vector<1x256xi32>
    %c0_i32_112 = arith.constant 0 : i32
    %224 = vector.broadcast %c0_i32_112 : i32 to vector<1x256xi32>
    %225 = arith.cmpi sge, %223, %224 : vector<1x256xi32>
    %c0_i32_113 = arith.constant 0 : i32
    %226 = vector.broadcast %c0_i32_113 : i32 to vector<1x256xi32>
    %227 = arith.addi %3, %226 : vector<1x256xi32>
    %c16_i32_114 = arith.constant 16 : i32
    %228 = vector.broadcast %c16_i32_114 : i32 to vector<1x256xi32>
    %229 = arith.cmpi slt, %227, %228 : vector<1x256xi32>
    %230 = arith.andi %225, %229 : vector<1x256xi1>
    %c1_i32_115 = arith.constant 1 : i32
    %231 = vector.broadcast %c1_i32_115 : i32 to vector<1x256xi32>
    %232 = arith.addi %7, %231 : vector<1x256xi32>
    %c0_i32_116 = arith.constant 0 : i32
    %233 = vector.broadcast %c0_i32_116 : i32 to vector<1x256xi32>
    %234 = arith.cmpi sge, %232, %233 : vector<1x256xi32>
    %235 = arith.andi %230, %234 : vector<1x256xi1>
    %c1_i32_117 = arith.constant 1 : i32
    %236 = vector.broadcast %c1_i32_117 : i32 to vector<1x256xi32>
    %237 = arith.addi %7, %236 : vector<1x256xi32>
    %c16_i32_118 = arith.constant 16 : i32
    %238 = vector.broadcast %c16_i32_118 : i32 to vector<1x256xi32>
    %239 = arith.cmpi slt, %237, %238 : vector<1x256xi32>
    %240 = arith.andi %235, %239 : vector<1x256xi1>
    %241 = arith.extui %240 : vector<1x256xi1> to vector<1x256xi32>
    %242 = arith.sitofp %241 : vector<1x256xi32> to vector<1x256xf32>
    %243 = arith.truncf %242 : vector<1x256xf32> to vector<1x256xbf16>
    %244 = vector.broadcast %243 : vector<1x256xbf16> to vector<8x256xbf16>
    %245 = arith.mulf %221, %244 : vector<8x256xbf16>
    %cst_119 = arith.constant dense<0.000000e+00> : vector<100x256xf32>
    %246 = tpu.matmul %218, %245, %cst_119 {dimension_numbers = #tpu.dot_dimension_numbers<[1], [0], [0], [1], [0, 0, 1, 1], [], []>} : vector<100x8xbf16>, vector<8x256xbf16>, vector<100x256xf32> -> vector<100x256xf32>
    %247 = arith.addf %216, %246 : vector<100x256xf32>
    %cst_120 = arith.constant 0.000000e+00 : f32
    %248 = vector.broadcast %cst_120 : f32 to vector<100x256xf32>
    %c3_121 = arith.constant 3 : index
    %c0_122 = arith.constant 0 : index
    %c0_123 = arith.constant 0 : index
    %c0_124 = arith.constant 0 : index
    %249 = vector.load %arg2[%c3_121, %c0_122, %c0_123, %c0_124] : memref<4x4x100x8xbf16, #tpu.memory_space<vmem>>, vector<1x1x100x8xbf16>
    %250 = vector.shape_cast %249 : vector<1x1x100x8xbf16> to vector<100x8xbf16>
    %cst_125 = arith.constant dense<0.000000e+00> : vector<100x256xf32>
    %251 = tpu.matmul %250, %0, %cst_125 {dimension_numbers = #tpu.dot_dimension_numbers<[1], [0], [0], [1], [0, 0, 1, 1], [], []>} : vector<100x8xbf16>, vector<8x256xbf16>, vector<100x256xf32> -> vector<100x256xf32>
    %252 = arith.addf %248, %251 : vector<100x256xf32>
    %c3_126 = arith.constant 3 : index
    %c1_127 = arith.constant 1 : index
    %c0_128 = arith.constant 0 : index
    %c0_129 = arith.constant 0 : index
    %253 = vector.load %arg2[%c3_126, %c1_127, %c0_128, %c0_129] : memref<4x4x100x8xbf16, #tpu.memory_space<vmem>>, vector<1x1x100x8xbf16>
    %254 = vector.shape_cast %253 : vector<1x1x100x8xbf16> to vector<100x8xbf16>
    %cst_130 = arith.constant dense<0.000000e+00> : vector<100x256xf32>
    %255 = tpu.matmul %254, %174, %cst_130 {dimension_numbers = #tpu.dot_dimension_numbers<[1], [0], [0], [1], [0, 0, 1, 1], [], []>} : vector<100x8xbf16>, vector<8x256xbf16>, vector<100x256xf32> -> vector<100x256xf32>
    %256 = arith.addf %252, %255 : vector<100x256xf32>
    %c3_131 = arith.constant 3 : index
    %c2_132 = arith.constant 2 : index
    %c0_133 = arith.constant 0 : index
    %c0_134 = arith.constant 0 : index
    %257 = vector.load %arg2[%c3_131, %c2_132, %c0_133, %c0_134] : memref<4x4x100x8xbf16, #tpu.memory_space<vmem>>, vector<1x1x100x8xbf16>
    %258 = vector.shape_cast %257 : vector<1x1x100x8xbf16> to vector<100x8xbf16>
    %cst_135 = arith.constant dense<0.000000e+00> : vector<100x256xf32>
    %259 = tpu.matmul %258, %245, %cst_135 {dimension_numbers = #tpu.dot_dimension_numbers<[1], [0], [0], [1], [0, 0, 1, 1], [], []>} : vector<100x8xbf16>, vector<8x256xbf16>, vector<100x256xf32> -> vector<100x256xf32>
    %260 = arith.addf %256, %259 : vector<100x256xf32>
    %c3_136 = arith.constant 3 : index
    %c3_137 = arith.constant 3 : index
    %c0_138 = arith.constant 0 : index
    %c0_139 = arith.constant 0 : index
    %261 = vector.load %arg2[%c3_136, %c3_137, %c0_138, %c0_139] : memref<4x4x100x8xbf16, #tpu.memory_space<vmem>>, vector<1x1x100x8xbf16>
    %262 = vector.shape_cast %261 : vector<1x1x100x8xbf16> to vector<100x8xbf16>
    %263 = vector.extract_strided_slice %0 {offsets = [0, 17], sizes = [8, 239], strides = [1, 1]} : vector<8x256xbf16> to vector<8x239xbf16>
    %cst_140 = arith.constant 0.000000e+00 : bf16
    %264 = vector.broadcast %cst_140 : bf16 to vector<8x17xbf16>
    %265 = tpu.concatenate %263, %264 in 1 : vector<8x239xbf16>, vector<8x17xbf16> -> vector<8x256xbf16>
    %c1_i32_141 = arith.constant 1 : i32
    %266 = vector.broadcast %c1_i32_141 : i32 to vector<1x256xi32>
    %267 = arith.addi %3, %266 : vector<1x256xi32>
    %c0_i32_142 = arith.constant 0 : i32
    %268 = vector.broadcast %c0_i32_142 : i32 to vector<1x256xi32>
    %269 = arith.cmpi sge, %267, %268 : vector<1x256xi32>
    %c1_i32_143 = arith.constant 1 : i32
    %270 = vector.broadcast %c1_i32_143 : i32 to vector<1x256xi32>
    %271 = arith.addi %3, %270 : vector<1x256xi32>
    %c16_i32_144 = arith.constant 16 : i32
    %272 = vector.broadcast %c16_i32_144 : i32 to vector<1x256xi32>
    %273 = arith.cmpi slt, %271, %272 : vector<1x256xi32>
    %274 = arith.andi %269, %273 : vector<1x256xi1>
    %c1_i32_145 = arith.constant 1 : i32
    %275 = vector.broadcast %c1_i32_145 : i32 to vector<1x256xi32>
    %276 = arith.addi %7, %275 : vector<1x256xi32>
    %c0_i32_146 = arith.constant 0 : i32
    %277 = vector.broadcast %c0_i32_146 : i32 to vector<1x256xi32>
    %278 = arith.cmpi sge, %276, %277 : vector<1x256xi32>
    %279 = arith.andi %274, %278 : vector<1x256xi1>
    %c1_i32_147 = arith.constant 1 : i32
    %280 = vector.broadcast %c1_i32_147 : i32 to vector<1x256xi32>
    %281 = arith.addi %7, %280 : vector<1x256xi32>
    %c16_i32_148 = arith.constant 16 : i32
    %282 = vector.broadcast %c16_i32_148 : i32 to vector<1x256xi32>
    %283 = arith.cmpi slt, %281, %282 : vector<1x256xi32>
    %284 = arith.andi %279, %283 : vector<1x256xi1>
    %285 = arith.extui %284 : vector<1x256xi1> to vector<1x256xi32>
    %286 = arith.sitofp %285 : vector<1x256xi32> to vector<1x256xf32>
    %287 = arith.truncf %286 : vector<1x256xf32> to vector<1x256xbf16>
    %288 = vector.broadcast %287 : vector<1x256xbf16> to vector<8x256xbf16>
    %289 = arith.mulf %265, %288 : vector<8x256xbf16>
    %cst_149 = arith.constant dense<0.000000e+00> : vector<100x256xf32>
    %290 = tpu.matmul %262, %289, %cst_149 {dimension_numbers = #tpu.dot_dimension_numbers<[1], [0], [0], [1], [0, 0, 1, 1], [], []>} : vector<100x8xbf16>, vector<8x256xbf16>, vector<100x256xf32> -> vector<100x256xf32>
    %291 = arith.addf %260, %290 : vector<100x256xf32>
    %292 = math.tanh %105 : vector<100x256xf32>
    %c0_150 = arith.constant 0 : index
    %c0_151 = arith.constant 0 : index
    %c0_152 = arith.constant 0 : index
    %293 = vector.load %arg3[%c0_150, %c0_151, %c0_152] : memref<4x100x256xf32, #tpu.memory_space<vmem>>, vector<1x100x256xf32>
    %294 = vector.shape_cast %293 : vector<1x100x256xf32> to vector<100x256xf32>
    %295 = vector.shape_cast %292 : vector<100x256xf32> to vector<1x100x256xf32>
    tpu.vector_store %arg3[%c0_150, %c0_151, %c0_152], %295 {strides = array<i32>} : memref<4x100x256xf32, #tpu.memory_space<vmem>>, vector<1x100x256xf32>,
    %296 = math.tanh %176 : vector<100x256xf32>
    %c1_153 = arith.constant 1 : index
    %c0_154 = arith.constant 0 : index
    %c0_155 = arith.constant 0 : index
    %297 = vector.load %arg3[%c1_153, %c0_154, %c0_155] : memref<4x100x256xf32, #tpu.memory_space<vmem>>, vector<1x100x256xf32>
    %298 = vector.shape_cast %297 : vector<1x100x256xf32> to vector<100x256xf32>
    %299 = vector.shape_cast %296 : vector<100x256xf32> to vector<1x100x256xf32>
    tpu.vector_store %arg3[%c1_153, %c0_154, %c0_155], %299 {strides = array<i32>} : memref<4x100x256xf32, #tpu.memory_space<vmem>>, vector<1x100x256xf32>,
    %300 = math.tanh %247 : vector<100x256xf32>
    %c2_156 = arith.constant 2 : index
    %c0_157 = arith.constant 0 : index
    %c0_158 = arith.constant 0 : index
    %301 = vector.load %arg3[%c2_156, %c0_157, %c0_158] : memref<4x100x256xf32, #tpu.memory_space<vmem>>, vector<1x100x256xf32>
    %302 = vector.shape_cast %301 : vector<1x100x256xf32> to vector<100x256xf32>
    %303 = vector.shape_cast %300 : vector<100x256xf32> to vector<1x100x256xf32>
    tpu.vector_store %arg3[%c2_156, %c0_157, %c0_158], %303 {strides = array<i32>} : memref<4x100x256xf32, #tpu.memory_space<vmem>>, vector<1x100x256xf32>,
    %304 = math.tanh %291 : vector<100x256xf32>
    %c3_159 = arith.constant 3 : index
    %c0_160 = arith.constant 0 : index
    %c0_161 = arith.constant 0 : index
    %305 = vector.load %arg3[%c3_159, %c0_160, %c0_161] : memref<4x100x256xf32, #tpu.memory_space<vmem>>, vector<1x100x256xf32>
    %306 = vector.shape_cast %305 : vector<1x100x256xf32> to vector<100x256xf32>
    %307 = vector.shape_cast %304 : vector<100x256xf32> to vector<1x100x256xf32>
    tpu.vector_store %arg3[%c3_159, %c0_160, %c0_161], %307 {strides = array<i32>} : memref<4x100x256xf32, #tpu.memory_space<vmem>>, vector<1x100x256xf32>,
    return
  }
  func.func @transform_0(%arg0: i32) -> (i32, i32) {
    %c0_i32 = arith.constant 0 : i32
    %c0_i32_0 = arith.constant 0 : i32
    return %c0_i32, %arg0 : i32, i32
  }
  func.func @transform_1(%arg0: i32) -> (i32, i32, i32, i32) {
    %c0_i32 = arith.constant 0 : i32
    %c0_i32_0 = arith.constant 0 : i32
    %c0_i32_1 = arith.constant 0 : i32
    %c0_i32_2 = arith.constant 0 : i32
    %c0_i32_3 = arith.constant 0 : i32
    return %c0_i32, %c0_i32_0, %c0_i32_1, %c0_i32_2 : i32, i32, i32, i32
  }
  func.func @transform_2(%arg0: i32) -> (i32, i32, i32) {
    %c0_i32 = arith.constant 0 : i32
    %c0_i32_0 = arith.constant 0 : i32
    %c0_i32_1 = arith.constant 0 : i32
    return %c0_i32, %c0_i32_0, %arg0 : i32, i32, i32
  }
}

</mosaic_0001>

<bundles_post_ra>
// kernel: netg1_forward.4
= control target key start
LH: loop header
LB: loop body
LE: loop exit
PB: predicated region body
PF: predicated region fallthrough
CT: control target
= control target key end

     0   :  { %v633_v1 = vmov 0   ;;  %vm67_vm0 = vcmask 261120   ;;  %vm196_vm1 = vcmask 779776   ;;  %vm171_vm2 = vcmask 517376   ;;  %s636_s7 = smov 32   ;;  %s825_s1 = inlined_call_operand.vmem [shape: bf16[32,512], index: 1, kind: input, shape index: {}]   ;;  %s826_s0 = inlined_call_operand.vmem [shape: bf16[2,32], index: 0, kind: input, shape index: {}]   ;;  %s827_s2 = inlined_call_operand.vmem [shape: f32[1,32], index: 2, kind: input, shape index: {}]   ;;  %s828_s3 = inlined_call_operand.vmem [shape: f32[1,32], index: 3, kind: input, shape index: {}]   ;;  %s829_s4 = inlined_call_operand.vmem [shape: f32[2,512], index: 4, kind: output, shape index: {}]  }
   0x1   :  { %v619_v0 = vld [vmem:[%s825_s1 + $0x4] ss:$16 sps:$4 sm:$0xff]   ;;  %103 = vmatprep.mubr.bf16.mxu0 %v633_v1  ;;  %144 = vmatprep.mubr.bf16.mxu1 %v633_v1  ;;  %v621_v2 = vld [vmem:[%s825_s1] ss:$16 sps:$4 sm:$0xff]   ;;  %v625_v5 = vld [vmem:[%s825_s1 + $0xc] ss:$16 sps:$4 sm:$0xff]  }
   0x2   :  { %71 = vmatprep.subr.bf16.mxu0 %v619_v0  ;;  %v622_v3 = vld [vmem:[%s825_s1 + $0x24] ss:$16 sps:$4 sm:$0xff]   ;;  %v624_v4 = vld [vmem:[%s825_s1 + $0x20] ss:$16 sps:$4 sm:$0xff]   ;;  %v627_v6 = vld [vmem:[%s825_s1 + $0x8] ss:$16 sps:$4 sm:$0xff]   ;;  %112 = vmatprep.subr.bf16.mxu1 %v625_v5 }
   0x3   :  { %72 = vmatpush1.bf16.msra.mxu0 %v621_v2  ;;  %v628_v7 = vld [vmem:[%s825_s1 + $0x2c] ss:$16 sps:$4 sm:$0xff]   ;;  %113 = vmatpush1.bf16.msra.mxu1 %v627_v6  ;;  %v630_v8 = vld [vmem:[%s825_s1 + $0x28] ss:$16 sps:$4 sm:$0xff]   ;;  %v18_v9 = vld [vmem:[%s826_s0] sm:$0x1] }
   0x4   :  { %73 = vmatprep.subr.bf16.mxu0 %v622_v3  ;;  %114 = vmatprep.subr.bf16.mxu1 %v628_v7  ;;  %vm221_vm3 = vcmask 1042176   ;;  %s634_s0 = smov 64   ;;  %s635_s1 = smov 96   ;;  %vm153_vm4 = vcmask 254976   ;;  %vm536_vm5 = vcmask 523264   ;;  %vm538_vm6 = vcmask 785408  }
   0x7   :  { %74 = vmatpush1.bf16.msra.mxu0 %v624_v4  ;;  %115 = vmatpush1.bf16.msra.mxu1 %v630_v8 }
   0xa   :  { %612 = vmatmul.mubr.msk.bf16.vlgmr.msra.gmra.mrb[0].mxu0 %vm67_vm0, %v18_v9  ;;  %613 = vmatmul.mubr.msk.bf16.vlgmr.msra.gmra.mrb[0].mxu1 %vm67_vm0, %v18_v9 }
  0xdd   :  { %v692_v10 = vpop.f32.mrb[0].mxu0  ;;  %v710_v22 = vpop.f32.mrb[0].mxu1 }
  0xde   :  { %v696_v11 = vmul.f32 %v692_v10, %v692_v10  ;;  %v698_v12 = vpop.f32.mrb[1].mxu0  ;;  %v197_v13 = vsel %vm196_vm1, %v692_v10, 0.0  ;;  %v172_v14 = vsel %vm171_vm2, %v692_v10, 0.0  ;;  %v222_v15 = vsel %vm221_vm3, %v692_v10, 0.0  ;;  %v722_v27 = vpop.f32.mrb[1].mxu1 }
  0xdf   :  { %v109_v16 = vpop.f32.mrb[2].mxu0  ;;  %v198_v17 = vrot.slane %v197_v13, 4  ;;  %v173_v18 = vrot.slane %v172_v14, 4  ;;  %v223_v19 = vrot.slane %v222_v15, 4  ;;  %v708_v20 = vmul.f32 %v698_v12, %v698_v12  ;;  %v150_v31 = vpop.f32.mrb[2].mxu1 }
  0xe0   :  { %v110_v21 = vpop.f32.mrb[3].mxu0  ;;  %v209_v23 = vsel %vm196_vm1, %v696_v11, 0.0  ;;  %v234_v24 = vsel %vm221_vm3, %v696_v11, 0.0  ;;  %v263_v25 = vsel %vm171_vm2, %v698_v12, 0.0  ;;  %v720_v26 = vmul.f32 %v710_v22, %v710_v22  ;;  %v151_v36 = vpop.f32.mrb[3].mxu1 }
  0xe1   :  { %v199_v28 = vadd.f32 %v198_v17, %v197_v13  ;;  %v174_v29 = vadd.f32 %v173_v18, %v172_v14  ;;  %v224_v30 = vadd.f32 %v223_v19, %v222_v15  ;;  %v210_v32 = vrot.slane %v209_v23, 4 }
  0xe2   :  { %v235_v33 = vrot.slane %v234_v24, 4  ;;  %v264_v34 = vrot.slane %v263_v25, 4  ;;  %v287_v35 = vsel %vm196_vm1, %v698_v12, 0.0  ;;  %v364_v40 = vsel %vm171_vm2, %v720_v26, 0.0 }
  0xe3   :  { %v200_v37 = vrot.slane %v199_v28, 2  ;;  %v175_v38 = vrot.slane %v174_v29, 2  ;;  %v225_v39 = vrot.slane %v224_v30, 2  ;;  %v211_v41 = vadd.f32 %v210_v32, %v209_v23 }
  0xe4   :  { %v236_v42 = vadd.f32 %v235_v33, %v234_v24  ;;  %v265_v43 = vadd.f32 %v264_v34, %v263_v25  ;;  %v365_v44 = vrot.slane %v364_v40, 4  ;;  %v288_v48 = vrot.slane %v287_v35, 4 }
  0xe5   :  { %v201_v45 = vadd.f32 %v200_v37, %v199_v28  ;;  %v176_v46 = vadd.f32 %v175_v38, %v174_v29  ;;  %v226_v47 = vadd.f32 %v225_v39, %v224_v30  ;;  %v212_v49 = vrot.slane %v211_v41, 2 }
  0xe6   :  { %v237_v50 = vrot.slane %v236_v42, 2  ;;  %v266_v51 = vrot.slane %v265_v43, 2  ;;  %v366_v52 = vadd.f32 %v365_v44, %v364_v40  ;;  %v289_v56 = vadd.f32 %v288_v48, %v287_v35 }
  0xe7   :  { %v202_v53 = vrot.slane %v201_v45, 1  ;;  %v177_v54 = vrot.slane %v176_v46, 1  ;;  %v227_v55 = vrot.slane %v226_v47, 1  ;;  %v213_v57 = vadd.f32 %v212_v49, %v211_v41 }
  0xe8   :  { %v238_v58 = vadd.f32 %v237_v50, %v236_v42  ;;  %v267_v59 = vadd.f32 %v266_v51, %v265_v43  ;;  %v367_v60 = vrot.slane %v366_v52, 2  ;;  %v290_v0 = vrot.slane %v289_v56, 2 }
  0xe9   :  { %v203_v61 = vadd.f32 %v202_v53, %v201_v45  ;;  %v178_v62 = vadd.f32 %v177_v54, %v176_v46  ;;  %v228_v63 = vadd.f32 %v227_v55, %v226_v47  ;;  %v214_v1 = vrot.slane %v213_v57, 1 }
  0xea   :  { %v239_v2 = vrot.slane %v238_v58, 1  ;;  %v268_v3 = vrot.slane %v267_v59, 1  ;;  %v368_v4 = vadd.f32 %v367_v60, %v366_v52  ;;  %v291_v5 = vadd.f32 %v290_v0, %v289_v56 }
  0xeb   :  { %205 = vrot.lane.b32.xlu1 %v203_v61, %s634_s0  ;;  %180 = vrot.lane.b32.xlu0 %v178_v62, %s635_s1  ;;  %v388_v6 = vsel %vm196_vm1, %v720_v26, 0.0  ;;  %v184_v7 = vsel %vm171_vm2, %v696_v11, 0.0  ;;  %v311_v8 = vsel %vm221_vm3, %v698_v12, 0.0  ;;  %v215_v9 = vadd.f32 %v214_v1, %v213_v57 }
  0xec   :  { %v240_v13 = vadd.f32 %v239_v2, %v238_v58  ;;  %v269_v14 = vadd.f32 %v268_v3, %v267_v59  ;;  %v369_v15 = vrot.slane %v368_v4, 1  ;;  %v292_v16 = vrot.slane %v291_v5, 1 }
  0xed   :  { %v389_v17 = vrot.slane %v388_v6, 4  ;;  %v185_v18 = vrot.slane %v184_v7, 4  ;;  %v312_v19 = vrot.slane %v311_v8, 4  ;;  %v275_v23 = vsel %vm171_vm2, %v708_v20, 0.0 }
  0xee   :  { %v370_v21 = vadd.f32 %v369_v15, %v368_v4  ;;  %v352_v24 = vsel %vm171_vm2, %v710_v22, 0.0  ;;  %v299_v25 = vsel %vm196_vm1, %v708_v20, 0.0  ;;  %v293_v28 = vadd.f32 %v292_v16, %v291_v5 }
  0xef   :  { %230 = vrot.lane.b32.xlu0 %v228_v63, %s636_s7  ;;  %217 = vrot.lane.b32.xlu1 %v215_v9, %s634_s0  ;;  %v390_v29 = vadd.f32 %v389_v17, %v388_v6  ;;  %v186_v30 = vadd.f32 %v185_v18, %v184_v7  ;;  %v276_v31 = vrot.slane %v275_v23, 4  ;;  %v313_v32 = vadd.f32 %v312_v19, %v311_v8 }
  0xf0   :  { %v353_v33 = vrot.slane %v352_v24, 4  ;;  %v300_v34 = vrot.slane %v299_v25, 4  ;;  %v376_v35 = vsel %vm196_vm1, %v710_v22, 0.0  ;;  %v323_v43 = vsel %vm221_vm3, %v708_v20, 0.0 }
  0xf1   :  { %v391_v36 = vrot.slane %v390_v29, 2  ;;  %v187_v37 = vrot.slane %v186_v30, 2  ;;  %v277_v38 = vadd.f32 %v276_v31, %v275_v23  ;;  %v377_v39 = vrot.slane %v376_v35, 4 }
  0xf2   :  { %v314_v40 = vrot.slane %v313_v32, 2  ;;  %v354_v41 = vadd.f32 %v353_v33, %v352_v24  ;;  %v301_v42 = vadd.f32 %v300_v34, %v299_v25  ;;  %v324_v51 = vrot.slane %v323_v43, 4 }
  0xf3   :  { %242 = vrot.lane.b32.xlu1 %v240_v13, %s636_s7  ;;  %271 = vrot.lane.b32.xlu0 %v269_v14, %s635_s1  ;;  %v392_v44 = vadd.f32 %v391_v36, %v390_v29  ;;  %v188_v45 = vadd.f32 %v187_v37, %v186_v30  ;;  %v278_v46 = vrot.slane %v277_v38, 2  ;;  %v378_v47 = vadd.f32 %v377_v39, %v376_v35 }
  0xf4   :  { %v315_v48 = vadd.f32 %v314_v40, %v313_v32  ;;  %v355_v49 = vrot.slane %v354_v41, 2  ;;  %v302_v50 = vrot.slane %v301_v42, 2  ;;  %v325_v59 = vadd.f32 %v324_v51, %v323_v43 }
  0xf5   :  { %v393_v52 = vrot.slane %v392_v44, 1  ;;  %v189_v53 = vrot.slane %v188_v45, 1  ;;  %v279_v54 = vadd.f32 %v278_v46, %v277_v38  ;;  %v379_v55 = vrot.slane %v378_v47, 2 }
  0xf6   :  { %v316_v56 = vrot.slane %v315_v48, 1  ;;  %v356_v57 = vadd.f32 %v355_v49, %v354_v41  ;;  %v303_v58 = vadd.f32 %v302_v50, %v301_v42  ;;  %v752_v60 = vmul.f32 %v722_v27, %v722_v27 }
  0xf7   :  { %372 = vrot.lane.b32.xlu1 %v370_v21, %s635_s1  ;;  %295 = vrot.lane.b32.xlu0 %v293_v28, %s634_s0  ;;  %v280_v61 = vrot.slane %v279_v54, 1  ;;  %v380_v62 = vadd.f32 %v379_v55, %v378_v47  ;;  %v394_v63 = vadd.f32 %v393_v52, %v392_v44  ;;  %v326_v1 = vrot.slane %v325_v59, 2 }
  0xf8   :  { %v357_v0 = vrot.slane %v356_v57, 1  ;;  %v190_v2 = vadd.f32 %v189_v53, %v188_v45  ;;  %v317_v3 = vadd.f32 %v316_v56, %v315_v48  ;;  %v400_v4 = vsel %vm221_vm3, %v710_v22, 0.0 }
  0xf9   :  { %v412_v5 = vsel %vm221_vm3, %v720_v26, 0.0  ;;  %v281_v6 = vadd.f32 %v280_v61, %v279_v54  ;;  %v304_v7 = vrot.slane %v303_v58, 1  ;;  %v327_v8 = vadd.f32 %v326_v1, %v325_v59 }
  0xfa   :  { %v401_v9 = vrot.slane %v400_v4, 4  ;;  %v381_v13 = vrot.slane %v380_v62, 1  ;;  %v413_v14 = vrot.slane %v412_v5, 4  ;;  %v441_v15 = vsel %vm171_vm2, %v722_v27, 0.0 }
  0xfb   :  { %396 = vrot.lane.b32.xlu1 %v394_v63, %s634_s0  ;;  %192 = vrot.lane.b32.xlu0 %v190_v2, %s635_s1  ;;  %v453_v16 = vsel %vm171_vm2, %v752_v60, 0.0  ;;  %v358_v17 = vadd.f32 %v357_v0, %v356_v57  ;;  %v442_v19 = vrot.slane %v441_v15, 4  ;;  %v465_v24 = vsel %vm196_vm1, %v722_v27, 0.0 }
  0xfc   :  { %v402_v18 = vadd.f32 %v401_v9, %v400_v4  ;;  %v454_v21 = vrot.slane %v453_v16, 4  ;;  %v414_v23 = vadd.f32 %v413_v14, %v412_v5  ;;  %v477_v25 = vsel %vm196_vm1, %v752_v60, 0.0 }
  0xfd   :  { %v489_v28 = vsel %vm221_vm3, %v722_v27, 0.0  ;;  %v328_v29 = vrot.slane %v327_v8, 1  ;;  %v443_v31 = vadd.f32 %v442_v19, %v441_v15  ;;  %v466_v34 = vrot.slane %v465_v24, 4 }
  0xfe   :  { %v403_v30 = vrot.slane %v402_v18, 2  ;;  %v455_v32 = vadd.f32 %v454_v21, %v453_v16  ;;  %v415_v33 = vrot.slane %v414_v23, 2  ;;  %v478_v35 = vrot.slane %v477_v25, 4 }
  0xff   :  { %319 = vrot.lane.b32.xlu0 %v317_v3, %s636_s7  ;;  %283 = vrot.lane.b32.xlu1 %v281_v6, %s635_s1  ;;  %v490_v36 = vrot.slane %v489_v28, 4  ;;  %v444_v38 = vrot.slane %v443_v31, 2  ;;  %v501_v40 = vsel %vm221_vm3, %v752_v60, 0.0  ;;  %v305_v41 = vadd.f32 %v304_v7, %v303_v58 }
 0x100   :  { %v404_v37 = vadd.f32 %v403_v30, %v402_v18  ;;  %v456_v39 = vrot.slane %v455_v32, 2  ;;  %v416_v42 = vadd.f32 %v415_v33, %v414_v23  ;;  %v467_v43 = vadd.f32 %v466_v34, %v465_v24 }
 0x101   :  { %v479_v44 = vadd.f32 %v478_v35, %v477_v25  ;;  %v502_v45 = vrot.slane %v501_v40, 4  ;;  %v382_v46 = vadd.f32 %v381_v13, %v380_v62  ;;  %v329_v47 = vadd.f32 %v328_v29, %v327_v8 }
 0x102   :  { %v405_v48 = vrot.slane %v404_v37, 1  ;;  %v445_v49 = vadd.f32 %v444_v38, %v443_v31  ;;  %v457_v50 = vadd.f32 %v456_v39, %v455_v32  ;;  %v491_v51 = vadd.f32 %v490_v36, %v489_v28 }
 0x103   :  { %360 = vrot.lane.b32.xlu0 %v358_v17, %s635_s1  ;;  %307 = vrot.lane.b32.xlu1 %v305_v41, %s634_s0  ;;  %v417_v52 = vrot.slane %v416_v42, 1  ;;  %v468_v53 = vrot.slane %v467_v43, 2  ;;  %v480_v54 = vrot.slane %v479_v44, 2  ;;  %v503_v55 = vadd.f32 %v502_v45, %v501_v40 }
 0x104   :  { %v406_v56 = vadd.f32 %v405_v48, %v404_v37  ;;  %v446_v57 = vrot.slane %v445_v49, 1  ;;  %v458_v58 = vrot.slane %v457_v50, 1  ;;  %v492_v59 = vrot.slane %v491_v51, 2 }
 0x105   :  { %v418_v61 = vadd.f32 %v417_v52, %v416_v42  ;;  %v469_v63 = vadd.f32 %v468_v53, %v467_v43  ;;  %v481_v62 = vadd.f32 %v480_v54, %v479_v44  ;;  %v504_v0 = vrot.slane %v503_v55, 2 }
 0x106   :  { %v447_v1 = vadd.f32 %v446_v57, %v445_v49  ;;  %v493_v2 = vadd.f32 %v492_v59, %v491_v51  ;;  %v459_v3 = vadd.f32 %v458_v58, %v457_v50  ;;  %v154_v16 = vsel %vm153_vm4, %v692_v10, 0.0 }
 0x107   :  { %384 = vrot.lane.b32.xlu0 %v382_v46, %s634_s0  ;;  %331 = vrot.lane.b32.xlu1 %v329_v47, %s636_s7  ;;  %v470_v4 = vrot.slane %v469_v63, 1  ;;  %v482_v5 = vrot.slane %v481_v62, 1  ;;  %v505_v6 = vadd.f32 %v504_v0, %v503_v55  ;;  %v155_v17 = vrot.slane %v154_v16, 4 }
 0x108   :  { %v494_v9 = vrot.slane %v493_v2, 1  ;;  %v246_v18 = vsel %vm153_vm4, %v698_v12, 0.0  ;;  %v163_v28 = vsel %vm153_vm4, %v696_v11, 0.0  ;;  %v255_v33 = vsel %vm153_vm4, %v708_v20, 0.0 }
 0x109   :  { %v471_v7 = vadd.f32 %v470_v4, %v469_v63  ;;  %v483_v8 = vadd.f32 %v482_v5, %v481_v62  ;;  %v506_v13 = vrot.slane %v505_v6, 1  ;;  %v156_v19 = vadd.f32 %v155_v17, %v154_v16 }
 0x10a   :  { %v495_v14 = vadd.f32 %v494_v9, %v493_v2  ;;  %v247_v21 = vrot.slane %v246_v18, 4  ;;  %v164_v31 = vrot.slane %v163_v28, 4  ;;  %v335_v34 = vsel %vm153_vm4, %v710_v22, 0.0 }
 0x10b   :  { %408 = vrot.lane.b32.xlu0 %v406_v56, %s636_s7  ;;  %420 = vrot.lane.b32.xlu1 %v418_v61, %s636_s7  ;;  %v507_v15 = vadd.f32 %v506_v13, %v505_v6  ;;  %v157_v23 = vrot.slane %v156_v19, 2  ;;  %v256_v41 = vrot.slane %v255_v33, 4  ;;  %v336_v42 = vrot.slane %v335_v34, 4 }
 0x10c   :  { %v248_v24 = vadd.f32 %v247_v21, %v246_v18  ;;  %v165_v36 = vadd.f32 %v164_v31, %v163_v28  ;;  %v344_v46 = vsel %vm153_vm4, %v720_v26, 0.0  ;;  %v424_v57 = vsel %vm153_vm4, %v722_v27, 0.0 }
 0x10d   :  { %v158_v25 = vadd.f32 %v157_v23, %v156_v19  ;;  %v257_v48 = vadd.f32 %v256_v41, %v255_v33  ;;  %v337_v49 = vadd.f32 %v336_v42, %v335_v34  ;;  %v345_v54 = vrot.slane %v344_v46, 4 }
 0x10e   :  { %v249_v29 = vrot.slane %v248_v24, 2  ;;  %v166_v11 = vrot.slane %v165_v36, 2  ;;  %v425_v62 = vrot.slane %v424_v57, 4 }
 0x10f   :  { %449 = vrot.lane.b32.xlu0 %v447_v1, %s635_s1  ;;  %461 = vrot.lane.b32.xlu1 %v459_v3, %s635_s1  ;;  %v159_v30 = vrot.slane %v158_v25, 1  ;;  %v258_v55 = vrot.slane %v257_v48, 2  ;;  %v338_v56 = vrot.slane %v337_v49, 2  ;;  %v346_v63 = vadd.f32 %v345_v54, %v344_v46 }
 0x110   :  { %v250_v32 = vadd.f32 %v249_v29, %v248_v24  ;;  %v167_v51 = vadd.f32 %v166_v11, %v165_v36  ;;  %v433_v1 = vsel %vm153_vm4, %v752_v60, 0.0  ;;  %v426_v6 = vadd.f32 %v425_v62, %v424_v57 }
 0x111   :  { %v160_v35 = vadd.f32 %v159_v30, %v158_v25  ;;  %v259_v26 = vadd.f32 %v258_v55, %v257_v48  ;;  %v339_v0 = vadd.f32 %v338_v56, %v337_v49  ;;  %v347_v5 = vrot.slane %v346_v63, 2 }
 0x112   :  { %v251_v40 = vrot.slane %v250_v32, 1  ;;  %v168_v58 = vrot.slane %v167_v51, 1  ;;  %v427_v21 = vrot.slane %v426_v6, 2 }
 0x113   :  { %473 = vrot.lane.b32.xlu0 %v471_v7, %s634_s0  ;;  %485 = vrot.lane.b32.xlu1 %v483_v8, %s634_s0  ;;  %v434_v7 = vrot.slane %v433_v1, 4  ;;  %v260_v13 = vrot.slane %v259_v26, 1  ;;  %v348_v19 = vadd.f32 %v347_v5, %v346_v63 }
 0x114   :  { %v252_v20 = vadd.f32 %v251_v40, %v250_v32  ;;  %v169_v2 = vadd.f32 %v168_v58, %v167_v51  ;;  %v428_v33 = vadd.f32 %v427_v21, %v426_v6 }
 0x115   :  { %v435_v23 = vadd.f32 %v434_v7, %v433_v1  ;;  %v261_v60 = vadd.f32 %v260_v13, %v259_v26  ;;  %v520_v13 = vld [vmem:[%s827_s2] sm:$0x1] }
 0x116   :  { %v429_v40 = vrot.slane %v428_v33, 1 }
 0x117   :  { %497 = vrot.lane.b32.xlu0 %v495_v14, %s636_s7  ;;  %509 = vrot.lane.b32.xlu1 %v507_v15, %s636_s7  ;;  %v340_v14 = vrot.slane %v339_v0, 1  ;;  %v436_v36 = vrot.slane %v435_v23, 2 }
 0x118   :  { %v430_v49 = vadd.f32 %v429_v40, %v428_v33 }
 0x119   :  { %v341_v28 = vadd.f32 %v340_v14, %v339_v0  ;;  %v437_v11 = vadd.f32 %v436_v36, %v435_v23 }
 0x15d   :  { %v206_v37 = vpop.permute.xlu1 %205  ;;  %v181_v38 = vpop.permute.xlu0 %180 }
 0x15e   :  { %v183_v39 = vadd.f32 %v181_v38, %v160_v35  ;;  %v349_v35 = vrot.slane %v348_v19, 1 }
 0x160   :  { %v208_v43 = vadd.f32 %v206_v37, %v183_v39  ;;  %v350_v42 = vadd.f32 %v349_v35, %v348_v19 }
 0x161   :  { %v231_v44 = vpop.permute.xlu0 %230  ;;  %v218_v45 = vpop.permute.xlu1 %217 }
 0x162   :  { %v233_v47 = vadd.f32 %v231_v44, %v208_v43 }
 0x164   :  { %v253_v50 = vadd.f32 %v252_v20, %v233_v47 }
 0x165   :  { %v243_v52 = vpop.permute.xlu1 %242  ;;  %v272_v53 = vpop.permute.xlu0 %271 }
 0x166   :  { %v274_v8 = vadd.f32 %v272_v53, %v253_v50  ;;  %v438_v50 = vrot.slane %v437_v11, 1 }
 0x168   :  { %v439_v56 = vadd.f32 %v438_v50, %v437_v11 }
 0x169   :  { %v373_v59 = vpop.permute.xlu1 %372  ;;  %v296_v61 = vpop.permute.xlu0 %295 }
 0x16a   :  { %v298_v15 = vadd.f32 %v296_v61, %v274_v8 }
 0x16d   :  { %v397_v3 = vpop.permute.xlu1 %396  ;;  %v193_v4 = vpop.permute.xlu0 %192 }
 0x16e   :  { %v195_v9 = vadd.f32 %v193_v4, %v169_v2 }
 0x170   :  { %v220_v16 = vadd.f32 %v218_v45, %v195_v9  ;;  %v541_v9 = vlaneseq }
 0x171   :  { %v320_v17 = vpop.permute.xlu0 %319  ;;  %v284_v18 = vpop.permute.xlu1 %283 }
 0x172   :  { %v322_v24 = vadd.f32 %v320_v17, %v298_v15  ;;  %v245_v25 = vadd.f32 %v243_v52, %v220_v16  ;;  %v542_v14 = vshrl.u32 %v541_v9, 7  ;;  %v522_v17 = vld [vmem:[%s828_s3] sm:$0x1] }
 0x174   :  { %v262_v29 = vadd.f32 %v261_v60, %v245_v25  ;;  %v342_v30 = vadd.f32 %v341_v28, %v322_v24  ;;  %v543_v19 = vsub.s32 0, %v542_v14 }
 0x175   :  { %v361_v31 = vpop.permute.xlu0 %360  ;;  %v308_v32 = vpop.permute.xlu1 %307 }
 0x176   :  { %v286_v34 = vadd.f32 %v284_v18, %v262_v29  ;;  %v363_v41 = vadd.f32 %v361_v31, %v342_v30 }
 0x178   :  { %v310_v37 = vadd.f32 %v308_v32, %v286_v34  ;;  %v637_v32 = vmov 1983009808  }
 0x179   :  { %v385_v38 = vpop.permute.xlu0 %384  ;;  %v332_v39 = vpop.permute.xlu1 %331  ;;  %v584_v33 = vunpack.c.l.s4 %v637_v32 }
 0x17a   :  { %v334_v43 = vadd.f32 %v332_v39, %v310_v37  ;;  %v387_v44 = vadd.f32 %v385_v38, %v363_v41 }
 0x17b   :  { %v585_v39 = vunpack.c.0.s8 %v584_v33 }
 0x17c   :  { %v351_v45 = vadd.f32 %v350_v42, %v334_v43 }
 0x17d   :  { %v409_v46 = vpop.permute.xlu0 %408  ;;  %v421_v47 = vpop.permute.xlu1 %420 }
 0x17e   :  { %v411_v20 = vadd.f32 %v409_v46, %v387_v44  ;;  %v375_v48 = vadd.f32 %v373_v59, %v351_v45 }
 0x180   :  { %v399_v51 = vadd.f32 %v397_v3, %v375_v48  ;;  %v431_v52 = vadd.f32 %v430_v49, %v411_v20  ;;  %v588_v48 = vsub.s32 %v585_v39, %v542_v14 }
 0x181   :  { %v450_v53 = vpop.permute.xlu0 %449  ;;  %v462_v54 = vpop.permute.xlu1 %461 }
 0x182   :  { %v423_v55 = vadd.f32 %v421_v47, %v399_v51  ;;  %v452_v63 = vadd.f32 %v450_v53, %v431_v52 }
 0x184   :  { %v440_v57 = vadd.f32 %v439_v56, %v423_v55 }
 0x185   :  { %v474_v58 = vpop.permute.xlu0 %473  ;;  %v486_v61 = vpop.permute.xlu1 %485 }
 0x186   :  { %v464_v62 = vadd.f32 %v462_v54, %v440_v57  ;;  %v476_v26 = vadd.f32 %v474_v58, %v452_v63 }
 0x188   :  { %v488_v0 = vadd.f32 %v486_v61, %v464_v62 }
 0x189   :  { %v498_v1 = vpop.permute.xlu0 %497  ;;  %v510_v2 = vpop.permute.xlu1 %509 }
 0x18a   :  { %v500_v4 = vadd.f32 %v498_v1, %v476_v26  ;;  %v512_v5 = vadd.f32 %v510_v2, %v488_v0 }
 0x18c   :  { %v514_v59 = vmul.f32 0.03125, %v500_v4  ;;  %v515_v7 = vmul.f32 0.03125, %v512_v5 }
 0x18e   :  { %v516_v6 = vmul.f32 %v514_v59, %v514_v59 }
 0x190   :  { %v517_v3 = vsub.f32 %v515_v7, %v516_v6 }
 0x192   :  { %v518_v8 = vadd.f32 1e-05, %v517_v3 }
 0x194   :  { %631 = vrsqrt.f32 %v518_v8 }
 0x19e   :  { %v632_v15 = vpop.eup %631 }
 0x19f   :  { %v521_v16 = vmul.f32 %v632_v15, %v520_v13 }
 0x1a1   :  { %529 = vrot.lane.b32.xlu1 %v521_v16, %s634_s0  ;;  %526 = vrot.lane.b32.xlu0 %v521_v16, %s636_s7  ;;  %v523_v18 = vmul.f32 %v521_v16, %v514_v59 }
 0x1a3   :  { %v524_v21 = vsub.f32 %v522_v17, %v523_v18 }
 0x1a5   :  { %532 = vrot.lane.b32.xlu0 %v521_v16, %s635_s1  ;;  %v544_v23 = vrot.slane %v524_v21, %v543_v19 }
 0x1a7   :  { %545 = vrot.lane.b32.xlu1 %v544_v23, %s636_s7 }
 0x1a9   :  { %548 = vrot.lane.b32.xlu0 %v544_v23, %s634_s0 }
 0x1ab   :  { %551 = vrot.lane.b32.xlu1 %v544_v23, %s635_s1 }
 0x213   :  { %v527_v24 = vpop.permute.xlu0 %526  ;;  %v530_v25 = vpop.permute.xlu1 %529 }
 0x214   :  { %v535_v60 = vsel %vm67_vm0, %v521_v16, %v527_v24 }
 0x215   :  { %v537_v28 = vsel %vm536_vm5, %v535_v60, %v530_v25 }
 0x217   :  { %v533_v29 = vpop.permute.xlu0 %532 }
 0x218   :  { %v539_v30 = vsel %vm538_vm6, %v537_v28, %v533_v29 }
 0x219   :  { %v546_v31 = vpop.permute.xlu1 %545  ;;  %v560_v34 = vrot.slane %v539_v30, %v543_v19 }
 0x21a   :  { %v554_v35 = vsel %vm67_vm0, %v524_v21, %v546_v31 }
 0x21b   :  { %v549_v36 = vpop.permute.xlu0 %548  ;;  %v561_v40 = vmul.f32 %v560_v34, %v692_v10  ;;  %v562_v42 = vmul.f32 %v560_v34, %v698_v12  ;;  %v563_v43 = vmul.f32 %v560_v34, %v710_v22  ;;  %v564_v11 = vmul.f32 %v560_v34, %v722_v27 }
 0x21c   :  { %v555_v37 = vsel %vm536_vm5, %v554_v35, %v549_v36 }
 0x21d   :  { %v552_v38 = vpop.permute.xlu1 %551 }
 0x21e   :  { %v556_v41 = vsel %vm538_vm6, %v555_v37, %v552_v38 }
 0x21f   :  { %v568_v44 = vrot.slane %v556_v41, %v543_v19 }
 0x221   :  { %v569_v45 = vadd.f32 %v568_v44, %v561_v40  ;;  %v570_v46 = vadd.f32 %v568_v44, %v562_v42  ;;  %v571_v47 = vadd.f32 %v568_v44, %v563_v43  ;;  %v572_v20 = vadd.f32 %v568_v44, %v564_v11 }
 0x223   :  { %v573_v49 = vmax.f32 %v569_v45, 0.0  ;;  %v574_v50 = vmax.f32 %v570_v46, 0.0  ;;  %v575_v51 = vmax.f32 %v571_v47, 0.0  ;;  %v576_v52 = vmax.f32 %v572_v20, 0.0 }
 0x225   :  { %v581_v53 = vcombine.low %v573_v49, %v574_v50  ;;  %v582_v54 = vcombine.low %v575_v51, %v576_v52 }
 0x227   :  { %v589_v10 = vrot.slane %v581_v53, %v588_v48  ;;  %v596_v55 = vrot.slane %v582_v54, %v588_v48 }
 0x229   :  { %v597_v56 = vcombine.low %v589_v10, %v596_v55 }
 0x22b   :  { %599 = vst [vmem:[%s829_s4] sm:$0xff] %v597_v56 }

// kernel: netg1_forward.5
= control target key start
LH: loop header
LB: loop body
LE: loop exit
PB: predicated region body
PF: predicated region fallthrough
CT: control target
= control target key end

     0   :  { %v1542_v1 = vmov 0.0   ;;  %s1543_s19 = smov 4   ;;  %vm1544_vm0 = vmmov 0   ;;  %s1545_s20 = smov 3   ;;  %v22_v3 = vlaneseq  ;;  %vm72_vm13 = vcmask 31744   ;;  %s1914_s0 = inlined_call_operand.vmem [shape: bf16[32,32], index: 0, kind: input, shape index: {}]   ;;  %s1915_s1 = inlined_call_operand.vmem [shape: bf16[4,4,16,32], index: 1, kind: input, shape index: {}]   ;;  %s1916_s2 = inlined_call_operand.vmem [shape: f32[16,1], index: 2, kind: input, shape index: {}]   ;;  %s1917_s3 = inlined_call_operand.vmem [shape: f32[16,1], index: 3, kind: input, shape index: {}]   ;;  %s1918_s4 = inlined_call_operand.vmem [shape: f32[4,16,32], index: 4, kind: output, shape index: {}]  }
   0x1   :  { %v1581_v0 = vld [vmem:[%s1914_s0] sm:$0xff]   ;;  %1331 = vmatprep.subr.bf16.mxu0 %v1542_v1  ;;  %1363 = vmatprep.subr.bf16.mxu1 %v1542_v1  ;;  %v1588_v2 = vld [vmem:[%s1914_s0 + $0x8] sm:$0xff]   ;;  %s1546_s21 = smov 5   ;;  %s1547_s0 = smov 1   ;;  %vm328_vm15 = vcmask 23552   ;;  %v1526_v51 = vld [vmem:[%s1915_s1 + $0x10] sm:$0xff]  }
   0x2   :  { %68 = vrot.lane.b32.xlu0 %v1581_v0, %s1543_s19  ;;  %70 = vrot.lane.b32.xlu1 %v1588_v2, %s1543_s19  ;;  %s1548_s22 = smov 127   ;;  %s1549_s23 = smov 125   ;;  %v23_v4 = vand.u32 127, %v22_v3  ;;  %v1522_v30 = vld [vmem:[%s1915_s1 + $0x8] sm:$0xff]   ;;  %v1524_v44 = vld [vmem:[%s1915_s1] sm:$0xff]  }
   0x3   :  { %1335 = vmatprep.mubr.msk.bf16.mxu0 %vm1544_vm0, %v1542_v1  ;;  %1367 = vmatprep.mubr.msk.bf16.mxu1 %vm1544_vm0, %v1542_v1  ;;  %s1550_s24 = smov 124   ;;  %s1551_s25 = smov 123   ;;  %v1523_v37 = vld [vmem:[%s1915_s1 + $0x28] sm:$0xff]   ;;  %v1525_v47 = vld [vmem:[%s1915_s1 + $0x20] sm:$0xff]   ;;  %v1527_v55 = vld [vmem:[%s1915_s1 + $0x30] sm:$0xff]  }
   0x4   :  { %v25_v5 = vshra.s32 %v23_v4, 2  ;;  %v24_v6 = vand.u32 3, %v23_v4  ;;  %v1528_v59 = vld [vmem:[%s1915_s1 + $0x18] sm:$0xff]   ;;  %v1530_v61 = vld [vmem:[%s1915_s1 + $0x48] sm:$0xff]   ;;  %v1535_v10 = vld [vmem:[%s1915_s1 + $0x70] sm:$0xff]  }
   0x5   :  { %v1529_v60 = vld [vmem:[%s1915_s1 + $0x38] sm:$0xff]   ;;  %v1531_v62 = vld [vmem:[%s1915_s1 + $0x68] sm:$0xff]  }
   0x6   :  { %324 = vrot.lane.b32.xlu0 %v1581_v0, %s1545_s20  ;;  %326 = vrot.lane.b32.xlu1 %v1588_v2, %s1545_s20  ;;  %v1610_v7 = vand.u32 3, %v25_v5  ;;  %v1612_v8 = vadd.s32 1, %v24_v6  ;;  %v1631_v12 = vadd.s32 4294967295, %v24_v6 }
   0x8   :  { %v1615_v9 = vadd.s32 1, %v1610_v7  ;;  %vm337_vm1 = vcmp.lt.s32.totalorder %v1612_v8, 4  ;;  %v55_v11 = vadd.s32 4294967295, %v1610_v7  ;;  %vm52_vm10 = vcmp.ge.s32.totalorder %v1631_v12, 0 }
   0xa   :  { %39 = vrot.lane.b32.xlu0 %v1581_v0, %s1546_s21  ;;  %41 = vrot.lane.b32.xlu1 %v1588_v2, %s1546_s21  ;;  %vm689_vm2 = vcmp.ge.s32.totalorder %v1615_v9, 0  ;;  %vm691_vm3 = vcmp.lt.s32.totalorder %v1615_v9, 4  ;;  %vm56_vm6 = vcmp.ge.s32.totalorder %v55_v11, 0  ;;  %vm58_vm7 = vcmp.lt.s32.totalorder %v55_v11, 4  ;;  %v1532_v9 = vld [vmem:[%s1915_s1 + $0x40] sm:$0xff]  }
   0xb   :  { %vm993_vm4 = vmand %vm337_vm1, %vm689_vm2 }
   0xc   :  { %vm1626_vm5 = vmand %vm993_vm4, %vm691_vm3  ;;  %vm202_vm4 = vcmp.ge.s32.totalorder %v1610_v7, 0 }
   0xd   :  { %vm83_vm8 = vmand %vm56_vm6, %vm58_vm7 }
   0xe   :  { %191 = vrot.lane.b32.xlu0 %v1581_v0, %s1547_s0  ;;  %193 = vrot.lane.b32.xlu1 %v1588_v2, %s1547_s0  ;;  %vm339_vm9 = vmand %vm337_vm1, %vm56_vm6  ;;  %v1210_v13 = vsel %vm83_vm8, 1.0, %v1542_v1  ;;  %vm204_vm8 = vcmp.lt.s32.totalorder %v1610_v7, 4 }
   0xf   :  { %vm340_vm11 = vmand %vm339_vm9, %vm58_vm7  ;;  %v86_v14 = vpack.c.bf16 %v1210_v13, %v1210_v13  ;;  %vm94_vm9 = vcmask 261120  }
  0x10   :  { %vm57_vm12 = vmand %vm52_vm10, %vm56_vm6  ;;  %v1228_v15 = vsel %vm340_vm11, 1.0, %v1542_v1  ;;  %vm43_vm6 = vcmask 39936  }
  0x11   :  { %vm59_vm14 = vmand %vm57_vm12, %vm58_vm7  ;;  %v343_v21 = vpack.c.bf16 %v1228_v15, %v1228_v15  ;;  %vm195_vm12 = vcmask 7168   ;;  %v1533_v15 = vld [vmem:[%s1915_s1 + $0x60] sm:$0xff]  }
  0x12   :  { %501 = vrot.lane.b32.xlu0 %v1581_v0, %s1548_s22  ;;  %503 = vrot.lane.b32.xlu1 %v1588_v2, %s1548_s22  ;;  %v1207_v22 = vsel %vm59_vm14, 1.0, %v1542_v1  ;;  %vm203_vm7 = vmand %vm52_vm10, %vm202_vm4 }
  0x13   :  { %v62_v29 = vpack.c.bf16 %v1207_v22, %v1207_v22  ;;  %vm205_vm11 = vmand %vm203_vm7, %vm204_vm8  ;;  %vm756_vm7 = vcmask 228352  }
  0x14   :  { %v1217_v39 = vsel %vm205_vm11, 1.0, %v1542_v1 }
  0x15   :  { %v208_v41 = vpack.c.bf16 %v1217_v39, %v1217_v39 }
  0x16   :  { %677 = vrot.lane.b32.xlu0 %v1581_v0, %s1549_s23  ;;  %752 = vrot.lane.b32.xlu1 %v1581_v0, %s1550_s24 }
  0x1a   :  { %679 = vrot.lane.b32.xlu0 %v1588_v2, %s1549_s23  ;;  %754 = vrot.lane.b32.xlu1 %v1588_v2, %s1550_s24 }
  0x1e   :  { %982 = vrot.lane.b32.xlu0 %v1581_v0, %s1551_s25  ;;  %984 = vrot.lane.b32.xlu1 %v1588_v2, %s1551_s25 }
  0x74   :  { %v69_v16 = vpop.permute.xlu0 %68  ;;  %v71_v18 = vpop.permute.xlu1 %70 }
  0x75   :  { %v74_v17 = vsel %vm72_vm13, 0, %v69_v16  ;;  %v77_v19 = vsel %vm72_vm13, 0, %v71_v18  ;;  %vm512_vm13 = vmand %vm337_vm1, %vm202_vm4  ;;  %vm505_vm1 = vcmask 252928  }
  0x76   :  { %v87_v20 = vmul.bf16 %v86_v14, %v74_v17  ;;  %v88_v23 = vmul.bf16 %v86_v14, %v77_v19  ;;  %vm513_vm14 = vmand %vm512_vm13, %vm204_vm8  ;;  %v1274_v19 = vsel %vm1626_vm5, 1.0, %v1542_v1 }
  0x77   :  { %v1239_v49 = vsel %vm513_vm14, 1.0, %v1542_v1  ;;  %v997_v22 = vpack.c.bf16 %v1274_v19, %v1274_v19 }
  0x78   :  { %1332 = vmatpush3.bf16.msra.mxu0 %v87_v20  ;;  %v325_v24 = vpop.permute.xlu0 %324  ;;  %v327_v26 = vpop.permute.xlu1 %326  ;;  %v516_v52 = vpack.c.bf16 %v1239_v49, %v1239_v49 }
  0x79   :  { %v330_v25 = vsel %vm328_vm15, 0, %v325_v24  ;;  %1333 = vmatprep.subr.bf16.mxu0 %v1542_v1  ;;  %v333_v27 = vsel %vm328_vm15, 0, %v327_v26  ;;  %vm690_vm15 = vmand %vm52_vm10, %vm689_vm2  ;;  %vm681_vm10 = vcmask 236544  }
  0x7a   :  { %v344_v28 = vmul.bf16 %v343_v21, %v330_v25  ;;  %v345_v31 = vmul.bf16 %v343_v21, %v333_v27  ;;  %vm692_vm4 = vmand %vm690_vm15, %vm691_vm3  ;;  %v1534_v21 = vld [vmem:[%s1915_s1 + $0x50] sm:$0xff]  }
  0x7b   :  { %v1252_v3 = vsel %vm692_vm4, 1.0, %v1542_v1 }
  0x7c   :  { %1334 = vmatpush3.bf16.msra.mxu0 %v88_v23  ;;  %1364 = vmatpush3.bf16.msra.mxu1 %v344_v28  ;;  %v40_v32 = vpop.permute.xlu0 %39  ;;  %v42_v34 = vpop.permute.xlu1 %41  ;;  %v695_v4 = vpack.c.bf16 %v1252_v3, %v1252_v3  ;;  %v1536_v28 = vld [vmem:[%s1915_s1 + $0x58] sm:$0xff]  }
  0x7d   :  { %v46_v33 = vsel %vm43_vm6, 0, %v40_v32  ;;  %1339 = vmatprep.subr.bf16.mxu0 %v1542_v1  ;;  %1365 = vmatprep.subr.bf16.mxu1 %v1542_v1  ;;  %v49_v36 = vsel %vm43_vm6, 0, %v42_v34  ;;  %vm764_vm6 = vmand %vm689_vm2, %vm691_vm3  ;;  %vm986_vm2 = vcmask 220160  }
  0x7e   :  { %v63_v35 = vmul.bf16 %v62_v29, %v46_v33  ;;  %v64_v38 = vmul.bf16 %v62_v29, %v49_v36  ;;  %v1257_v7 = vsel %vm764_vm6, 1.0, %v1542_v1  ;;  %v1537_v29 = vld [vmem:[%s1915_s1 + $0x78] sm:$0xff]  }
  0x7f   :  { %1336 = vmatmul.mubr.msk.bf16.vlgmr.msra.gmra.mrb[0].mxu0 %vm94_vm9, %v1522_v30  ;;  %v767_v11 = vpack.c.bf16 %v1257_v7, %v1257_v7 }
  0x80   :  { %1340 = vmatpush3.bf16.msra.mxu0 %v63_v35  ;;  %1366 = vmatpush3.bf16.msra.mxu1 %v345_v31  ;;  %v192_v40 = vpop.permute.xlu0 %191  ;;  %v194_v43 = vpop.permute.xlu1 %193 }
  0x81   :  { %1371 = vmatprep.subr.bf16.mxu1 %v1542_v1  ;;  %1341 = vmatprep.subr.bf16.mxu0 %v1542_v1  ;;  %v197_v42 = vsel %vm195_vm12, 0, %v192_v40  ;;  %v200_v46 = vsel %vm195_vm12, 0, %v194_v43 }
  0x82   :  { %1343 = vmatprep.mubr.msk.bf16.mxu0 %vm1544_vm0, %v1542_v1  ;;  %v209_v45 = vmul.bf16 %v208_v41, %v197_v42  ;;  %v210_v48 = vmul.bf16 %v208_v41, %v200_v46 }
  0x83   :  { %1368 = vmatmul.mubr.msk.bf16.vlgmr.msra.gmra.mrb[0].mxu1 %vm94_vm9, %v1523_v37 }
  0x84   :  { %1372 = vmatpush3.bf16.msra.mxu1 %v87_v20  ;;  %1342 = vmatpush3.bf16.msra.mxu0 %v64_v38  ;;  %v502_v50 = vpop.permute.xlu0 %501  ;;  %v504_v54 = vpop.permute.xlu1 %503 }
  0x85   :  { %1373 = vmatprep.subr.bf16.mxu1 %v1542_v1  ;;  %1347 = vmatprep.subr.bf16.mxu0 %v1542_v1  ;;  %v507_v53 = vsel %vm505_vm1, %v502_v50, 0  ;;  %v510_v57 = vsel %vm505_vm1, %v504_v54, 0 }
  0x86   :  { %1375 = vmatprep.mubr.msk.bf16.mxu1 %vm1544_vm0, %v1542_v1  ;;  %v517_v56 = vmul.bf16 %v516_v52, %v507_v53  ;;  %v518_v58 = vmul.bf16 %v516_v52, %v510_v57 }
  0x88   :  { %1374 = vmatpush3.bf16.msra.mxu1 %v88_v23  ;;  %v678_v63 = vpop.permute.xlu0 %677  ;;  %v753_v5 = vpop.permute.xlu1 %752 }
  0x89   :  { %1379 = vmatprep.subr.bf16.mxu1 %v1542_v1  ;;  %v683_v6 = vsel %vm681_vm10, %v678_v63, 0  ;;  %v758_v12 = vsel %vm756_vm7, %v753_v5, 0 }
  0x8a   :  { %v768_v16 = vmul.bf16 %v767_v11, %v758_v12 }
  0x8b   :  { %1344 = vmatmul.mubr.msk.bf16.vlgmr.msra.gmra.mrb[0].mxu0 %vm94_vm9, %v1524_v44 }
  0x8c   :  { %1348 = vmatpush3.bf16.msra.mxu0 %v209_v45  ;;  %1351 = vmatprep.mubr.msk.bf16.mxu0 %vm1544_vm0, %v1542_v1  ;;  %v680_v8 = vpop.permute.xlu0 %679  ;;  %v755_v14 = vpop.permute.xlu1 %754 }
  0x8d   :  { %1349 = vmatprep.subr.bf16.mxu0 %v1542_v1  ;;  %v686_v13 = vsel %vm681_vm10, %v680_v8, 0  ;;  %v1552_v8 = vmov 0  }
  0x8e   :  { %v697_v17 = vmul.bf16 %v695_v4, %v686_v13  ;;  %1518 = vset.pattern.permute.xlu1 %v1552_v8  ;;  %1519 = vset.pattern.permute.xlu0 %v1552_v8 }
  0x8f   :  { %1376 = vmatmul.mubr.msk.bf16.vlgmr.msra.gmra.mrb[0].mxu1 %vm94_vm9, %v1525_v47 }
  0x90   :  { %1380 = vmatpush3.bf16.msra.mxu1 %v1581_v0  ;;  %1350 = vmatpush3.bf16.msra.mxu0 %v210_v48  ;;  %v983_v20 = vpop.permute.xlu0 %982  ;;  %v985_v24 = vpop.permute.xlu1 %984 }
  0x91   :  { %1381 = vmatprep.subr.bf16.mxu1 %v1542_v1  ;;  %1355 = vmatprep.subr.bf16.mxu0 %v1542_v1  ;;  %v988_v23 = vsel %vm986_vm2, %v983_v20, 0  ;;  %v991_v26 = vsel %vm986_vm2, %v985_v24, 0 }
  0x92   :  { %1383 = vmatprep.mubr.msk.bf16.mxu1 %vm1544_vm0, %v1542_v1  ;;  %v998_v25 = vmul.bf16 %v997_v22, %v988_v23  ;;  %v999_v27 = vmul.bf16 %v997_v22, %v991_v26 }
  0x94   :  { %1382 = vmatpush3.bf16.msra.mxu1 %v1588_v2 }
  0x95   :  { %1387 = vmatprep.subr.bf16.mxu1 %v1542_v1 }
  0x97   :  { %1352 = vmatmul.mubr.msk.bf16.vlgmr.msra.gmra.mrb[0].mxu0 %vm94_vm9, %v1526_v51 }
  0x98   :  { %1356 = vmatpush3.bf16.msra.mxu0 %v1581_v0  ;;  %1359 = vmatprep.mubr.msk.bf16.mxu0 %vm1544_vm0, %v1542_v1 }
  0x99   :  { %1357 = vmatprep.subr.bf16.mxu0 %v1542_v1 }
  0x9b   :  { %1384 = vmatmul.mubr.msk.bf16.vlgmr.msra.gmra.mrb[0].mxu1 %vm94_vm9, %v1527_v55 }
  0x9c   :  { %1388 = vmatpush3.bf16.msra.mxu1 %v517_v56  ;;  %1358 = vmatpush3.bf16.msra.mxu0 %v1588_v2 }
  0x9d   :  { %1389 = vmatprep.subr.bf16.mxu1 %v1542_v1  ;;  %1395 = vmatprep.subr.bf16.mxu0 %v1542_v1 }
  0x9e   :  { %1391 = vmatprep.mubr.msk.bf16.mxu1 %vm1544_vm0, %v1542_v1 }
  0xa0   :  { %1390 = vmatpush3.bf16.msra.mxu1 %v518_v58 }
  0xa1   :  { %1427 = vmatprep.subr.bf16.mxu1 %v1542_v1 }
  0xa3   :  { %1360 = vmatmul.mubr.msk.bf16.vlgmr.msra.gmra.mrb[0].mxu0 %vm94_vm9, %v1528_v59 }
  0xa4   :  { %1396 = vmatpush3.bf16.msra.mxu0 %v1581_v0  ;;  %1399 = vmatprep.mubr.msk.bf16.mxu0 %vm1544_vm0, %v1542_v1 }
  0xa5   :  { %1397 = vmatprep.subr.bf16.mxu0 %v1542_v1 }
  0xa7   :  { %1392 = vmatmul.mubr.msk.bf16.vlgmr.msra.gmra.mrb[0].mxu1 %vm94_vm9, %v1529_v60 }
  0xa8   :  { %1398 = vmatpush3.bf16.msra.mxu0 %v1588_v2  ;;  %1428 = vmatpush3.bf16.msra.mxu1 %v517_v56 }
  0xa9   :  { %1403 = vmatprep.subr.bf16.mxu0 %v1542_v1  ;;  %1429 = vmatprep.subr.bf16.mxu1 %v1542_v1 }
  0xaa   :  { %1431 = vmatprep.mubr.msk.bf16.mxu1 %vm1544_vm0, %v1542_v1 }
  0xab   :  { %1400 = vmatmul.mubr.msk.bf16.vlgmr.msra.gmra.mrb[4].mxu0 %vm94_vm9, %v1530_v61 }
  0xac   :  { %1404 = vmatpush3.bf16.msra.mxu0 %v209_v45  ;;  %1430 = vmatpush3.bf16.msra.mxu1 %v518_v58 }
  0xad   :  { %1405 = vmatprep.subr.bf16.mxu0 %v1542_v1  ;;  %1435 = vmatprep.subr.bf16.mxu1 %v1542_v1 }
  0xae   :  { %1407 = vmatprep.mubr.msk.bf16.mxu0 %vm1544_vm0, %v1542_v1 }
  0xaf   :  { %1432 = vmatmul.mubr.msk.bf16.vlgmr.msra.gmra.mrb[4].mxu1 %vm94_vm9, %v1531_v62 }
  0xb0   :  { %1406 = vmatpush3.bf16.msra.mxu0 %v210_v48  ;;  %1436 = vmatpush3.bf16.msra.mxu1 %v1581_v0  ;;  %v696_v0 = vmul.bf16 %v695_v4, %v683_v6 }
  0xb1   :  { %1437 = vmatprep.subr.bf16.mxu1 %v1542_v1  ;;  %1411 = vmatprep.subr.bf16.mxu0 %v1542_v1 }
  0xb2   :  { %1439 = vmatprep.mubr.msk.bf16.mxu1 %vm1544_vm0, %v1542_v1 }
  0xb4   :  { %1438 = vmatpush3.bf16.msra.mxu1 %v1588_v2  ;;  %v761_v2 = vsel %vm756_vm7, %v755_v14, 0 }
  0xb5   :  { %1443 = vmatprep.subr.bf16.mxu1 %v1542_v1  ;;  %v769_v18 = vmul.bf16 %v767_v11, %v761_v2 }
  0xb7   :  { %1408 = vmatmul.mubr.msk.bf16.vlgmr.msra.gmra.mrb[4].mxu0 %vm94_vm9, %v1532_v9 }
  0xb8   :  { %1412 = vmatpush3.bf16.msra.mxu0 %v696_v0  ;;  %1415 = vmatprep.mubr.msk.bf16.mxu0 %vm1544_vm0, %v1542_v1 }
  0xb9   :  { %1413 = vmatprep.subr.bf16.mxu0 %v1542_v1 }
  0xbb   :  { %1440 = vmatmul.mubr.msk.bf16.vlgmr.msra.gmra.mrb[4].mxu1 %vm94_vm9, %v1533_v15 }
  0xbc   :  { %1444 = vmatpush3.bf16.msra.mxu1 %v768_v16  ;;  %1414 = vmatpush3.bf16.msra.mxu0 %v697_v17 }
  0xbd   :  { %1445 = vmatprep.subr.bf16.mxu1 %v1542_v1  ;;  %1419 = vmatprep.subr.bf16.mxu0 %v1542_v1 }
  0xbe   :  { %1447 = vmatprep.mubr.msk.bf16.mxu1 %vm1544_vm0, %v1542_v1 }
  0xc0   :  { %1446 = vmatpush3.bf16.msra.mxu1 %v769_v18 }
  0xc1   :  { %1451 = vmatprep.subr.bf16.mxu1 %v1542_v1 }
  0xc3   :  { %1416 = vmatmul.mubr.msk.bf16.vlgmr.msra.gmra.mrb[4].mxu0 %vm94_vm9, %v1534_v21 }
  0xc4   :  { %1420 = vmatpush3.bf16.msra.mxu0 %v768_v16  ;;  %1423 = vmatprep.mubr.msk.bf16.mxu0 %vm1544_vm0, %v1542_v1 }
  0xc5   :  { %1421 = vmatprep.subr.bf16.mxu0 %v1542_v1 }
  0xc7   :  { %1448 = vmatmul.mubr.msk.bf16.vlgmr.msra.gmra.mrb[4].mxu1 %vm94_vm9, %v1535_v10 }
  0xc8   :  { %1422 = vmatpush3.bf16.msra.mxu0 %v769_v18  ;;  %1452 = vmatpush3.bf16.msra.mxu1 %v998_v25 }
  0xc9   :  { %1453 = vmatprep.subr.bf16.mxu1 %v1542_v1  ;;  %1455 = vmatprep.mubr.msk.bf16.mxu1 %vm1544_vm0, %v1542_v1 }
  0xcc   :  { %1454 = vmatpush3.bf16.msra.mxu1 %v999_v27 }
  0xcf   :  { %1424 = vmatmul.mubr.msk.bf16.vlgmr.msra.gmra.mrb[4].mxu0 %vm94_vm9, %v1536_v28 }
  0xd3   :  { %1456 = vmatmul.mubr.msk.bf16.vlgmr.msra.gmra.mrb[4].mxu1 %vm94_vm9, %v1537_v29 }
 0x176   :  { %v1806_v30 = vpop.f32.mrb[0].mxu0 }
 0x177   :  { %v1361_v31 = vpop.f32.mrb[1].mxu0  ;;  %v1051_v32 = vsel %vm94_vm9, %v1806_v30, 0.0  ;;  %v1059_v35 = vmul.f32 %v1806_v30, %v1806_v30 }
 0x178   :  { %1052 = vadd.xlane.f32.xlu0 %v1051_v32  ;;  %v1810_v1 = vpop.f32.mrb[2].mxu0 }
 0x179   :  { %v1362_v33 = vpop.f32.mrb[3].mxu0  ;;  %v1054_v34 = vsel %vm94_vm9, %v1810_v1, 0.0  ;;  %v1061_v41 = vsel %vm94_vm9, %v1059_v35, 0.0  ;;  %v1060_v44 = vmul.f32 %v1810_v1, %v1810_v1 }
 0x17a   :  { %1055 = vadd.xlane.f32.xlu1 %v1054_v34  ;;  %v1816_v36 = vpop.f32.mrb[0].mxu1 }
 0x17b   :  { %v1393_v37 = vpop.f32.mrb[1].mxu1  ;;  %v1069_v38 = vsel %vm94_vm9, %v1816_v36, 0.0  ;;  %v1077_v42 = vmul.f32 %v1816_v36, %v1816_v36  ;;  %v1064_v46 = vsel %vm94_vm9, %v1060_v44, 0.0 }
 0x17c   :  { %1070 = vadd.xlane.f32.xlu0 %v1069_v38  ;;  %v1820_v39 = vpop.f32.mrb[2].mxu1 }
 0x17d   :  { %v1394_v40 = vpop.f32.mrb[3].mxu1  ;;  %v1072_v43 = vsel %vm94_vm9, %v1820_v39, 0.0  ;;  %v1079_v45 = vsel %vm94_vm9, %v1077_v42, 0.0  ;;  %v1078_v47 = vmul.f32 %v1820_v39, %v1820_v39 }
 0x17e   :  { %1062 = vadd.xlane.f32.xlu1 %v1061_v41 }
 0x17f   :  { %v1082_v48 = vsel %vm94_vm9, %v1078_v47, 0.0 }
 0x180   :  { %1073 = vadd.xlane.f32.xlu0 %v1072_v43 }
 0x182   :  { %1080 = vadd.xlane.f32.xlu1 %v1079_v45 }
 0x184   :  { %1065 = vadd.xlane.f32.xlu0 %v1064_v46 }
 0x188   :  { %1083 = vadd.xlane.f32.xlu0 %v1082_v48  ;;  %v1136_v48 = vld [vmem:[%s1916_s2] sm:$0xff] }
 0x1a2   :  { %v1834_v49 = vpop.f32.mrb[4].mxu0 }
 0x1a3   :  { %v1425_v50 = vpop.f32.mrb[5].mxu0  ;;  %v1087_v51 = vsel %vm94_vm9, %v1834_v49, 0.0  ;;  %v1095_v58 = vmul.f32 %v1834_v49, %v1834_v49 }
 0x1a4   :  { %1088 = vadd.xlane.f32.xlu1 %v1087_v51  ;;  %v1838_v52 = vpop.f32.mrb[6].mxu0  ;;  %v1137_v51 = vld [vmem:[%s1916_s2 + $0x8] sm:$0xff] }
 0x1a5   :  { %v1426_v53 = vpop.f32.mrb[7].mxu0  ;;  %v1090_v54 = vsel %vm94_vm9, %v1838_v52, 0.0  ;;  %v1096_v62 = vmul.f32 %v1838_v52, %v1838_v52  ;;  %v1097_v63 = vsel %vm94_vm9, %v1095_v58, 0.0 }
 0x1a6   :  { %1091 = vadd.xlane.f32.xlu0 %v1090_v54  ;;  %v1842_v55 = vpop.f32.mrb[4].mxu1 }
 0x1a7   :  { %v1457_v56 = vpop.f32.mrb[5].mxu1  ;;  %v1105_v57 = vsel %vm94_vm9, %v1842_v55, 0.0  ;;  %v1113_v3 = vmul.f32 %v1842_v55, %v1842_v55  ;;  %v1100_v4 = vsel %vm94_vm9, %v1096_v62, 0.0  ;;  %v1141_v62 = vld [vmem:[%s1917_s3 + $0x8] sm:$0xff] }
 0x1a8   :  { %1106 = vadd.xlane.f32.xlu1 %v1105_v57  ;;  %v1848_v59 = vpop.f32.mrb[6].mxu1  ;;  %v1140_v56 = vld [vmem:[%s1917_s3] sm:$0xff] }
 0x1a9   :  { %v1458_v60 = vpop.f32.mrb[7].mxu1  ;;  %v1108_v61 = vsel %vm94_vm9, %v1848_v59, 0.0  ;;  %v1114_v5 = vmul.f32 %v1848_v59, %v1848_v59  ;;  %v1115_v6 = vsel %vm94_vm9, %v1113_v3, 0.0 }
 0x1aa   :  { %1109 = vadd.xlane.f32.xlu0 %v1108_v61 }
 0x1ab   :  { %v1118_v7 = vsel %vm94_vm9, %v1114_v5, 0.0 }
 0x1ac   :  { %1098 = vadd.xlane.f32.xlu1 %v1097_v63 }
 0x1ae   :  { %1101 = vadd.xlane.f32.xlu0 %v1100_v4 }
 0x1b0   :  { %1116 = vadd.xlane.f32.xlu1 %v1115_v6 }
 0x1b2   :  { %1119 = vadd.xlane.f32.xlu0 %v1118_v7 }
 0x205   :  { %v1053_v9 = vpop.xlane.xlu0 %1052 }
 0x207   :  { %v1056_v11 = vpop.xlane.xlu1 %1055 }
 0x209   :  { %v1071_v0 = vpop.xlane.xlu0 %1070 }
 0x20a   :  { %v1075_v18 = vadd.f32 %v1071_v0, %v1053_v9 }
 0x20b   :  { %v1063_v13 = vpop.xlane.xlu1 %1062 }
 0x20d   :  { %v1074_v12 = vpop.xlane.xlu0 %1073 }
 0x20e   :  { %v1076_v20 = vadd.f32 %v1074_v12, %v1056_v11 }
 0x20f   :  { %v1081_v15 = vpop.xlane.xlu1 %1080 }
 0x210   :  { %v1085_v25 = vadd.f32 %v1081_v15, %v1063_v13 }
 0x211   :  { %v1066_v14 = vpop.xlane.xlu0 %1065 }
 0x215   :  { %v1084_v16 = vpop.xlane.xlu0 %1083 }
 0x216   :  { %v1086_v28 = vadd.f32 %v1084_v16, %v1066_v14 }
 0x231   :  { %v1089_v17 = vpop.xlane.xlu1 %1088 }
 0x232   :  { %v1093_v21 = vadd.f32 %v1089_v17, %v1075_v18 }
 0x233   :  { %v1092_v2 = vpop.xlane.xlu0 %1091 }
 0x234   :  { %v1094_v23 = vadd.f32 %v1092_v2, %v1076_v20 }
 0x235   :  { %v1107_v19 = vpop.xlane.xlu1 %1106 }
 0x236   :  { %v1111_v24 = vadd.f32 %v1107_v19, %v1093_v21 }
 0x237   :  { %v1110_v22 = vpop.xlane.xlu0 %1109 }
 0x238   :  { %v1112_v26 = vadd.f32 %v1110_v22, %v1094_v23  ;;  %v1124_v29 = vmul.f32 0.0078125, %v1111_v24 }
 0x239   :  { %v1099_v10 = vpop.xlane.xlu1 %1098 }
 0x23a   :  { %v1103_v31 = vadd.f32 %v1099_v10, %v1085_v25  ;;  %v1125_v33 = vmul.f32 0.0078125, %v1112_v26  ;;  %v1128_v38 = vmul.f32 %v1124_v29, %v1124_v29 }
 0x23b   :  { %v1102_v27 = vpop.xlane.xlu0 %1101 }
 0x23c   :  { %v1104_v34 = vadd.f32 %v1102_v27, %v1086_v28  ;;  %v1129_v42 = vmul.f32 %v1125_v33, %v1125_v33 }
 0x23d   :  { %v1117_v32 = vpop.xlane.xlu1 %1116 }
 0x23e   :  { %v1121_v35 = vadd.f32 %v1117_v32, %v1103_v31 }
 0x23f   :  { %v1120_v37 = vpop.xlane.xlu0 %1119 }
 0x240   :  { %v1126_v40 = vmul.f32 0.0078125, %v1121_v35  ;;  %v1122_v41 = vadd.f32 %v1120_v37, %v1104_v34 }
 0x242   :  { %v1130_v43 = vsub.f32 %v1126_v40, %v1128_v38  ;;  %v1127_v44 = vmul.f32 0.0078125, %v1122_v41 }
 0x244   :  { %v1132_v45 = vadd.f32 1e-05, %v1130_v43  ;;  %v1131_v46 = vsub.f32 %v1127_v44, %v1129_v42 }
 0x246   :  { %1538 = vrsqrt.f32 %v1132_v45  ;;  %v1133_v47 = vadd.f32 1e-05, %v1131_v46 }
 0x248   :  { %1540 = vrsqrt.f32 %v1133_v47 }
 0x250   :  { %v1539_v50 = vpop.eup %1538 }
 0x251   :  { %v1138_v53 = vmul.f32 %v1539_v50, %v1136_v48 }
 0x252   :  { %v1541_v54 = vpop.eup %1540 }
 0x253   :  { %1148 = vperm.xlu1 %1518, %v1138_v53   ;;  %v1139_v57 = vmul.f32 %v1541_v54, %v1137_v51  ;;  %v1142_v58 = vmul.f32 %v1138_v53, %v1124_v29 }
 0x255   :  { %1153 = vperm.xlu0 %1519, %v1139_v57   ;;  %v1144_v60 = vsub.f32 %v1140_v56, %v1142_v58  ;;  %v1143_v61 = vmul.f32 %v1139_v57, %v1125_v33 }
 0x257   :  { %1160 = vperm.xlu1 %1518, %v1144_v60   ;;  %v1145_v63 = vsub.f32 %v1141_v62, %v1143_v61 }
 0x25b   :  { %1165 = vperm.xlu1 %1518, %v1145_v63  }
 0x2d2   :  { %v1149_v3 = vpop.permute.xlu1 %1148 }
 0x2d3   :  { %v1156_v4 = vmul.f32 %v1149_v3, %v1806_v30  ;;  %v1170_v5 = vmul.f32 %v1149_v3, %v1816_v36  ;;  %v1174_v6 = vmul.f32 %v1149_v3, %v1834_v49  ;;  %v1178_v7 = vmul.f32 %v1149_v3, %v1842_v55 }
 0x2d4   :  { %v1154_v8 = vpop.permute.xlu0 %1153 }
 0x2d5   :  { %v1157_v14 = vmul.f32 %v1154_v8, %v1810_v1  ;;  %v1171_v15 = vmul.f32 %v1154_v8, %v1820_v39  ;;  %v1175_v16 = vmul.f32 %v1154_v8, %v1838_v52  ;;  %v1179_v30 = vmul.f32 %v1154_v8, %v1848_v59 }
 0x2d6   :  { %v1161_v9 = vpop.permute.xlu1 %1160 }
 0x2d7   :  { %v1168_v0 = vadd.f32 %v1161_v9, %v1156_v4  ;;  %v1172_v11 = vadd.f32 %v1170_v5, %v1161_v9  ;;  %v1176_v12 = vadd.f32 %v1174_v6, %v1161_v9  ;;  %v1180_v13 = vadd.f32 %v1178_v7, %v1161_v9 }
 0x2d9   :  { %v1182_v17 = vmax.f32 %v1168_v0, 0.0  ;;  %v1186_v36 = vmax.f32 %v1172_v11, 0.0  ;;  %v1191_v2 = vmax.f32 %v1176_v12, 0.0  ;;  %v1196_v49 = vmax.f32 %v1180_v13, 0.0 }
 0x2da   :  { %v1166_v18 = vpop.permute.xlu1 %1165 }
 0x2db   :  { %1184 = vst.msk [vmem:[%s1918_s4] sm:$0xff] %vm94_vm9, %v1182_v17  ;;  %1277 = vst.msk [vmem:[%s1918_s4 + $0x10] sm:$0xff] %vm94_vm9, %v1186_v36  ;;  %v1169_v1 = vadd.f32 %v1166_v18, %v1157_v14  ;;  %v1173_v39 = vadd.f32 %v1171_v15, %v1166_v18  ;;  %v1177_v52 = vadd.f32 %v1175_v16, %v1166_v18 }
 0x2dc   :  { %1279 = vst.msk [vmem:[%s1918_s4 + $0x20] sm:$0xff] %vm94_vm9, %v1191_v2  ;;  %1281 = vst.msk [vmem:[%s1918_s4 + $0x30] sm:$0xff] %vm94_vm9, %v1196_v49  ;;  %v1181_v55 = vadd.f32 %v1179_v30, %v1166_v18 }
 0x2dd   :  { %v1183_v59 = vmax.f32 %v1169_v1, 0.0  ;;  %v1187_v19 = vmax.f32 %v1173_v39, 0.0  ;;  %v1192_v20 = vmax.f32 %v1177_v52, 0.0 }
 0x2de   :  { %v1197_v21 = vmax.f32 %v1181_v55, 0.0 }
 0x2df   :  { %1185 = vst.msk [vmem:[%s1918_s4 + $0x8] sm:$0xff] %vm94_vm9, %v1183_v59  ;;  %1278 = vst.msk [vmem:[%s1918_s4 + $0x18] sm:$0xff] %vm94_vm9, %v1187_v19 }
 0x2e0   :  { %1280 = vst.msk [vmem:[%s1918_s4 + $0x28] sm:$0xff] %vm94_vm9, %v1192_v20  ;;  %1282 = vst.msk [vmem:[%s1918_s4 + $0x38] sm:$0xff] %vm94_vm9, %v1197_v21 }

// kernel: netg1_forward.6
= control target key start
LH: loop header
LB: loop body
LE: loop exit
PB: predicated region body
PF: predicated region fallthrough
CT: control target
= control target key end

     0   :  { %v1183_v1 = vmov 0.0   ;;  %s1184_s17 = smov 8   ;;  %s1185_s18 = smov 9   ;;  %vm1186_vm0 = vmmov 0   ;;  %v20_v2 = vlaneseq  ;;  %vm55_vm10 = vcmask 64512   ;;  %s1412_s0 = inlined_call_operand.vmem [shape: bf16[16,128], index: 0, kind: input, shape index: {}]   ;;  %s1413_s1 = inlined_call_operand.vmem [shape: bf16[4,4,8,16], index: 1, kind: input, shape index: {}]   ;;  %s1414_s2 = inlined_call_operand.vmem [shape: f32[8,1], index: 2, kind: input, shape index: {}]   ;;  %s1415_s3 = inlined_call_operand.vmem [shape: f32[8,1], index: 3, kind: input, shape index: {}]   ;;  %s1416_s4 = inlined_call_operand.vmem [shape: f32[4,8,128], index: 4, kind: output, shape index: {}]  }
   0x1   :  { %v1222_v0 = vld [vmem:[%s1412_s0] sm:$0xff]   ;;  %1023 = vmatprep.subr.bf16.mxu0 %v1183_v1  ;;  %1047 = vmatprep.subr.bf16.mxu1 %v1183_v1  ;;  %s1187_s0 = smov 7   ;;  %s1188_s19 = smov 1   ;;  %vm33_vm11 = vcmask 72704   ;;  %vm268_vm13 = vcmask 56320  }
   0x2   :  { %53 = vrot.lane.b32.xlu0 %v1222_v0, %s1184_s17  ;;  %31 = vrot.lane.b32.xlu1 %v1222_v0, %s1185_s18  ;;  %s1189_s20 = smov 127   ;;  %s1190_s21 = smov 121   ;;  %v21_v3 = vand.u32 127, %v20_v2  ;;  %v950_v23 = vld [vmem:[%s1413_s1 + $0x4] sm:$0xf] }
   0x3   :  { %1025 = vmatprep.mubr.msk.bf16.mxu0 %vm1186_vm0, %v1183_v1  ;;  %1049 = vmatprep.mubr.msk.bf16.mxu1 %vm1186_vm0, %v1183_v1  ;;  %s1191_s22 = smov 120   ;;  %s1192_s23 = smov 119   ;;  %v960_v26 = vld [vmem:[%s1413_s1 + $0x14] sm:$0xf]  ;;  %v25_v32 = vld [vmem:[%s1413_s1] sm:$0xf] }
   0x4   :  { %v23_v4 = vshra.s32 %v21_v3, 3  ;;  %v22_v6 = vand.u32 7, %v21_v3  ;;  %v959_v33 = vld [vmem:[%s1413_s1 + $0x10] sm:$0xf]  ;;  %v954_v36 = vld [vmem:[%s1413_s1 + $0x8] sm:$0xf] }
   0x5   :  { %v964_v40 = vld [vmem:[%s1413_s1 + $0x18] sm:$0xf]  ;;  %v957_v41 = vld [vmem:[%s1413_s1 + $0xc] sm:$0xf]  ;;  %v966_v43 = vld [vmem:[%s1413_s1 + $0x1c] sm:$0xf] }
   0x6   :  { %266 = vrot.lane.b32.xlu0 %v1222_v0, %s1187_s0  ;;  %157 = vrot.lane.b32.xlu1 %v1222_v0, %s1188_s19  ;;  %v1238_v5 = vand.u32 7, %v23_v4  ;;  %v1240_v7 = vadd.s32 4294967295, %v22_v6  ;;  %v1243_v9 = vadd.s32 1, %v22_v6  ;;  %v970_v44 = vld [vmem:[%s1413_s1 + $0x24] sm:$0xf] }
   0x7   :  { %v980_v45 = vld [vmem:[%s1413_s1 + $0x34] sm:$0xf]  ;;  %v969_v53 = vld [vmem:[%s1413_s1 + $0x20] sm:$0xf]  ;;  %v979_v57 = vld [vmem:[%s1413_s1 + $0x30] sm:$0xf] }
   0x8   :  { %v42_v8 = vadd.s32 4294967295, %v1238_v5  ;;  %vm39_vm1 = vcmp.ge.s32.totalorder %v1240_v7, 0  ;;  %vm274_vm4 = vcmp.lt.s32.totalorder %v1243_v9, 8  ;;  %vm163_vm12 = vcmp.ge.s32.totalorder %v1238_v5, 0  ;;  %v973_v60 = vld [vmem:[%s1413_s1 + $0x28] sm:$0xf] }
   0x9   :  { %vm164_vm14 = vmand %vm39_vm1, %vm163_vm12  ;;  %vm165_vm15 = vcmp.lt.s32.totalorder %v1238_v5, 8  ;;  %v570_v42 = vadd.s32 1, %v1238_v5  ;;  %v976_v2 = vld [vmem:[%s1413_s1 + $0x2c] sm:$0xf]  ;;  %v985_v3 = vld [vmem:[%s1413_s1 + $0x3c] sm:$0xf] }
   0xa   :  { %416 = vrot.lane.b32.xlu0 %v1222_v0, %s1189_s20  ;;  %564 = vrot.lane.b32.xlu1 %v1222_v0, %s1190_s21  ;;  %vm43_vm2 = vcmp.ge.s32.totalorder %v42_v8, 0  ;;  %vm45_vm3 = vcmp.lt.s32.totalorder %v42_v8, 8 }
   0xb   :  { %vm44_vm5 = vmand %vm39_vm1, %vm43_vm2 }
   0xc   :  { %vm63_vm6 = vmand %vm43_vm2, %vm45_vm3 }
   0xd   :  { %vm276_vm7 = vmand %vm274_vm4, %vm43_vm2  ;;  %v951_v10 = vsel %vm63_vm6, 1.0, %v1183_v1  ;;  %vm68_vm2 = vcmask 130048  }
   0xe   :  { %625 = vrot.lane.b32.xlu0 %v1222_v0, %s1191_s22  ;;  %819 = vrot.lane.b32.xlu1 %v1222_v0, %s1192_s23  ;;  %vm46_vm8 = vmand %vm44_vm5, %vm45_vm3  ;;  %v66_v12 = vpack.c.bf16 %v951_v10, %v951_v10  ;;  %vm159_vm5 = vcmask 7168  }
   0xf   :  { %vm277_vm9 = vmand %vm276_vm7, %vm45_vm3  ;;  %v949_v11 = vsel %vm46_vm8, 1.0, %v1183_v1  ;;  %vm418_vm8 = vcmask 1039360  }
  0x10   :  { %v961_v13 = vsel %vm277_vm9, 1.0, %v1183_v1  ;;  %v49_v15 = vpack.c.bf16 %v949_v11, %v949_v11  ;;  %vm166_vm3 = vmand %vm164_vm14, %vm165_vm15  ;;  %vm571_vm9 = vcmp.ge.s32.totalorder %v570_v42, 0  ;;  %vm627_vm14 = vcmask 982016  }
  0x11   :  { %v280_v20 = vpack.c.bf16 %v961_v13, %v961_v13  ;;  %v955_v27 = vsel %vm166_vm3, 1.0, %v1183_v1  ;;  %vm422_vm6 = vmand %vm274_vm4, %vm163_vm12 }
  0x12   :  { %v169_v29 = vpack.c.bf16 %v955_v27, %v955_v27  ;;  %vm423_vm7 = vmand %vm422_vm6, %vm165_vm15 }
  0x13   :  { %v967_v34 = vsel %vm423_vm7, 1.0, %v1183_v1  ;;  %vm825_vm15 = vmand %vm274_vm4, %vm571_vm9  ;;  %vm821_vm4 = vcmask 973824  }
  0x14   :  { %v426_v37 = vpack.c.bf16 %v967_v34, %v967_v34 }
  0x74   :  { %v54_v14 = vpop.permute.xlu0 %53  ;;  %v32_v16 = vpop.permute.xlu1 %31 }
  0x75   :  { %v57_v17 = vsel %vm55_vm10, 0, %v54_v14  ;;  %v36_v18 = vsel %vm33_vm11, 0, %v32_v16  ;;  %vm572_vm10 = vmand %vm39_vm1, %vm571_vm9  ;;  %vm573_vm11 = vcmp.lt.s32.totalorder %v570_v42, 8  ;;  %vm566_vm1 = vcmask 990208  }
  0x76   :  { %v67_v19 = vmul.bf16 %v66_v12, %v57_v17  ;;  %v50_v21 = vmul.bf16 %v49_v15, %v36_v18  ;;  %vm574_vm12 = vmand %vm572_vm10, %vm573_vm11 }
  0x77   :  { %v974_v46 = vsel %vm574_vm12, 1.0, %v1183_v1  ;;  %vm826_vm3 = vmand %vm825_vm15, %vm573_vm11 }
  0x78   :  { %1024 = vmatpush3.bf16.msra.mxu0 %v67_v19  ;;  %v267_v22 = vpop.permute.xlu0 %266  ;;  %v158_v28 = vpop.permute.xlu1 %157  ;;  %v577_v48 = vpack.c.bf16 %v974_v46, %v974_v46  ;;  %v986_v58 = vsel %vm826_vm3, 1.0, %v1183_v1  ;;  %v912_v46 = vld [vmem:[%s1415_s3] sm:$0xff] }
  0x79   :  { %v270_v24 = vsel %vm268_vm13, 0, %v267_v22  ;;  %1029 = vmatprep.subr.bf16.mxu0 %v1183_v1  ;;  %v161_v30 = vsel %vm159_vm5, 0, %v158_v28  ;;  %vm632_vm13 = vmand %vm571_vm9, %vm573_vm11  ;;  %v829_v61 = vpack.c.bf16 %v986_v58, %v986_v58 }
  0x7a   :  { %v281_v25 = vmul.bf16 %v280_v20, %v270_v24  ;;  %v170_v31 = vmul.bf16 %v169_v29, %v161_v30  ;;  %v977_v50 = vsel %vm632_vm13, 1.0, %v1183_v1 }
  0x7b   :  { %1026 = vmatmul.mubr.msk.bf16.vlgmr.msra.gmra.mrb[0].mxu0 %vm68_vm2, %v950_v23  ;;  %v635_v54 = vpack.c.bf16 %v977_v50, %v977_v50  ;;  %v1193_v23 = vmov 0  }
  0x7c   :  { %1030 = vmatpush3.bf16.msra.mxu0 %v50_v21  ;;  %1048 = vmatpush3.bf16.msra.mxu1 %v281_v25  ;;  %v417_v35 = vpop.permute.xlu0 %416  ;;  %v565_v47 = vpop.permute.xlu1 %564 }
  0x7d   :  { %1053 = vmatprep.subr.bf16.mxu1 %v1183_v1  ;;  %1031 = vmatprep.mubr.msk.bf16.mxu0 %vm1186_vm0, %v1183_v1  ;;  %v420_v38 = vsel %vm418_vm8, %v417_v35, 0  ;;  %v568_v49 = vsel %vm566_vm1, %v565_v47, 0 }
  0x7e   :  { %1035 = vmatprep.subr.bf16.mxu0 %v1183_v1  ;;  %v427_v39 = vmul.bf16 %v426_v37, %v420_v38  ;;  %v578_v52 = vmul.bf16 %v577_v48, %v568_v49  ;;  %1178 = vset.pattern.permute.xlu1 %v1193_v23 }
  0x7f   :  { %1050 = vmatmul.mubr.msk.bf16.vlgmr.msra.gmra.mrb[0].mxu1 %vm68_vm2, %v960_v26  ;;  %1179 = vset.pattern.permute.xlu0 %v1193_v23 }
  0x80   :  { %1054 = vmatpush3.bf16.msra.mxu1 %v67_v19  ;;  %1055 = vmatprep.mubr.msk.bf16.mxu1 %vm1186_vm0, %v1183_v1  ;;  %v626_v51 = vpop.permute.xlu0 %625  ;;  %v820_v59 = vpop.permute.xlu1 %819 }
  0x81   :  { %1059 = vmatprep.subr.bf16.mxu1 %v1183_v1  ;;  %v629_v55 = vsel %vm627_vm14, %v626_v51, 0  ;;  %v823_v62 = vsel %vm821_vm4, %v820_v59, 0 }
  0x82   :  { %v636_v56 = vmul.bf16 %v635_v54, %v629_v55  ;;  %v830_v63 = vmul.bf16 %v829_v61, %v823_v62 }
  0x87   :  { %1032 = vmatmul.mubr.msk.bf16.vlgmr.msra.gmra.mrb[0].mxu0 %vm68_vm2, %v25_v32 }
  0x88   :  { %1036 = vmatpush3.bf16.msra.mxu0 %v170_v31  ;;  %1037 = vmatprep.mubr.msk.bf16.mxu0 %vm1186_vm0, %v1183_v1 }
  0x89   :  { %1041 = vmatprep.subr.bf16.mxu0 %v1183_v1 }
  0x8b   :  { %1056 = vmatmul.mubr.msk.bf16.vlgmr.msra.gmra.mrb[0].mxu1 %vm68_vm2, %v959_v33 }
  0x8c   :  { %1060 = vmatpush3.bf16.msra.mxu1 %v1222_v0  ;;  %1061 = vmatprep.mubr.msk.bf16.mxu1 %vm1186_vm0, %v1183_v1 }
  0x8d   :  { %1065 = vmatprep.subr.bf16.mxu1 %v1183_v1 }
  0x93   :  { %1038 = vmatmul.mubr.msk.bf16.vlgmr.msra.gmra.mrb[0].mxu0 %vm68_vm2, %v954_v36 }
  0x94   :  { %1042 = vmatpush3.bf16.msra.mxu0 %v1222_v0  ;;  %1043 = vmatprep.mubr.msk.bf16.mxu0 %vm1186_vm0, %v1183_v1 }
  0x95   :  { %1071 = vmatprep.subr.bf16.mxu0 %v1183_v1 }
  0x97   :  { %1062 = vmatmul.mubr.msk.bf16.vlgmr.msra.gmra.mrb[0].mxu1 %vm68_vm2, %v964_v40 }
  0x98   :  { %1066 = vmatpush3.bf16.msra.mxu1 %v427_v39  ;;  %1067 = vmatprep.mubr.msk.bf16.mxu1 %vm1186_vm0, %v1183_v1 }
  0x99   :  { %1095 = vmatprep.subr.bf16.mxu1 %v1183_v1 }
  0x9f   :  { %1044 = vmatmul.mubr.msk.bf16.vlgmr.msra.gmra.mrb[0].mxu0 %vm68_vm2, %v957_v41 }
  0xa0   :  { %1072 = vmatpush3.bf16.msra.mxu0 %v1222_v0  ;;  %1073 = vmatprep.mubr.msk.bf16.mxu0 %vm1186_vm0, %v1183_v1 }
  0xa1   :  { %1077 = vmatprep.subr.bf16.mxu0 %v1183_v1 }
  0xa3   :  { %1068 = vmatmul.mubr.msk.bf16.vlgmr.msra.gmra.mrb[0].mxu1 %vm68_vm2, %v966_v43  ;;  %v910_v43 = vld [vmem:[%s1414_s2] sm:$0xff] }
  0xa4   :  { %1096 = vmatpush3.bf16.msra.mxu1 %v427_v39  ;;  %1097 = vmatprep.mubr.msk.bf16.mxu1 %vm1186_vm0, %v1183_v1 }
  0xa5   :  { %1101 = vmatprep.subr.bf16.mxu1 %v1183_v1 }
  0xa7   :  { %1074 = vmatmul.mubr.msk.bf16.vlgmr.msra.gmra.mrb[4].mxu0 %vm68_vm2, %v970_v44 }
  0xa8   :  { %1078 = vmatpush3.bf16.msra.mxu0 %v170_v31  ;;  %1079 = vmatprep.mubr.msk.bf16.mxu0 %vm1186_vm0, %v1183_v1 }
  0xa9   :  { %1083 = vmatprep.subr.bf16.mxu0 %v1183_v1 }
  0xab   :  { %1098 = vmatmul.mubr.msk.bf16.vlgmr.msra.gmra.mrb[4].mxu1 %vm68_vm2, %v980_v45 }
  0xac   :  { %1102 = vmatpush3.bf16.msra.mxu1 %v1222_v0  ;;  %1103 = vmatprep.mubr.msk.bf16.mxu1 %vm1186_vm0, %v1183_v1  ;;  %v983_v0 = vld [vmem:[%s1413_s1 + $0x38] sm:$0xf] }
  0xad   :  { %1107 = vmatprep.subr.bf16.mxu1 %v1183_v1 }
  0xb3   :  { %1080 = vmatmul.mubr.msk.bf16.vlgmr.msra.gmra.mrb[4].mxu0 %vm68_vm2, %v969_v53 }
  0xb4   :  { %1084 = vmatpush3.bf16.msra.mxu0 %v578_v52  ;;  %1085 = vmatprep.mubr.msk.bf16.mxu0 %vm1186_vm0, %v1183_v1 }
  0xb5   :  { %1089 = vmatprep.subr.bf16.mxu0 %v1183_v1 }
  0xb7   :  { %1104 = vmatmul.mubr.msk.bf16.vlgmr.msra.gmra.mrb[4].mxu1 %vm68_vm2, %v979_v57 }
  0xb8   :  { %1108 = vmatpush3.bf16.msra.mxu1 %v636_v56  ;;  %1109 = vmatprep.mubr.msk.bf16.mxu1 %vm1186_vm0, %v1183_v1 }
  0xb9   :  { %1113 = vmatprep.subr.bf16.mxu1 %v1183_v1 }
  0xbf   :  { %1086 = vmatmul.mubr.msk.bf16.vlgmr.msra.gmra.mrb[4].mxu0 %vm68_vm2, %v973_v60 }
  0xc0   :  { %1090 = vmatpush3.bf16.msra.mxu0 %v636_v56  ;;  %1091 = vmatprep.mubr.msk.bf16.mxu0 %vm1186_vm0, %v1183_v1 }
  0xc3   :  { %1110 = vmatmul.mubr.msk.bf16.vlgmr.msra.gmra.mrb[4].mxu1 %vm68_vm2, %v983_v0 }
  0xc4   :  { %1114 = vmatpush3.bf16.msra.mxu1 %v830_v63  ;;  %1115 = vmatprep.mubr.msk.bf16.mxu1 %vm1186_vm0, %v1183_v1 }
  0xcb   :  { %1092 = vmatmul.mubr.msk.bf16.vlgmr.msra.gmra.mrb[4].mxu0 %vm68_vm2, %v976_v2 }
  0xcf   :  { %1116 = vmatmul.mubr.msk.bf16.vlgmr.msra.gmra.mrb[4].mxu1 %vm68_vm2, %v985_v3 }
 0x172   :  { %v255_v4 = vpop.f32.mrb[0].mxu0 }
 0x173   :  { %875 = vadd.xlane.f32.xlu0 %v255_v4  ;;  %v1045_v5 = vpop.f32.mrb[1].mxu0  ;;  %v878_v8 = vmul.f32 %v255_v4, %v255_v4 }
 0x174   :  { %v258_v6 = vpop.f32.mrb[2].mxu0 }
 0x175   :  { %v1046_v7 = vpop.f32.mrb[3].mxu0 }
 0x176   :  { %v465_v9 = vpop.f32.mrb[0].mxu1 }
 0x177   :  { %879 = vadd.xlane.f32.xlu0 %v878_v8  ;;  %882 = vadd.xlane.f32.xlu1 %v465_v9  ;;  %v1069_v1 = vpop.f32.mrb[1].mxu1  ;;  %v885_v12 = vmul.f32 %v465_v9, %v465_v9 }
 0x178   :  { %v468_v10 = vpop.f32.mrb[2].mxu1 }
 0x179   :  { %v1070_v11 = vpop.f32.mrb[3].mxu1 }
 0x17b   :  { %886 = vadd.xlane.f32.xlu0 %v885_v12 }
 0x19e   :  { %v674_v13 = vpop.f32.mrb[4].mxu0 }
 0x19f   :  { %889 = vadd.xlane.f32.xlu1 %v674_v13  ;;  %v1093_v14 = vpop.f32.mrb[5].mxu0  ;;  %v892_v15 = vmul.f32 %v674_v13, %v674_v13 }
 0x1a0   :  { %v677_v16 = vpop.f32.mrb[6].mxu0 }
 0x1a1   :  { %893 = vadd.xlane.f32.xlu0 %v892_v15  ;;  %v1094_v17 = vpop.f32.mrb[7].mxu0 }
 0x1a2   :  { %v868_v18 = vpop.f32.mrb[4].mxu1 }
 0x1a3   :  { %v1117_v19 = vpop.f32.mrb[5].mxu1  ;;  %896 = vadd.xlane.f32.xlu1 %v868_v18  ;;  %v899_v20 = vmul.f32 %v868_v18, %v868_v18 }
 0x1a4   :  { %v871_v21 = vpop.f32.mrb[6].mxu1 }
 0x1a5   :  { %v1118_v22 = vpop.f32.mrb[7].mxu1  ;;  %900 = vadd.xlane.f32.xlu0 %v899_v20 }
 0x200   :  { %v876_v24 = vpop.xlane.xlu0 %875 }
 0x204   :  { %v880_v25 = vpop.xlane.xlu0 %879  ;;  %v883_v26 = vpop.xlane.xlu1 %882 }
 0x205   :  { %v884_v29 = vadd.f32 %v883_v26, %v876_v24 }
 0x208   :  { %v887_v27 = vpop.xlane.xlu0 %886 }
 0x209   :  { %v888_v31 = vadd.f32 %v887_v27, %v880_v25 }
 0x22c   :  { %v890_v28 = vpop.xlane.xlu1 %889 }
 0x22d   :  { %v891_v32 = vadd.f32 %v890_v28, %v884_v29 }
 0x22e   :  { %v894_v30 = vpop.xlane.xlu0 %893 }
 0x22f   :  { %v895_v34 = vadd.f32 %v894_v30, %v888_v31 }
 0x230   :  { %v897_v33 = vpop.xlane.xlu1 %896 }
 0x231   :  { %v898_v35 = vadd.f32 %v897_v33, %v891_v32 }
 0x232   :  { %v901_v36 = vpop.xlane.xlu0 %900 }
 0x233   :  { %v904_v37 = vmul.f32 0.001953125, %v898_v35  ;;  %v902_v38 = vadd.f32 %v901_v36, %v895_v34 }
 0x235   :  { %v906_v39 = vmul.f32 %v904_v37, %v904_v37  ;;  %v905_v40 = vmul.f32 0.001953125, %v902_v38 }
 0x237   :  { %v907_v41 = vsub.f32 %v905_v40, %v906_v39 }
 0x239   :  { %v908_v42 = vadd.f32 1e-05, %v907_v41 }
 0x23b   :  { %1181 = vrsqrt.f32 %v908_v42 }
 0x245   :  { %v1182_v44 = vpop.eup %1181 }
 0x246   :  { %v911_v45 = vmul.f32 %v1182_v44, %v910_v43 }
 0x248   :  { %917 = vperm.xlu1 %1178, %v911_v45   ;;  %v913_v47 = vmul.f32 %v911_v45, %v904_v37 }
 0x24a   :  { %v914_v48 = vsub.f32 %v912_v46, %v913_v47 }
 0x24c   :  { %923 = vperm.xlu0 %1179, %v914_v48  }
 0x2c7   :  { %v918_v49 = vpop.permute.xlu1 %917 }
 0x2c8   :  { %v920_v50 = vmul.f32 %v918_v49, %v255_v4  ;;  %v927_v51 = vmul.f32 %v918_v49, %v465_v9  ;;  %v929_v52 = vmul.f32 %v918_v49, %v674_v13  ;;  %v931_v53 = vmul.f32 %v918_v49, %v868_v18 }
 0x2cb   :  { %v924_v54 = vpop.permute.xlu0 %923 }
 0x2cc   :  { %v926_v55 = vadd.f32 %v924_v54, %v920_v50  ;;  %v928_v56 = vadd.f32 %v927_v51, %v924_v54  ;;  %v930_v57 = vadd.f32 %v929_v52, %v924_v54  ;;  %v932_v58 = vadd.f32 %v931_v53, %v924_v54 }
 0x2ce   :  { %v933_v59 = vmax.f32 %v926_v55, 0.0  ;;  %v935_v60 = vmax.f32 %v928_v56, 0.0  ;;  %v938_v61 = vmax.f32 %v930_v57, 0.0  ;;  %v941_v62 = vmax.f32 %v932_v58, 0.0 }
 0x2d0   :  { %934 = vst [vmem:[%s1416_s4] sm:$0xff] %v933_v59  ;;  %988 = vst [vmem:[%s1416_s4 + $0x8] sm:$0xff] %v935_v60 }
 0x2d1   :  { %989 = vst [vmem:[%s1416_s4 + $0x10] sm:$0xff] %v938_v61  ;;  %990 = vst [vmem:[%s1416_s4 + $0x18] sm:$0xff] %v941_v62 }

// kernel: netg1_forward.7
= control target key start
LH: loop header
LB: loop body
LE: loop exit
PB: predicated region body
PF: predicated region fallthrough
CT: control target
= control target key end

     0   :  { %s5126_s9 = smov 0   ;;  %s5128_s10 = smov 0   ;;  %s6270_s0 = inlined_call_operand.vmem [shape: bf16[8,512], index: 0, kind: input, shape index: {}]   ;;  %s6271_s1 = inlined_call_operand.vmem [shape: bf16[4,4,100,8], index: 1, kind: input, shape index: {}]   ;;  %s6272_s2 = inlined_call_operand.vmem [shape: f32[4,100,512], index: 2, kind: output, shape index: {}]  }
   0x1   :  { %s5130_s11 = smov 0  }
   0x2 LB: > { %s5139_s12 = sadd.s32 4294967295, %s5099_s11   ;;  %s5141_s13 = sadd.s32 1, %s5099_s11   ;;  %s5099_s11 = sphi %s5130_s11, %s6284_s11   ;;  %s5095_s10 = sphi %s5128_s10, %s6283_s10   ;;  %s5091_s9 = sphi %s5126_s9, %s6282_s9  }
   0x3   : > { %s63_s14 = ssub.s32 %s5099_s11, %s5141_s13  ;;  %s66_s15 = sadd.s32 1, %s5095_s10 }
   0x4   : > { %p64_p0 = scmp.eq.s32.totalorder %s63_s14, 0  ;;  %p76_p1 = scmp.ne.s32.totalorder %s5095_s10, %s5091_s9 }
   0x5   : > { %p77_p2 = scmp.eq.s32.totalorder %s5139_s12, 1  ;;  %p3845_p3 = scmp.ge.s32.totalorder %s5099_s11, 1 }
   0x6   : > { %s5149_s16 = scalar_select %p64_p0, %s5095_s10, %s66_s15  }
   0x7   : > { %p5151_p4 = por %p77_p2, %p76_p1  ;;  %p113_p5 = scmp.lt.s32.totalorder %s5099_s11, 3 }
   0x9   : > { %p114_p6 = pnand %p3845_p3, %p113_p5 }
   0xa   : > { %s3846_s18 = sshll.u32 (!%p114_p6), %s5139_s12, 1  ;;  %v5101_v2 = vmov (!%p114_p6), 0   ;;  %s5102_s23 = smov (!%p114_p6), 15   ;;  %v143_v4 = vlaneseq (!%p114_p6)  ;;  %v5107_v20 = vmov (!%p114_p6), 0.0   ;;  %v4757_v50 = vld [vmem:[%s6271_s1 + $0x34] sm:$0xff] (!%p114_p6)   ;;  %v4758_v53 = vld [vmem:[%s6271_s1 + $0x104] sm:$0xff] (!%p114_p6)  }
   0xb   : > { %117 = sbr.rel (%p114_p6) target bundleno = 853 (0x355), region = 28  ;;  %p135_p7 = scmp.lt.s32.totalorder (!%p114_p6), %s3846_s18, 3  ;;  %345 = vmatprep.mubr.bf16.mxu0 (!%p114_p6), %v5101_v2  ;;  %1155 = vmatprep.mubr.bf16.mxu1 (!%p114_p6), %v5101_v2  ;;  %v4759_v62 = vld [vmem:[%s6271_s1 + $0x3c] sm:$0xff] (!%p114_p6)   ;;  %v4760_v63 = vld [vmem:[%s6271_s1 + $0x10c] sm:$0xff] (!%p114_p6)  }
   0xc   : > { %s5103_s24 = smov (!%p114_p6), 16   ;;  %s5104_s25 = smov (!%p114_p6), 17   ;;  %v144_v5 = vand.u32 (!%p114_p6), 127, %v143_v4  ;;  %v4762_v4 = vld [vmem:[%s6271_s1 + $0x114] sm:$0xff] (!%p114_p6)  }
   0xd   : > { %s5105_s26 = smov (!%p114_p6), 1   ;;  %s5106_s27 = smov (!%p114_p6), 127   ;;  %v4770_v19 = vld [vmem:[%s6271_s1 + $0x134] ss:$0 sps:$4 sm:$0x33] (!%p114_p6)  }
   0xe   : > { %v145_v6 = vadd.s32 (!%p114_p6), 128, %v144_v5  ;;  %v148_v7 = vshra.s32 (!%p114_p6), %v144_v5, 4  ;;  %v146_v9 = vand.u32 (!%p114_p6), 15, %v144_v5  ;;  %v4763_v5 = vld [vmem:[%s6271_s1 + $0x4c] sm:$0xff] (!%p114_p6)   ;;  %s5110_s6 = smov (!%p114_p6), 111  }
  0x10   : > { %v149_v8 = vshra.s32 (!%p114_p6), %v145_v6, 4  ;;  %v5175_v10 = vand.u32 (!%p114_p6), 15, %v148_v7  ;;  %v147_v11 = vand.u32 (!%p114_p6), 15, %v145_v6  ;;  %v5179_v13 = vadd.s32 (!%p114_p6), 4294967295, %v146_v9  ;;  %v4764_v6 = vld [vmem:[%s6271_s1 + $0x11c] sm:$0xff] (!%p114_p6)   ;;  %v4765_v7 = vld [vmem:[%s6271_s1 + $0x54] sm:$0xff] (!%p114_p6)  }
  0x11   : > { %v5182_v15 = vadd.s32 (!%p114_p6), 1, %v146_v9  ;;  %v4767_v9 = vld [vmem:[%s6271_s1 + $0x5c] sm:$0xff] (!%p114_p6)  }
  0x12   : > { %s6286_s18 = smov (!%p135_p7, %s3846_s18), 3  ;;  %v5177_v12 = vand.u32 15, %v149_v8  ;;  %v190_v14 = vadd.s32 4294967295, %v5175_v10  ;;  %v5185_v17 = vadd.s32 1, %v147_v11  ;;  %vm184_vm0 = vcmp.ge.s32.totalorder %v5179_v13, 0  ;;  %v4766_v8 = vld [vmem:[%s6271_s1 + $0x124] sm:$0xff]  }
  0x13   : > { %s3847_s19 = sshll.u32 %s6286_s18, 2  ;;  %vm6273_vm2 = vcmp.lt.s32.totalorder %v5182_v15, 16  ;;  %v5190_v18 = vadd.s32 4294967295, %v147_v11  ;;  %v4768_v11 = vld [vmem:[%s6271_s1 + $0x12c] sm:$0xff]   ;;  %s4383_s11 = sshll.u32 (%p5151_p4), %s5139_s12, 4 }
  0x14   : > { %s138_s22 = scalar_lea.vmem %s6270_s0, %s3847_s19  ;;  %v191_v16 = vadd.s32 4294967295, %v5177_v12  ;;  %vm192_vm1 = vcmp.ge.s32.totalorder %v190_v14, 0  ;;  %vm6274_vm4 = vcmp.lt.s32.totalorder %v5185_v17, 16  ;;  %vm196_vm6 = vcmp.lt.s32.totalorder %v190_v14, 16  ;;  %s6053_s18 = scalar_lea.vmem (%p5151_p4), %s6272_s2, %s4383_s11 }
  0x15   : > { %v142_v0 = vld [vmem:[%s138_s22] sm:$0xff]  ;;  %vm5194_vm5 = vmand %vm184_vm0, %vm192_vm1  ;;  %vm185_vm11 = vcmp.ge.s32.totalorder %v5190_v18, 0  ;;  %s5108_s22 = smov 113  }
  0x16   : > { %v5159_v1 = vcombine.low %v142_v0, %v142_v0  ;;  %v5163_v3 = vcombine.high %v142_v0, %v142_v0  ;;  %vm193_vm3 = vcmp.ge.s32.totalorder %v191_v16, 0  ;;  %vm1051_vm7 = vmand %vm6273_vm2, %vm192_vm1  ;;  %vm197_vm8 = vcmp.lt.s32.totalorder %v191_v16, 16  ;;  %v4761_v0 = vld [vmem:[%s6271_s1 + $0x44] sm:$0xff]  }
  0x17   : > { %vm1052_vm9 = vmand %vm6274_vm4, %vm193_vm3  ;;  %vm1036_vm2 = vcmask 121856   ;;  %vm226_vm4 = vcmask 130048   ;;  %v4769_v16 = vld [vmem:[%s6271_s1 + $0x64] ss:$0 sps:$4 sm:$0x33]  }
  0x18   : > { %1032 = vrot.lane.b32.xlu1 %v5159_v1, %s5102_s23  ;;  %222 = vrot.lane.b32.xlu0 %v5159_v1, %s5103_s24  ;;  %vm241_vm10 = vmand %vm192_vm1, %vm196_vm6  ;;  %vm601_vm1 = vcmp.ge.s32.totalorder %v5177_v12, 0 }
  0x19   : > { %vm1053_vm12 = vmand %vm1051_vm7, %vm196_vm6  ;;  %v3865_v21 = vsel %vm241_vm10, 1.0, %v5107_v20  ;;  %vm605_vm10 = vcmp.lt.s32.totalorder %v5177_v12, 16 }
  0x1a   : > { %vm1054_vm13 = vmand %vm1052_vm9, %vm197_vm8  ;;  %v3981_v22 = vsel %vm1053_vm12, 1.0, %v5107_v20  ;;  %v247_v27 = vpack.c.bf16 %v3865_v21, %v3865_v21  ;;  %vm600_vm12 = vcmp.ge.s32.totalorder %v5175_v10, 0 }
  0x1b   : > { %vm242_vm14 = vmand %vm193_vm3, %vm197_vm8  ;;  %v3982_v23 = vsel %vm1054_vm13, 1.0, %v5107_v20  ;;  %v1059_v28 = vpack.c.bf16 %v3981_v22, %v3981_v22 }
  0x1c   : > { %1034 = vrot.lane.b32.xlu1 %v5163_v3, %s5102_s23  ;;  %224 = vrot.lane.b32.xlu0 %v5163_v3, %s5103_s24  ;;  %vm195_vm15 = vmand %vm185_vm11, %vm193_vm3  ;;  %v3866_v24 = vsel %vm242_vm14, 1.0, %v5107_v20  ;;  %v1060_v31 = vpack.c.bf16 %v3982_v23, %v3982_v23  ;;  %vm604_vm14 = vcmp.lt.s32.totalorder %v5175_v10, 16 }
  0x1d   : > { %vm198_vm7 = vmand %vm5194_vm5, %vm196_vm6  ;;  %v248_v32 = vpack.c.bf16 %v3866_v24, %v3866_v24  ;;  %vm306_vm6 = vcmask 1043456  }
  0x1e   : > { %vm199_vm3 = vmand %vm195_vm15, %vm197_vm8  ;;  %v3850_v33 = vsel %vm198_vm7, 1.0, %v5107_v20  ;;  %vm174_vm8 = vcmask 138240   ;;  %vm6278_vm7 = vcmp.lt.s32.totalorder %v5185_v17, 16 }
  0x1f   : > { %vm603_vm9 = vmand %vm185_vm11, %vm601_vm1  ;;  %v3851_v34 = vsel %vm199_vm3, 1.0, %v5107_v20  ;;  %v204_v43 = vpack.c.bf16 %v3850_v33, %v3850_v33  ;;  %v4773_v33 = vld [vmem:[%s6271_s1 + $0x8] sm:$0xff]  }
  0x20   : > { %172 = vrot.lane.b32.xlu1 %v5163_v3, %s5104_s25  ;;  %170 = vrot.lane.b32.xlu0 %v5159_v1, %s5104_s25  ;;  %vm607_vm5 = vmand %vm603_vm9, %vm605_vm10  ;;  %v205_v44 = vpack.c.bf16 %v3851_v34, %v3851_v34  ;;  %v4774_v34 = vld [vmem:[%s6271_s1 + $0xd8] sm:$0xff]  }
  0x21   : > { %v3911_v45 = vsel %vm607_vm5, 1.0, %v5107_v20  ;;  %vm602_vm13 = vmand %vm184_vm0, %vm600_vm12 }
  0x22   : > { %v613_v56 = vpack.c.bf16 %v3911_v45, %v3911_v45  ;;  %vm606_vm15 = vmand %vm602_vm13, %vm604_vm14 }
  0x23   : > { %vm1600_vm3 = vmand %vm6278_vm7, %vm601_vm1  ;;  %v3910_v14 = vsel %vm606_vm15, 1.0, %v5107_v20  ;;  %vm1592_vm1 = vcmask 1039360   ;;  %vm2154_vm15 = vcmask 924672   ;;  %vm2384_vm7 = vcmask 916480  }
  0x24   : > { %591 = vrot.lane.b32.xlu1 %v5163_v3, %s5105_s26  ;;  %589 = vrot.lane.b32.xlu0 %v5159_v1, %s5105_s26  ;;  %vm1602_vm9 = vmand %vm1600_vm3, %vm605_vm10  ;;  %v612_v21 = vpack.c.bf16 %v3910_v14, %v3910_v14  ;;  %vm6279_vm10 = vcmp.lt.s32.totalorder %v5182_v15, 16  ;;  %v4808_v14 = vld [vmem:[%s6271_s1 + $0x18c] sm:$0xff]  }
  0x25   : > { %v4055_v23 = vsel %vm1602_vm9, 1.0, %v5107_v20  ;;  %vm1599_vm5 = vmand %vm6279_vm10, %vm600_vm12 }
  0x28   : > { %1590 = vrot.lane.b32.xlu1 %v5163_v3, %s5106_s27  ;;  %1588 = vrot.lane.b32.xlu0 %v5159_v1, %s5106_s27  ;;  %s5109_s27 = smov 112  }
  0x2c   : > { %2152 = vrot.lane.b32.xlu1 %v5163_v3, %s5108_s22  ;;  %2150 = vrot.lane.b32.xlu0 %v5159_v1, %s5108_s22 }
  0x30   : > { %2382 = vrot.lane.b32.xlu1 %v5163_v3, %s5109_s27  ;;  %2380 = vrot.lane.b32.xlu0 %v5159_v1, %s5109_s27  ;;  %s131_s27 = sand.u32 1, %s5091_s9  }
  0x31   : > { %s4720_s30 = smul.u32 832, %s131_s27 }
  0x34   : > { %3139 = vrot.lane.b32.xlu1 %v5163_v3, %s5110_s6  ;;  %3137 = vrot.lane.b32.xlu0 %v5159_v1, %s5110_s6  ;;  %s5876_s6 = scalar_lea.vmem [#allocation2], %s4720_s30 }
  0x8a   : > { %v1033_v25 = vpop.permute.xlu1 %1032  ;;  %v223_v26 = vpop.permute.xlu0 %222 }
  0x8b   : > { %v1041_v29 = vsel %vm1036_vm2, 0, %v1033_v25  ;;  %v231_v30 = vsel %vm226_vm4, 0, %v223_v26 }
  0x8c   : > { %v249_v37 = vmul.bf16 %v247_v27, %v231_v30  ;;  %v1061_v38 = vmul.bf16 %v1059_v28, %v1041_v29  ;;  %v4771_v27 = vld [vmem:[%s6271_s1] sm:$0xff]   ;;  %v4772_v29 = vld [vmem:[%s6271_s1 + $0xd0] sm:$0xff]  }
  0x8e   : > { %v1035_v35 = vpop.permute.xlu1 %1034  ;;  %v225_v36 = vpop.permute.xlu0 %224  ;;  %v308_v48 = vsel %vm306_vm6, %v249_v37, 0  ;;  %v1118_v49 = vsel %vm306_vm6, %v1061_v38, 0  ;;  %v4777_v37 = vld [vmem:[%s6271_s1 + $0x18] sm:$0xff]   ;;  %v4778_v38 = vld [vmem:[%s6271_s1 + $0xe8] sm:$0xff]  }
  0x8f   : > { %v1037_v39 = vsel %vm1036_vm2, %v1033_v25, %v1035_v35  ;;  %v227_v40 = vsel %vm226_vm4, %v223_v26, %v225_v36  ;;  %vm284_vm2 = vcmask 64512   ;;  %vm593_vm4 = vcmask 7168   ;;  %v4775_v35 = vld [vmem:[%s6271_s1 + $0x10] sm:$0xff]   ;;  %v4776_v36 = vld [vmem:[%s6271_s1 + $0xe0] sm:$0xff]  }
  0x90   : > { %v1062_v41 = vmul.bf16 %v1060_v31, %v1037_v39  ;;  %v250_v42 = vmul.bf16 %v248_v32, %v227_v40  ;;  %v1608_v26 = vpack.c.bf16 %v4055_v23, %v4055_v23  ;;  %v5349_v31 = vsel %vm306_vm6, %v5159_v1, 0  ;;  %v4779_v39 = vld [vmem:[%s6271_s1 + $0x20] sm:$0xff]   ;;  %v4780_v40 = vld [vmem:[%s6271_s1 + $0xf0] sm:$0xff]   ;;  %v4812_v23 = vld [vmem:[%s6271_s1 + $0x19c] ss:$0 sps:$4 sm:$0x33]  }
  0x91   : > { %v4783_v1 = vld [vmem:[%s6271_s1 + $0x30] ss:$0 sps:$4 sm:$0x33]  }
  0x92   : > { %3990 = vmatprep.subr.msk.bf16.mxu1 %vm306_vm6, %v1062_v41  ;;  %v173_v46 = vpop.permute.xlu1 %172  ;;  %3874 = vmatprep.subr.msk.bf16.mxu0 %vm306_vm6, %v250_v42  ;;  %v171_v47 = vpop.permute.xlu0 %170  ;;  %v4781_v41 = vld [vmem:[%s6271_s1 + $0x28] sm:$0xff]  }
  0x93   : > { %v175_v51 = vsel %vm174_vm8, %v171_v47, %v173_v46  ;;  %v180_v52 = vsel %vm174_vm8, 0, %v171_v47  ;;  %314 = vmatpush1.bf16.msra.mxu0 %v308_v48  ;;  %1124 = vmatpush1.bf16.msra.mxu1 %v1118_v49  ;;  %vm1601_vm8 = vmand %vm1599_vm5, %vm604_vm14  ;;  %v4785_v49 = vld [vmem:[%s6271_s1 + $0x68] sm:$0xff]  }
  0x94   : > { %v206_v54 = vmul.bf16 %v204_v43, %v180_v52  ;;  %v207_v55 = vmul.bf16 %v205_v44, %v175_v51  ;;  %4005 = vmatprep.subr.msk.bf16.mxu1 %vm306_vm6, %v250_v42  ;;  %v4782_v42 = vld [vmem:[%s6271_s1 + $0xf8] sm:$0xff]   ;;  %v4054_v43 = vsel %vm1601_vm8, 1.0, %v5107_v20  ;;  %v4784_v44 = vld [vmem:[%s6271_s1 + $0x100] ss:$0 sps:$4 sm:$0x33]   ;;  %v4787_v52 = vld [vmem:[%s6271_s1 + $0x70] sm:$0xff]  }
  0x95   : > { %v1607_v46 = vpack.c.bf16 %v4054_v43, %v4054_v43  ;;  %v4824_v43 = vld [vmem:[%s6271_s1 + $0x2cc] sm:$0xff]  }
  0x96   : > { %3875 = vmatmul.mubr.msk.bf16.vlgmr.msra.gmra.mrb[0].mxu0 %vm284_vm2, %v4757_v50  ;;  %3889 = vmatprep.subr.msk.bf16.mxu0 %vm306_vm6, %v207_v55  ;;  %v469_v57 = vsel %vm306_vm6, %v206_v54, 0  ;;  %v592_v58 = vpop.permute.xlu1 %591  ;;  %v590_v59 = vpop.permute.xlu0 %589  ;;  %v4786_v50 = vld [vmem:[%s6271_s1 + $0x138] sm:$0xff]   ;;  %v4790_v55 = vld [vmem:[%s6271_s1 + $0x148] sm:$0xff]  }
  0x97   : > { %3991 = vmatmul.mubr.msk.bf16.vlgmr.msra.gmra.mrb[0].mxu1 %vm284_vm2, %v4758_v53  ;;  %475 = vmatpush1.bf16.msra.mxu0 %v469_v57  ;;  %v594_v60 = vsel %vm593_vm4, %v590_v59, %v592_v58  ;;  %v598_v22 = vsel %vm593_vm4, 0, %v590_v59  ;;  %v4788_v53 = vld [vmem:[%s6271_s1 + $0x140] sm:$0xff]   ;;  %v4789_v54 = vld [vmem:[%s6271_s1 + $0x78] sm:$0xff]   ;;  %v4792_v57 = vld [vmem:[%s6271_s1 + $0x150] sm:$0xff]  }
  0x98   : > { %1279 = vmatpush1.bf16.msra.mxu1 %v308_v48  ;;  %355 = vmatprep.mubr.bf16.mxu0 %v5101_v2  ;;  %v5249_v61 = vmul.bf16 %v613_v56, %v594_v60  ;;  %v614_v25 = vmul.bf16 %v612_v21, %v598_v22  ;;  %v4791_v56 = vld [vmem:[%s6271_s1 + $0x80] sm:$0xff]   ;;  %v4793_v58 = vld [vmem:[%s6271_s1 + $0x88] sm:$0xff]   ;;  %v4794_v59 = vld [vmem:[%s6271_s1 + $0x158] sm:$0xff]  }
  0x99   : > { %1165 = vmatprep.mubr.bf16.mxu1 %v5101_v2  ;;  %4033 = vmatprep.subr.msk.bf16.mxu1 %vm306_vm6, %v5163_v3  ;;  %v4795_v60 = vld [vmem:[%s6271_s1 + $0x90] sm:$0xff]  }
  0x9a   : > { %3919 = vmatprep.subr.msk.bf16.mxu0 %vm306_vm6, %v5249_v61  ;;  %v1591_v24 = vpop.permute.xlu1 %1590  ;;  %v5345_v30 = vsel %vm306_vm6, %v614_v25, 0  ;;  %v1589_v45 = vpop.permute.xlu0 %1588  ;;  %v4810_v21 = vld [vmem:[%s6271_s1 + $0x194] sm:$0xff]  }
  0x9b   : > { %v1597_v28 = vsel %vm1592_vm1, %v1591_v24, 0  ;;  %v1593_v47 = vsel %vm1592_vm1, %v1589_v45, %v1591_v24 }
  0x9c   : > { %v5351_v32 = vmul.bf16 %v1608_v26, %v1597_v28  ;;  %v1609_v48 = vmul.bf16 %v1607_v46, %v1593_v47  ;;  %v4826_v46 = vld [vmem:[%s6271_s1 + $0x2d4] ss:$0 sps:$4 sm:$0x33]  }
  0x9e   : > { %3876 = vmatmul.mubr.msk.bf16.gmra.mrb[4].mxu0 %vm284_vm2, %v4759_v62  ;;  %v1666_v51 = vsel %vm306_vm6, %v1609_v48, 0  ;;  %v4796_v62 = vld [vmem:[%s6271_s1 + $0x160] sm:$0xff]   ;;  %v5586_v22 = vpop.permute.xlu1 %2152 }
  0x9f   : > { %3992 = vmatmul.mubr.msk.bf16.gmra.mrb[4].mxu1 %vm284_vm2, %v4760_v63  ;;  %365 = vmatprep.mubr.bf16.mxu0 %v5101_v2  ;;  %v4797_v63 = vld [vmem:[%s6271_s1 + $0x98] ss:$0 sps:$4 sm:$0x33]   ;;  %v2159_v28 = vsel %vm2154_vm15, %v5586_v22, 0 }
  0xa0   : > { %1175 = vmatprep.mubr.bf16.mxu1 %v5101_v2 }
  0xa2   : > { %v5603_v25 = vpop.permute.xlu1 %2382 }
  0xa6   : > { %3877 = vmatmul.mubr.msk.bf16.gmra.mrb[8].mxu0 %vm284_vm2, %v4761_v0  ;;  %v4798_v0 = vld [vmem:[%s6271_s1 + $0x168] ss:$0 sps:$4 sm:$0x33]  }
  0xa7   : > { %3993 = vmatmul.mubr.msk.bf16.gmra.mrb[8].mxu1 %vm284_vm2, %v4762_v4  ;;  %375 = vmatprep.mubr.bf16.mxu0 %v5101_v2  ;;  %v4799_v4 = vld [vmem:[%s6271_s1 + $0x9c] sm:$0xff]  }
  0xa8   : > { %1185 = vmatprep.mubr.bf16.mxu1 %v5101_v2 }
  0xae   : > { %3878 = vmatmul.mubr.msk.bf16.gmra.mrb[12].mxu0 %vm284_vm2, %v4763_v5  ;;  %v4800_v5 = vld [vmem:[%s6271_s1 + $0x16c] sm:$0xff]  }
  0xaf   : > { %3994 = vmatmul.mubr.msk.bf16.gmra.mrb[12].mxu1 %vm284_vm2, %v4764_v6  ;;  %385 = vmatprep.mubr.bf16.mxu0 %v5101_v2  ;;  %v4801_v6 = vld [vmem:[%s6271_s1 + $0xa4] sm:$0xff]  }
  0xb0   : > { %1195 = vmatprep.mubr.bf16.mxu1 %v5101_v2 }
  0xb6   : > { %3879 = vmatmul.mubr.msk.bf16.gmra.mrb[16].mxu0 %vm284_vm2, %v4765_v7  ;;  %v4802_v7 = vld [vmem:[%s6271_s1 + $0x174] sm:$0xff]  }
  0xb7   : > { %3995 = vmatmul.mubr.msk.bf16.gmra.mrb[16].mxu1 %vm284_vm2, %v4766_v8  ;;  %395 = vmatprep.mubr.bf16.mxu0 %v5101_v2  ;;  %v4805_v8 = vld [vmem:[%s6271_s1 + $0xb4] sm:$0xff]  }
  0xb8   : > { %1205 = vmatprep.mubr.bf16.mxu1 %v5101_v2 }
  0xbe   : > { %3880 = vmatmul.mubr.msk.bf16.gmra.mrb[20].mxu0 %vm284_vm2, %v4767_v9  ;;  %v4806_v9 = vld [vmem:[%s6271_s1 + $0x184] sm:$0xff]  }
  0xbf   : > { %3996 = vmatmul.mubr.msk.bf16.gmra.mrb[20].mxu1 %vm284_vm2, %v4768_v11  ;;  %405 = vmatprep.mubr.bf16.mxu0 %v5101_v2  ;;  %v4807_v11 = vld [vmem:[%s6271_s1 + $0xbc] sm:$0xff]  }
  0xc0   : > { %1215 = vmatprep.mubr.bf16.mxu1 %v5101_v2 }
  0xc6   : > { %3881 = vmatmul.mubr.msk.bf16.gmra.mrb[24].mxu0 %vm284_vm2, %v4769_v16  ;;  %v5565_v16 = vadd.s32 1, %v5177_v12  ;;  %v4811_v12 = vld [vmem:[%s6271_s1 + $0xcc] ss:$0 sps:$4 sm:$0x33]  }
  0xc7   : > { %3997 = vmatmul.mubr.msk.bf16.gmra.mrb[24].mxu1 %vm284_vm2, %v4770_v19  ;;  %506 = vmatprep.mubr.bf16.mxu0 %v5101_v2  ;;  %v4809_v19 = vld [vmem:[%s6271_s1 + $0xc4] sm:$0xff]  }
  0xc8   : > { %1310 = vmatprep.mubr.bf16.mxu1 %v5101_v2  ;;  %vm2164_vm4 = vcmp.ge.s32.totalorder %v5565_v16, 0  ;;  %vm2168_vm13 = vcmp.lt.s32.totalorder %v5565_v16, 16 }
  0xc9   : > { %vm2166_vm12 = vmand %vm185_vm11, %vm2164_vm4 }
  0xca   : > { %vm2170_vm14 = vmand %vm2166_vm12, %vm2168_vm13 }
  0xcb   : > { %vm2394_vm11 = vmand %vm2164_vm4, %vm2168_vm13  ;;  %v4141_v18 = vsel %vm2170_vm14, 1.0, %v5107_v20 }
  0xcc   : > { %v4171_v24 = vsel %vm2394_vm11, 1.0, %v5107_v20  ;;  %v2176_v26 = vpack.c.bf16 %v4141_v18, %v4141_v18  ;;  %v4843_v18 = vld [vmem:[%s6271_s1 + $0x210] sm:$0xff]  }
  0xce   : > { %3890 = vmatmul.mubr.msk.bf16.vlgmr.msra.gmra.mrb[0].mxu0 %vm284_vm2, %v4771_v27  ;;  %v4813_v27 = vld [vmem:[%s6271_s1 + $0x1d4] sm:$0xff]  }
  0xcf   : > { %4006 = vmatmul.mubr.msk.bf16.vlgmr.msra.gmra.mrb[0].mxu1 %vm284_vm2, %v4772_v29  ;;  %677 = vmatpush1.bf16.msra.mxu0 %v5345_v30  ;;  %v2400_v29 = vpack.c.bf16 %v4171_v24, %v4171_v24  ;;  %v4844_v24 = vld [vmem:[%s6271_s1 + $0x2e0] sm:$0xff]  }
  0xd0   : > { %1448 = vmatpush1.bf16.msra.mxu1 %v5349_v31  ;;  %516 = vmatprep.mubr.bf16.mxu0 %v5101_v2 }
  0xd1   : > { %1320 = vmatprep.mubr.bf16.mxu1 %v5101_v2  ;;  %4063 = vmatprep.subr.msk.bf16.mxu1 %vm306_vm6, %v5351_v32 }
  0xd2   : > { %3947 = vmatprep.subr.msk.bf16.mxu0 %vm306_vm6, %v5163_v3 }
  0xd6   : > { %3891 = vmatmul.mubr.msk.bf16.gmra.mrb[4].mxu0 %vm284_vm2, %v4773_v33  ;;  %v2389_v33 = vsel %vm2384_vm7, %v5603_v25, 0 }
  0xd7   : > { %4007 = vmatmul.mubr.msk.bf16.gmra.mrb[4].mxu1 %vm284_vm2, %v4774_v34  ;;  %526 = vmatprep.mubr.bf16.mxu0 %v5101_v2  ;;  %v2178_v34 = vmul.bf16 %v2176_v26, %v2159_v28  ;;  %v4846_v26 = vld [vmem:[%s6271_s1 + $0x2e8] sm:$0xff]   ;;  %v4848_v28 = vld [vmem:[%s6271_s1 + $0x2f0] sm:$0xff]  }
  0xd8   : > { %1330 = vmatprep.mubr.bf16.mxu1 %v5101_v2 }
  0xde   : > { %3892 = vmatmul.mubr.msk.bf16.gmra.mrb[8].mxu0 %vm284_vm2, %v4775_v35  ;;  %v5616_v35 = vmul.bf16 %v2400_v29, %v2389_v33  ;;  %v4849_v29 = vld [vmem:[%s6271_s1 + $0x228] sm:$0xff]   ;;  %v4851_v33 = vld [vmem:[%s6271_s1 + $0x230] sm:$0xff]  }
  0xdf   : > { %4008 = vmatmul.mubr.msk.bf16.gmra.mrb[8].mxu1 %vm284_vm2, %v4776_v36  ;;  %536 = vmatprep.mubr.bf16.mxu0 %v5101_v2  ;;  %v4815_v36 = vld [vmem:[%s6271_s1 + $0x1dc] sm:$0xff]  }
  0xe0   : > { %1340 = vmatprep.mubr.bf16.mxu1 %v5101_v2 }
  0xe6   : > { %3893 = vmatmul.mubr.msk.bf16.gmra.mrb[12].mxu0 %vm284_vm2, %v4777_v37  ;;  %v4818_v37 = vld [vmem:[%s6271_s1 + $0x2b4] sm:$0xff]  }
  0xe7   : > { %4009 = vmatmul.mubr.msk.bf16.gmra.mrb[12].mxu1 %vm284_vm2, %v4778_v38  ;;  %546 = vmatprep.mubr.bf16.mxu0 %v5101_v2  ;;  %v4819_v38 = vld [vmem:[%s6271_s1 + $0x1ec] sm:$0xff]  }
  0xe8   : > { %1350 = vmatprep.mubr.bf16.mxu1 %v5101_v2 }
  0xee   : > { %3894 = vmatmul.mubr.msk.bf16.gmra.mrb[16].mxu0 %vm284_vm2, %v4779_v39  ;;  %v4820_v39 = vld [vmem:[%s6271_s1 + $0x2bc] sm:$0xff]  }
  0xef   : > { %4010 = vmatmul.mubr.msk.bf16.gmra.mrb[16].mxu1 %vm284_vm2, %v4780_v40  ;;  %556 = vmatprep.mubr.bf16.mxu0 %v5101_v2  ;;  %v4821_v40 = vld [vmem:[%s6271_s1 + $0x1f4] sm:$0xff]  }
  0xf0   : > { %1360 = vmatprep.mubr.bf16.mxu1 %v5101_v2 }
  0xf6   : > { %3895 = vmatmul.mubr.msk.bf16.gmra.mrb[20].mxu0 %vm284_vm2, %v4781_v41  ;;  %v4822_v41 = vld [vmem:[%s6271_s1 + $0x2c4] sm:$0xff]  }
  0xf7   : > { %4011 = vmatmul.mubr.msk.bf16.gmra.mrb[20].mxu1 %vm284_vm2, %v4782_v42  ;;  %566 = vmatprep.mubr.bf16.mxu0 %v5101_v2  ;;  %v5663_v42 = vadd.s32 1, %v5175_v10  ;;  %v2151_v10 = vpop.permute.xlu0 %2150 }
  0xf8   : > { %1370 = vmatprep.mubr.bf16.mxu1 %v5101_v2 }
  0xf9   : > { %vm2163_vm3 = vcmp.ge.s32.totalorder %v5663_v42, 0  ;;  %vm2167_vm1 = vcmp.lt.s32.totalorder %v5663_v42, 16 }
  0xfa   : > { %vm2165_vm9 = vmand %vm184_vm0, %vm2163_vm3  ;;  %vm6280_vm0 = vcmp.lt.s32.totalorder %v5185_v17, 16 }
  0xfb   : > { %vm2169_vm10 = vmand %vm2165_vm9, %vm2167_vm1  ;;  %v2381_v47 = vpop.permute.xlu0 %2380 }
  0xfc   : > { %vm2393_vm5 = vmand %vm2163_vm3, %vm2167_vm1  ;;  %v4140_v13 = vsel %vm2169_vm10, 1.0, %v5107_v20 }
  0xfd   : > { %vm3149_vm8 = vmand %vm6280_vm0, %vm2164_vm4  ;;  %v4170_v45 = vsel %vm2393_vm5, 1.0, %v5107_v20  ;;  %v2175_v48 = vpack.c.bf16 %v4140_v13, %v4140_v13  ;;  %vm3141_vm4 = vcmask 908288   ;;  %v4855_v13 = vld [vmem:[%s6271_s1 + $0x23c] sm:$0xff]  }
  0xfe   : > { %3896 = vmatmul.mubr.msk.bf16.gmra.mrb[24].mxu0 %vm284_vm2, %v4783_v1  ;;  %v4823_v1 = vld [vmem:[%s6271_s1 + $0x1fc] sm:$0xff]   ;;  %vm3151_vm12 = vmand %vm3149_vm8, %vm2168_vm13  ;;  %v2399_v17 = vpack.c.bf16 %v4170_v45, %v4170_v45  ;;  %vm6281_vm13 = vcmp.lt.s32.totalorder %v5182_v15, 16 }
  0xff   : > { %4012 = vmatmul.mubr.msk.bf16.gmra.mrb[24].mxu1 %vm284_vm2, %v4784_v44  ;;  %708 = vmatprep.mubr.bf16.mxu0 %v5101_v2  ;;  %v4825_v44 = vld [vmem:[%s6271_s1 + $0x204] ss:$0 sps:$4 sm:$0x33]   ;;  %vm3148_vm14 = vmand %vm6281_vm13, %vm2163_vm3  ;;  %v4840_v15 = vld [vmem:[%s6271_s1 + $0x2a0] ss:$0 sps:$4 sm:$0x33]   ;;  %v3138_v16 = vpop.permute.xlu0 %3137 }
 0x100   : > { %1479 = vmatprep.mubr.bf16.mxu1 %v5101_v2  ;;  %vm3150_vm11 = vmand %vm3148_vm14, %vm2167_vm1 }
 0x106   : > { %3920 = vmatmul.mubr.msk.bf16.vlgmr.msra.gmra.mrb[0].mxu0 %vm284_vm2, %v4785_v49  ;;  %v2155_v49 = vsel %vm2154_vm15, %v2151_v10, %v5586_v22  ;;  %v4842_v22 = vld [vmem:[%s6271_s1 + $0x2d8] sm:$0xff]  }
 0x107   : > { %4034 = vmatmul.mubr.msk.bf16.vlgmr.msra.gmra.mrb[0].mxu1 %vm284_vm2, %v4786_v50  ;;  %878 = vmatpush1.bf16.msra.mxu0 %v5349_v31  ;;  %v2385_v50 = vsel %vm2384_vm7, %v2381_v47, %v5603_v25  ;;  %v4845_v25 = vld [vmem:[%s6271_s1 + $0x218] sm:$0xff]  }
 0x108   : > { %1672 = vmatpush1.bf16.msra.mxu1 %v1666_v51  ;;  %718 = vmatprep.mubr.bf16.mxu0 %v5101_v2 }
 0x109   : > { %4220 = vmatprep.subr.msk.bf16.mxu1 %vm306_vm6, %v5351_v32  ;;  %1489 = vmatprep.mubr.bf16.mxu1 %v5101_v2  ;;  %v4814_v32 = vld [vmem:[%s6271_s1 + $0x2a4] sm:$0xff]  }
 0x10a   : > { %4104 = vmatprep.subr.msk.bf16.mxu0 %vm306_vm6, %v5163_v3 }
 0x10e   : > { %3921 = vmatmul.mubr.msk.bf16.gmra.mrb[4].mxu0 %vm284_vm2, %v4787_v52  ;;  %v2177_v52 = vmul.bf16 %v2175_v48, %v2155_v49 }
 0x10f   : > { %4035 = vmatmul.mubr.msk.bf16.gmra.mrb[4].mxu1 %vm284_vm2, %v4788_v53  ;;  %728 = vmatprep.mubr.bf16.mxu0 %v5101_v2  ;;  %v3140_v53 = vpop.permute.xlu1 %3139 }
 0x110   : > { %1499 = vmatprep.mubr.bf16.mxu1 %v5101_v2 }
 0x116   : > { %3922 = vmatmul.mubr.msk.bf16.gmra.mrb[8].mxu0 %vm284_vm2, %v4789_v54  ;;  %v2401_v54 = vmul.bf16 %v2399_v17, %v2385_v50 }
 0x117   : > { %4036 = vmatmul.mubr.msk.bf16.gmra.mrb[8].mxu1 %vm284_vm2, %v4790_v55  ;;  %738 = vmatprep.mubr.bf16.mxu0 %v5101_v2  ;;  %v4827_v55 = vld [vmem:[%s6271_s1 + $0x1a0] sm:$0xff]  }
 0x118   : > { %1509 = vmatprep.mubr.bf16.mxu1 %v5101_v2 }
 0x11e   : > { %3923 = vmatmul.mubr.msk.bf16.gmra.mrb[12].mxu0 %vm284_vm2, %v4791_v56 }
 0x11f   : > { %4037 = vmatmul.mubr.msk.bf16.gmra.mrb[12].mxu1 %vm284_vm2, %v4792_v57  ;;  %748 = vmatprep.mubr.bf16.mxu0 %v5101_v2  ;;  %v4828_v57 = vld [vmem:[%s6271_s1 + $0x270] sm:$0xff]  }
 0x120   : > { %1519 = vmatprep.mubr.bf16.mxu1 %v5101_v2 }
 0x126   : > { %3924 = vmatmul.mubr.msk.bf16.gmra.mrb[16].mxu0 %vm284_vm2, %v4793_v58  ;;  %v3146_v58 = vsel %vm3141_vm4, %v3140_v53, 0 }
 0x127   : > { %4038 = vmatmul.mubr.msk.bf16.gmra.mrb[16].mxu1 %vm284_vm2, %v4794_v59  ;;  %758 = vmatprep.mubr.bf16.mxu0 %v5101_v2  ;;  %v2234_v59 = vsel %vm306_vm6, %v2177_v52, 0 }
 0x128   : > { %1529 = vmatprep.mubr.bf16.mxu1 %v5101_v2 }
 0x12e   : > { %3925 = vmatmul.mubr.msk.bf16.gmra.mrb[20].mxu0 %vm284_vm2, %v4795_v60  ;;  %v2458_v60 = vsel %vm306_vm6, %v2401_v54, 0 }
 0x12f   : > { %4039 = vmatmul.mubr.msk.bf16.gmra.mrb[20].mxu1 %vm284_vm2, %v4796_v62  ;;  %768 = vmatprep.mubr.bf16.mxu0 %v5101_v2 }
 0x130   : > { %1539 = vmatprep.mubr.bf16.mxu1 %v5101_v2 }
 0x136   : > { %3926 = vmatmul.mubr.msk.bf16.gmra.mrb[24].mxu0 %vm284_vm2, %v4797_v63  ;;  %v4829_v63 = vld [vmem:[%s6271_s1 + $0x1a8] sm:$0xff]  }
 0x137   : > { %4040 = vmatmul.mubr.msk.bf16.gmra.mrb[24].mxu1 %vm284_vm2, %v4798_v0  ;;  %909 = vmatprep.mubr.bf16.mxu0 %v5101_v2  ;;  %v4830_v0 = vld [vmem:[%s6271_s1 + $0x278] sm:$0xff]  }
 0x138   : > { %1703 = vmatprep.mubr.bf16.mxu1 %v5101_v2 }
 0x13e   : > { %3948 = vmatmul.mubr.msk.bf16.vlgmr.msra.gmra.mrb[0].mxu0 %vm284_vm2, %v4799_v4  ;;  %v4831_v4 = vld [vmem:[%s6271_s1 + $0x1b0] sm:$0xff]  }
 0x13f   : > { %4064 = vmatmul.mubr.msk.bf16.vlgmr.msra.gmra.mrb[0].mxu1 %vm284_vm2, %v4800_v5  ;;  %1881 = vmatpush1.bf16.msra.mxu0 %v5349_v31  ;;  %v4832_v5 = vld [vmem:[%s6271_s1 + $0x280] sm:$0xff]  }
 0x140   : > { %2673 = vmatpush1.bf16.msra.mxu1 %v1666_v51  ;;  %4119 = vmatprep.subr.msk.bf16.mxu0 %vm306_vm6, %v5249_v61  ;;  %v4803_v61 = vld [vmem:[%s6271_s1 + $0xac] sm:$0xff]   ;;  %v4285_v51 = vsel %vm3151_vm12, 1.0, %v5107_v20 }
 0x141   : > { %919 = vmatprep.mubr.bf16.mxu0 %v5101_v2  ;;  %1713 = vmatprep.mubr.bf16.mxu1 %v5101_v2  ;;  %v3157_v56 = vpack.c.bf16 %v4285_v51, %v4285_v51 }
 0x142   : > { %4235 = vmatprep.subr.msk.bf16.mxu1 %vm306_vm6, %v5163_v3  ;;  %v4804_v3 = vld [vmem:[%s6271_s1 + $0x17c] sm:$0xff]  }
 0x143   : > { %v3159_v62 = vmul.bf16 %v3157_v56, %v3146_v58 }
 0x146   : > { %3949 = vmatmul.mubr.msk.bf16.gmra.mrb[4].mxu0 %vm284_vm2, %v4801_v6  ;;  %v4833_v6 = vld [vmem:[%s6271_s1 + $0x1b8] sm:$0xff]  }
 0x147   : > { %4065 = vmatmul.mubr.msk.bf16.gmra.mrb[4].mxu1 %vm284_vm2, %v4802_v7  ;;  %929 = vmatprep.mubr.bf16.mxu0 %v5101_v2  ;;  %v4834_v7 = vld [vmem:[%s6271_s1 + $0x288] sm:$0xff]  }
 0x148   : > { %1723 = vmatprep.mubr.bf16.mxu1 %v5101_v2 }
 0x14e   : > { %3950 = vmatmul.mubr.msk.bf16.gmra.mrb[8].mxu0 %vm284_vm2, %v4803_v61  ;;  %v4835_v61 = vld [vmem:[%s6271_s1 + $0x1c0] sm:$0xff]  }
 0x14f   : > { %4066 = vmatmul.mubr.msk.bf16.gmra.mrb[8].mxu1 %vm284_vm2, %v4804_v3  ;;  %939 = vmatprep.mubr.bf16.mxu0 %v5101_v2  ;;  %v4836_v3 = vld [vmem:[%s6271_s1 + $0x290] sm:$0xff]  }
 0x150   : > { %1733 = vmatprep.mubr.bf16.mxu1 %v5101_v2 }
 0x156   : > { %3951 = vmatmul.mubr.msk.bf16.gmra.mrb[12].mxu0 %vm284_vm2, %v4805_v8  ;;  %v4837_v8 = vld [vmem:[%s6271_s1 + $0x1c8] sm:$0xff]  }
 0x157   : > { %4067 = vmatmul.mubr.msk.bf16.gmra.mrb[12].mxu1 %vm284_vm2, %v4806_v9  ;;  %949 = vmatprep.mubr.bf16.mxu0 %v5101_v2  ;;  %v4838_v9 = vld [vmem:[%s6271_s1 + $0x298] sm:$0xff]  }
 0x158   : > { %1743 = vmatprep.mubr.bf16.mxu1 %v5101_v2 }
 0x15e   : > { %3952 = vmatmul.mubr.msk.bf16.gmra.mrb[16].mxu0 %vm284_vm2, %v4807_v11  ;;  %v4839_v11 = vld [vmem:[%s6271_s1 + $0x1d0] ss:$0 sps:$4 sm:$0x33]  }
 0x15f   : > { %4068 = vmatmul.mubr.msk.bf16.gmra.mrb[16].mxu1 %vm284_vm2, %v4808_v14  ;;  %959 = vmatprep.mubr.bf16.mxu0 %v5101_v2  ;;  %v4284_v14 = vsel %vm3150_vm11, 1.0, %v5107_v20  ;;  %v4841_v20 = vld [vmem:[%s6271_s1 + $0x208] sm:$0xff]  }
 0x160   : > { %1753 = vmatprep.mubr.bf16.mxu1 %v5101_v2 }
 0x166   : > { %3953 = vmatmul.mubr.msk.bf16.gmra.mrb[20].mxu0 %vm284_vm2, %v4809_v19  ;;  %v3156_v19 = vpack.c.bf16 %v4284_v14, %v4284_v14 }
 0x167   : > { %4069 = vmatmul.mubr.msk.bf16.gmra.mrb[20].mxu1 %vm284_vm2, %v4810_v21  ;;  %969 = vmatprep.mubr.bf16.mxu0 %v5101_v2  ;;  %v3142_v21 = vsel %vm3141_vm4, %v3138_v16, %v3140_v53 }
 0x168   : > { %1763 = vmatprep.mubr.bf16.mxu1 %v5101_v2 }
 0x16e   : > { %3954 = vmatmul.mubr.msk.bf16.gmra.mrb[24].mxu0 %vm284_vm2, %v4811_v12  ;;  %v3158_v12 = vmul.bf16 %v3156_v19, %v3142_v21  ;;  %v4859_v21 = vld [vmem:[%s6271_s1 + $0x24c] sm:$0xff]  }
 0x16f   : > { %4070 = vmatmul.mubr.msk.bf16.gmra.mrb[24].mxu1 %vm284_vm2, %v4812_v23  ;;  %1912 = vmatprep.mubr.bf16.mxu0 %v5101_v2 }
 0x170   : > { %2704 = vmatprep.mubr.bf16.mxu1 %v5101_v2  ;;  %v3215_v23 = vsel %vm306_vm6, %v3158_v12, 0 }
 0x176   : > { %4105 = vmatmul.mubr.msk.bf16.vlgmr.msra.gmra.mrb[28].mxu0 %vm284_vm2, %v4813_v27  ;;  %v4847_v27 = vld [vmem:[%s6271_s1 + $0x220] sm:$0xff]  }
 0x177   : > { %2036 = vmatpush1.bf16.msra.mxu0 %v5345_v30  ;;  %4221 = vmatmul.mubr.msk.bf16.vlgmr.msra.gmra.mrb[28].mxu1 %vm284_vm2, %v4814_v32  ;;  %v4816_v30 = vld [vmem:[%s6271_s1 + $0x2ac] sm:$0xff]   ;;  %v4850_v32 = vld [vmem:[%s6271_s1 + $0x2f8] sm:$0xff]  }
 0x178   : > { %2828 = vmatpush1.bf16.msra.mxu1 %v5349_v31  ;;  %1922 = vmatprep.mubr.bf16.mxu0 %v5101_v2  ;;  %v4817_v31 = vld [vmem:[%s6271_s1 + $0x1e4] sm:$0xff]  }
 0x179   : > { %2714 = vmatprep.mubr.bf16.mxu1 %v5101_v2  ;;  %4149 = vmatprep.subr.msk.bf16.mxu0 %vm306_vm6, %v2178_v34  ;;  %v4852_v34 = vld [vmem:[%s6271_s1 + $0x300] sm:$0xff]  }
 0x17a   : > { %4263 = vmatprep.subr.msk.bf16.mxu1 %vm306_vm6, %v5616_v35 }
 0x17e   : > { %4106 = vmatmul.mubr.msk.bf16.gmra.mrb[32].mxu0 %vm284_vm2, %v4815_v36 }
 0x17f   : > { %4222 = vmatmul.mubr.msk.bf16.gmra.mrb[32].mxu1 %vm284_vm2, %v4816_v30  ;;  %1932 = vmatprep.mubr.bf16.mxu0 %v5101_v2 }
 0x180   : > { %2724 = vmatprep.mubr.bf16.mxu1 %v5101_v2 }
 0x186   : > { %4107 = vmatmul.mubr.msk.bf16.gmra.mrb[36].mxu0 %vm284_vm2, %v4817_v31  ;;  %v4853_v31 = vld [vmem:[%s6271_s1 + $0x238] ss:$0 sps:$4 sm:$0x33]  }
 0x187   : > { %4223 = vmatmul.mubr.msk.bf16.gmra.mrb[36].mxu1 %vm284_vm2, %v4818_v37  ;;  %1942 = vmatprep.mubr.bf16.mxu0 %v5101_v2 }
 0x188   : > { %2734 = vmatprep.mubr.bf16.mxu1 %v5101_v2 }
 0x18e   : > { %4108 = vmatmul.mubr.msk.bf16.gmra.mrb[40].mxu0 %vm284_vm2, %v4819_v38 }
 0x18f   : > { %4224 = vmatmul.mubr.msk.bf16.gmra.mrb[40].mxu1 %vm284_vm2, %v4820_v39  ;;  %1952 = vmatprep.mubr.bf16.mxu0 %v5101_v2  ;;  %v4854_v39 = vld [vmem:[%s6271_s1 + $0x308] ss:$0 sps:$4 sm:$0x33]  }
 0x190   : > { %2744 = vmatprep.mubr.bf16.mxu1 %v5101_v2 }
 0x196   : > { %4109 = vmatmul.mubr.msk.bf16.gmra.mrb[44].mxu0 %vm284_vm2, %v4821_v40 }
 0x197   : > { %4225 = vmatmul.mubr.msk.bf16.gmra.mrb[44].mxu1 %vm284_vm2, %v4822_v41  ;;  %1962 = vmatprep.mubr.bf16.mxu0 %v5101_v2 }
 0x198   : > { %2754 = vmatprep.mubr.bf16.mxu1 %v5101_v2 }
 0x19e   : > { %4110 = vmatmul.mubr.msk.bf16.gmra.mrb[48].mxu0 %vm284_vm2, %v4823_v1 }
 0x19f   : > { %4226 = vmatmul.mubr.msk.bf16.gmra.mrb[48].mxu1 %vm284_vm2, %v4824_v43  ;;  %1972 = vmatprep.mubr.bf16.mxu0 %v5101_v2 }
 0x1a0   : > { %2764 = vmatprep.mubr.bf16.mxu1 %v5101_v2 }
 0x1a6   : > { %4111 = vmatmul.mubr.msk.bf16.gmra.mrb[52].mxu0 %vm284_vm2, %v4825_v44 }
 0x1a7   : > { %4227 = vmatmul.mubr.msk.bf16.gmra.mrb[52].mxu1 %vm284_vm2, %v4826_v46  ;;  %2067 = vmatprep.mubr.bf16.mxu0 %v5101_v2  ;;  %v4856_v46 = vld [vmem:[%s6271_s1 + $0x30c] sm:$0xff]  }
 0x1a8   : > { %2859 = vmatprep.mubr.bf16.mxu1 %v5101_v2 }
 0x1ae   : > { %4120 = vmatmul.mubr.msk.bf16.vlgmr.msra.gmra.mrb[28].mxu0 %vm284_vm2, %v4827_v55 }
 0x1af   : > { %2240 = vmatpush1.bf16.msra.mxu0 %v2234_v59  ;;  %4236 = vmatmul.mubr.msk.bf16.vlgmr.msra.gmra.mrb[28].mxu1 %vm284_vm2, %v4828_v57  ;;  %v4857_v59 = vld [vmem:[%s6271_s1 + $0x244] sm:$0xff]  }
 0x1b0   : > { %4179 = vmatprep.subr.msk.bf16.mxu0 %vm306_vm6, %v5616_v35  ;;  %2997 = vmatpush1.bf16.msra.mxu1 %v2458_v60 }
 0x1b1   : > { %2077 = vmatprep.mubr.bf16.mxu0 %v5101_v2  ;;  %2869 = vmatprep.mubr.bf16.mxu1 %v5101_v2 }
 0x1b2   : > { %4293 = vmatprep.subr.msk.bf16.mxu1 %vm306_vm6, %v3159_v62 }
 0x1b6   : > { %4121 = vmatmul.mubr.msk.bf16.gmra.mrb[32].mxu0 %vm284_vm2, %v4829_v63 }
 0x1b7   : > { %4237 = vmatmul.mubr.msk.bf16.gmra.mrb[32].mxu1 %vm284_vm2, %v4830_v0  ;;  %2087 = vmatprep.mubr.bf16.mxu0 %v5101_v2  ;;  %v4858_v0 = vld [vmem:[%s6271_s1 + $0x314] sm:$0xff]  }
 0x1b8   : > { %2879 = vmatprep.mubr.bf16.mxu1 %v5101_v2 }
 0x1be   : > { %4122 = vmatmul.mubr.msk.bf16.gmra.mrb[36].mxu0 %vm284_vm2, %v4831_v4 }
 0x1bf   : > { %4238 = vmatmul.mubr.msk.bf16.gmra.mrb[36].mxu1 %vm284_vm2, %v4832_v5  ;;  %2097 = vmatprep.mubr.bf16.mxu0 %v5101_v2 }
 0x1c0   : > { %2889 = vmatprep.mubr.bf16.mxu1 %v5101_v2 }
 0x1c6   : > { %4123 = vmatmul.mubr.msk.bf16.gmra.mrb[40].mxu0 %vm284_vm2, %v4833_v6 }
 0x1c7   : > { %4239 = vmatmul.mubr.msk.bf16.gmra.mrb[40].mxu1 %vm284_vm2, %v4834_v7  ;;  %2107 = vmatprep.mubr.bf16.mxu0 %v5101_v2 }
 0x1c8   : > { %2899 = vmatprep.mubr.bf16.mxu1 %v5101_v2 }
 0x1ce   : > { %4124 = vmatmul.mubr.msk.bf16.gmra.mrb[44].mxu0 %vm284_vm2, %v4835_v61 }
 0x1cf   : > { %4240 = vmatmul.mubr.msk.bf16.gmra.mrb[44].mxu1 %vm284_vm2, %v4836_v3  ;;  %2117 = vmatprep.mubr.bf16.mxu0 %v5101_v2 }
 0x1d0   : > { %2909 = vmatprep.mubr.bf16.mxu1 %v5101_v2 }
 0x1d6   : > { %4125 = vmatmul.mubr.msk.bf16.gmra.mrb[48].mxu0 %vm284_vm2, %v4837_v8 }
 0x1d7   : > { %4241 = vmatmul.mubr.msk.bf16.gmra.mrb[48].mxu1 %vm284_vm2, %v4838_v9  ;;  %2127 = vmatprep.mubr.bf16.mxu0 %v5101_v2 }
 0x1d8   : > { %2919 = vmatprep.mubr.bf16.mxu1 %v5101_v2 }
 0x1de   : > { %4126 = vmatmul.mubr.msk.bf16.gmra.mrb[52].mxu0 %vm284_vm2, %v4839_v11 }
 0x1df   : > { %4242 = vmatmul.mubr.msk.bf16.gmra.mrb[52].mxu1 %vm284_vm2, %v4840_v15  ;;  %2271 = vmatprep.mubr.bf16.mxu0 %v5101_v2 }
 0x1e0   : > { %3028 = vmatprep.mubr.bf16.mxu1 %v5101_v2 }
 0x1e6   : > { %4150 = vmatmul.mubr.msk.bf16.vlgmr.msra.gmra.mrb[28].mxu0 %vm284_vm2, %v4841_v20 }
 0x1e7   : > { %2464 = vmatpush1.bf16.msra.mxu0 %v2458_v60  ;;  %4264 = vmatmul.mubr.msk.bf16.vlgmr.msra.gmra.mrb[28].mxu1 %vm284_vm2, %v4842_v22 }
 0x1e8   : > { %3221 = vmatpush1.bf16.msra.mxu1 %v3215_v23  ;;  %2281 = vmatprep.mubr.bf16.mxu0 %v5101_v2  ;;  %v4860_v23 = vld [vmem:[%s6271_s1 + $0x31c] sm:$0xff]  }
 0x1e9   : > { %3038 = vmatprep.mubr.bf16.mxu1 %v5101_v2 }
 0x1ee   : > { %4151 = vmatmul.mubr.msk.bf16.gmra.mrb[32].mxu0 %vm284_vm2, %v4843_v18 }
 0x1ef   : > { %4265 = vmatmul.mubr.msk.bf16.gmra.mrb[32].mxu1 %vm284_vm2, %v4844_v24  ;;  %2291 = vmatprep.mubr.bf16.mxu0 %v5101_v2 }
 0x1f0   : > { %3048 = vmatprep.mubr.bf16.mxu1 %v5101_v2 }
 0x1f6   : > { %4152 = vmatmul.mubr.msk.bf16.gmra.mrb[36].mxu0 %vm284_vm2, %v4845_v25 }
 0x1f7   : > { %4266 = vmatmul.mubr.msk.bf16.gmra.mrb[36].mxu1 %vm284_vm2, %v4846_v26  ;;  %2301 = vmatprep.mubr.bf16.mxu0 %v5101_v2 }
 0x1f8   : > { %3058 = vmatprep.mubr.bf16.mxu1 %v5101_v2 }
 0x1fe   : > { %4153 = vmatmul.mubr.msk.bf16.gmra.mrb[40].mxu0 %vm284_vm2, %v4847_v27 }
 0x1ff   : > { %4267 = vmatmul.mubr.msk.bf16.gmra.mrb[40].mxu1 %vm284_vm2, %v4848_v28  ;;  %2311 = vmatprep.mubr.bf16.mxu0 %v5101_v2 }
 0x200   : > { %3068 = vmatprep.mubr.bf16.mxu1 %v5101_v2 }
 0x206   : > { %4154 = vmatmul.mubr.msk.bf16.gmra.mrb[44].mxu0 %vm284_vm2, %v4849_v29 }
 0x207   : > { %4268 = vmatmul.mubr.msk.bf16.gmra.mrb[44].mxu1 %vm284_vm2, %v4850_v32  ;;  %2321 = vmatprep.mubr.bf16.mxu0 %v5101_v2 }
 0x208   : > { %3078 = vmatprep.mubr.bf16.mxu1 %v5101_v2 }
 0x20e   : > { %4155 = vmatmul.mubr.msk.bf16.gmra.mrb[48].mxu0 %vm284_vm2, %v4851_v33 }
 0x20f   : > { %4269 = vmatmul.mubr.msk.bf16.gmra.mrb[48].mxu1 %vm284_vm2, %v4852_v34  ;;  %2331 = vmatprep.mubr.bf16.mxu0 %v5101_v2 }
 0x210   : > { %3088 = vmatprep.mubr.bf16.mxu1 %v5101_v2 }
 0x211   : > { %v911_v35 = vpop.f32.mrb[0].mxu0 }
 0x212   : > { %4869 = vtanh.f32 %v911_v35  ;;  %v1705_v36 = vpop.f32.mrb[0].mxu1  ;;  %v913_v30 = vpop.f32.mrb[1].mxu0 }
 0x213   : > { %4871 = vtanh.f32 %v1705_v36  ;;  %v1707_v37 = vpop.f32.mrb[1].mxu1  ;;  %v915_v38 = vpop.f32.mrb[2].mxu0 }
 0x214   : > { %4873 = vtanh.f32 %v913_v30  ;;  %v1709_v40 = vpop.f32.mrb[2].mxu1  ;;  %v917_v41 = vpop.f32.mrb[3].mxu0 }
 0x215   : > { %4875 = vtanh.f32 %v1707_v37  ;;  %v1711_v42 = vpop.f32.mrb[3].mxu1 }
 0x216   : > { %4877 = vtanh.f32 %v915_v38  ;;  %4156 = vmatmul.mubr.msk.bf16.gmra.mrb[52].mxu0 %vm284_vm2, %v4853_v31  ;;  %v4861_v31 = vld [vmem:[%s6271_s1 + $0x254] sm:$0xff]  }
 0x217   : > { %4879 = vtanh.f32 %v1709_v40  ;;  %4270 = vmatmul.mubr.msk.bf16.gmra.mrb[52].mxu1 %vm284_vm2, %v4854_v39  ;;  %2495 = vmatprep.mubr.bf16.mxu0 %v5101_v2  ;;  %v4862_v40 = vld [vmem:[%s6271_s1 + $0x324] sm:$0xff]  }
 0x218   : > { %4881 = vtanh.f32 %v917_v41  ;;  %3252 = vmatprep.mubr.bf16.mxu1 %v5101_v2 }
 0x219   : > { %4883 = vtanh.f32 %v1711_v42  ;;  %v921_v1 = vpop.f32.mrb[4].mxu0 }
 0x21a   : > { %4885 = vtanh.f32 %v921_v1  ;;  %v1715_v43 = vpop.f32.mrb[4].mxu1  ;;  %v923_v10 = vpop.f32.mrb[5].mxu0 }
 0x21b   : > { %4887 = vtanh.f32 %v1715_v43  ;;  %v1717_v44 = vpop.f32.mrb[5].mxu1  ;;  %v925_v45 = vpop.f32.mrb[6].mxu0 }
 0x21c   : > { %v4870_v47 = vpop.eup %4869  ;;  %4889 = vtanh.f32 %v923_v10  ;;  %v1719_v48 = vpop.f32.mrb[6].mxu1 }
 0x21d   : > { %v927_v49 = vpop.f32.mrb[7].mxu0  ;;  %v4872_v17 = vpop.eup %4871  ;;  %3373 = vst [vmem:[%s5876_s6] sm:$0xff] %v4870_v47  ;;  %4891 = vtanh.f32 %v1717_v44 }
 0x21e   : > { %v1721_v50 = vpop.f32.mrb[7].mxu1  ;;  %v4874_v51 = vpop.eup %4873  ;;  %4301 = vst [vmem:[%s5876_s6 + $0xd0] sm:$0xff] %v4872_v17  ;;  %4893 = vtanh.f32 %v925_v45  ;;  %4180 = vmatmul.mubr.msk.bf16.vlgmr.msra.gmra.mrb[28].mxu0 %vm284_vm2, %v4855_v13 }
 0x21f   : > { %v4876_v52 = vpop.eup %4875  ;;  %3374 = vst [vmem:[%s5876_s6 + $0x8] sm:$0xff] %v4874_v51  ;;  %4895 = vtanh.f32 %v1719_v48  ;;  %4294 = vmatmul.mubr.msk.bf16.vlgmr.msra.gmra.mrb[28].mxu1 %vm284_vm2, %v4856_v46  ;;  %2505 = vmatprep.mubr.bf16.mxu0 %v5101_v2 }
 0x220   : > { %v4878_v53 = vpop.eup %4877  ;;  %4302 = vst [vmem:[%s5876_s6 + $0xd8] sm:$0xff] %v4876_v52  ;;  %4897 = vtanh.f32 %v927_v49  ;;  %3262 = vmatprep.mubr.bf16.mxu1 %v5101_v2 }
 0x221   : > { %v4880_v54 = vpop.eup %4879  ;;  %3375 = vst [vmem:[%s5876_s6 + $0x10] sm:$0xff] %v4878_v53  ;;  %4899 = vtanh.f32 %v1721_v50  ;;  %v931_v55 = vpop.f32.mrb[8].mxu0  ;;  %v4863_v50 = vld [vmem:[%s6271_s1 + $0x25c] sm:$0xff]  }
 0x222   : > { %v4882_v56 = vpop.eup %4881  ;;  %4303 = vst [vmem:[%s5876_s6 + $0xe0] sm:$0xff] %v4880_v54  ;;  %4901 = vtanh.f32 %v931_v55  ;;  %v1725_v57 = vpop.f32.mrb[8].mxu1  ;;  %v4864_v54 = vld [vmem:[%s6271_s1 + $0x32c] sm:$0xff]  }
 0x223   : > { %v933_v58 = vpop.f32.mrb[9].mxu0  ;;  %v4884_v60 = vpop.eup %4883  ;;  %3376 = vst [vmem:[%s5876_s6 + $0x18] sm:$0xff] %v4882_v56  ;;  %4903 = vtanh.f32 %v1725_v57 }
 0x224   : > { %v1727_v62 = vpop.f32.mrb[9].mxu1  ;;  %v935_v63 = vpop.f32.mrb[10].mxu0  ;;  %4304 = vst [vmem:[%s5876_s6 + $0xe8] sm:$0xff] %v4884_v60  ;;  %4905 = vtanh.f32 %v933_v58 }
 0x225   : > { %v4886_v4 = vpop.eup %4885  ;;  %v1729_v5 = vpop.f32.mrb[10].mxu1  ;;  %4907 = vtanh.f32 %v1727_v62 }
 0x226   : > { %v937_v6 = vpop.f32.mrb[11].mxu0  ;;  %v4888_v7 = vpop.eup %4887  ;;  %3377 = vst [vmem:[%s5876_s6 + $0x20] sm:$0xff] %v4886_v4  ;;  %4909 = vtanh.f32 %v935_v63  ;;  %4181 = vmatmul.mubr.msk.bf16.gmra.mrb[32].mxu0 %vm284_vm2, %v4857_v59 }
 0x227   : > { %v1731_v61 = vpop.f32.mrb[11].mxu1  ;;  %v4890_v3 = vpop.eup %4889  ;;  %4305 = vst [vmem:[%s5876_s6 + $0xf0] sm:$0xff] %v4888_v7  ;;  %4911 = vtanh.f32 %v1729_v5  ;;  %4295 = vmatmul.mubr.msk.bf16.gmra.mrb[32].mxu1 %vm284_vm2, %v4858_v0  ;;  %2515 = vmatprep.mubr.bf16.mxu0 %v5101_v2 }
 0x228   : > { %v4892_v8 = vpop.eup %4891  ;;  %3378 = vst [vmem:[%s5876_s6 + $0x28] sm:$0xff] %v4890_v3  ;;  %4913 = vtanh.f32 %v937_v6  ;;  %3272 = vmatprep.mubr.bf16.mxu1 %v5101_v2 }
 0x229   : > { %v4894_v9 = vpop.eup %4893  ;;  %4306 = vst [vmem:[%s5876_s6 + $0xf8] sm:$0xff] %v4892_v8  ;;  %4915 = vtanh.f32 %v1731_v61  ;;  %v941_v14 = vpop.f32.mrb[12].mxu0  ;;  %v4865_v61 = vld [vmem:[%s6271_s1 + $0x264] sm:$0xff]  }
 0x22a   : > { %v4896_v11 = vpop.eup %4895  ;;  %3379 = vst [vmem:[%s5876_s6 + $0x30] sm:$0xff] %v4894_v9  ;;  %4917 = vtanh.f32 %v941_v14  ;;  %v1735_v16 = vpop.f32.mrb[12].mxu1 }
 0x22b   : > { %v4898_v15 = vpop.eup %4897  ;;  %4307 = vst [vmem:[%s5876_s6 + $0x100] sm:$0xff] %v4896_v11  ;;  %v943_v19 = vpop.f32.mrb[13].mxu0  ;;  %4919 = vtanh.f32 %v1735_v16  ;;  %v4866_v11 = vld [vmem:[%s6271_s1 + $0x334] sm:$0xff]  }
 0x22c   : > { %v4900_v12 = vpop.eup %4899  ;;  %3380 = vst [vmem:[%s5876_s6 + $0x38] sm:$0xff] %v4898_v15  ;;  %v1737_v20 = vpop.f32.mrb[13].mxu1  ;;  %4921 = vtanh.f32 %v943_v19 }
 0x22d   : > { %v945_v22 = vpop.f32.mrb[14].mxu0  ;;  %v4902_v18 = vpop.eup %4901  ;;  %4308 = vst [vmem:[%s5876_s6 + $0x108] sm:$0xff] %v4900_v12  ;;  %4923 = vtanh.f32 %v1737_v20 }
 0x22e   : > { %v1739_v24 = vpop.f32.mrb[14].mxu1  ;;  %v947_v25 = vpop.f32.mrb[15].mxu0  ;;  %3381 = vst [vmem:[%s5876_s6 + $0x40] sm:$0xff] %v4902_v18  ;;  %4925 = vtanh.f32 %v945_v22  ;;  %4182 = vmatmul.mubr.msk.bf16.gmra.mrb[36].mxu0 %vm284_vm2, %v4859_v21 }
 0x22f   : > { %v4904_v26 = vpop.eup %4903  ;;  %v1741_v27 = vpop.f32.mrb[15].mxu1  ;;  %4927 = vtanh.f32 %v1739_v24  ;;  %4296 = vmatmul.mubr.msk.bf16.gmra.mrb[36].mxu1 %vm284_vm2, %v4860_v23  ;;  %2525 = vmatprep.mubr.bf16.mxu0 %v5101_v2  ;;  %v4867_v24 = vld [vmem:[%s6271_s1 + $0x26c] ss:$0 sps:$4 sm:$0x33]  }
 0x230   : > { %v4906_v28 = vpop.eup %4905  ;;  %4309 = vst [vmem:[%s5876_s6 + $0x110] sm:$0xff] %v4904_v26  ;;  %4929 = vtanh.f32 %v947_v25  ;;  %3282 = vmatprep.mubr.bf16.mxu1 %v5101_v2  ;;  %v4868_v26 = vld [vmem:[%s6271_s1 + $0x33c] ss:$0 sps:$4 sm:$0x33]  }
 0x231   : > { %v4908_v29 = vpop.eup %4907  ;;  %3382 = vst [vmem:[%s5876_s6 + $0x48] sm:$0xff] %v4906_v28  ;;  %4931 = vtanh.f32 %v1741_v27  ;;  %v951_v34 = vpop.f32.mrb[16].mxu0 }
 0x232   : > { %v4910_v32 = vpop.eup %4909  ;;  %4310 = vst [vmem:[%s5876_s6 + $0x118] sm:$0xff] %v4908_v29  ;;  %4933 = vtanh.f32 %v951_v34  ;;  %v1745_v36 = vpop.f32.mrb[16].mxu1 }
 0x233   : > { %v4912_v33 = vpop.eup %4911  ;;  %3383 = vst [vmem:[%s5876_s6 + $0x50] sm:$0xff] %v4910_v32  ;;  %v953_v30 = vpop.f32.mrb[17].mxu0  ;;  %4935 = vtanh.f32 %v1745_v36 }
 0x234   : > { %v4914_v35 = vpop.eup %4913  ;;  %4311 = vst [vmem:[%s5876_s6 + $0x120] sm:$0xff] %v4912_v33  ;;  %v1747_v38 = vpop.f32.mrb[17].mxu1  ;;  %4937 = vtanh.f32 %v953_v30 }
 0x235   : > { %v4916_v37 = vpop.eup %4915  ;;  %3384 = vst [vmem:[%s5876_s6 + $0x58] sm:$0xff] %v4914_v35  ;;  %v955_v39 = vpop.f32.mrb[18].mxu0  ;;  %4939 = vtanh.f32 %v1747_v38 }
 0x236   : > { %v4918_v41 = vpop.eup %4917  ;;  %4312 = vst [vmem:[%s5876_s6 + $0x128] sm:$0xff] %v4916_v37  ;;  %v1749_v42 = vpop.f32.mrb[18].mxu1  ;;  %4941 = vtanh.f32 %v955_v39  ;;  %4183 = vmatmul.mubr.msk.bf16.gmra.mrb[40].mxu0 %vm284_vm2, %v4861_v31 }
 0x237   : > { %v957_v1 = vpop.f32.mrb[19].mxu0  ;;  %v4920_v43 = vpop.eup %4919  ;;  %3385 = vst [vmem:[%s5876_s6 + $0x60] sm:$0xff] %v4918_v41  ;;  %4943 = vtanh.f32 %v1749_v42  ;;  %4297 = vmatmul.mubr.msk.bf16.gmra.mrb[40].mxu1 %vm284_vm2, %v4862_v40  ;;  %2535 = vmatprep.mubr.bf16.mxu0 %v5101_v2 }
 0x238   : > { %v1751_v10 = vpop.f32.mrb[19].mxu1  ;;  %v4922_v13 = vpop.eup %4921  ;;  %4313 = vst [vmem:[%s5876_s6 + $0x130] sm:$0xff] %v4920_v43  ;;  %4945 = vtanh.f32 %v957_v1  ;;  %3292 = vmatprep.mubr.bf16.mxu1 %v5101_v2 }
 0x239   : > { %v4924_v44 = vpop.eup %4923  ;;  %3386 = vst [vmem:[%s5876_s6 + $0x68] sm:$0xff] %v4922_v13  ;;  %4947 = vtanh.f32 %v1751_v10  ;;  %v961_v47 = vpop.f32.mrb[20].mxu0 }
 0x23a   : > { %v4926_v45 = vpop.eup %4925  ;;  %4314 = vst [vmem:[%s5876_s6 + $0x138] sm:$0xff] %v4924_v44  ;;  %4949 = vtanh.f32 %v961_v47  ;;  %v1755_v49 = vpop.f32.mrb[20].mxu1 }
 0x23b   : > { %v4928_v46 = vpop.eup %4927  ;;  %3387 = vst [vmem:[%s5876_s6 + $0x70] sm:$0xff] %v4926_v45  ;;  %v963_v17 = vpop.f32.mrb[21].mxu0  ;;  %4951 = vtanh.f32 %v1755_v49 }
 0x23c   : > { %v4930_v48 = vpop.eup %4929  ;;  %4315 = vst [vmem:[%s5876_s6 + $0x140] sm:$0xff] %v4928_v46  ;;  %v1757_v52 = vpop.f32.mrb[21].mxu1  ;;  %4953 = vtanh.f32 %v963_v17 }
 0x23d   : > { %v4932_v51 = vpop.eup %4931  ;;  %3388 = vst [vmem:[%s5876_s6 + $0x78] sm:$0xff] %v4930_v48  ;;  %v965_v53 = vpop.f32.mrb[22].mxu0  ;;  %4955 = vtanh.f32 %v1757_v52 }
 0x23e   : > { %v4934_v55 = vpop.eup %4933  ;;  %4316 = vst [vmem:[%s5876_s6 + $0x148] sm:$0xff] %v4932_v51  ;;  %v1759_v56 = vpop.f32.mrb[22].mxu1  ;;  %4957 = vtanh.f32 %v965_v53  ;;  %4184 = vmatmul.mubr.msk.bf16.gmra.mrb[44].mxu0 %vm284_vm2, %v4863_v50 }
 0x23f   : > { %v967_v57 = vpop.f32.mrb[23].mxu0  ;;  %v4936_v58 = vpop.eup %4935  ;;  %3389 = vst [vmem:[%s5876_s6 + $0x80] sm:$0xff] %v4934_v55  ;;  %4959 = vtanh.f32 %v1759_v56  ;;  %4298 = vmatmul.mubr.msk.bf16.gmra.mrb[44].mxu1 %vm284_vm2, %v4864_v54  ;;  %2545 = vmatprep.mubr.bf16.mxu0 %v5101_v2 }
 0x240   : > { %v1761_v59 = vpop.f32.mrb[23].mxu1  ;;  %v4938_v60 = vpop.eup %4937  ;;  %4317 = vst [vmem:[%s5876_s6 + $0x150] sm:$0xff] %v4936_v58  ;;  %4961 = vtanh.f32 %v967_v57  ;;  %3302 = vmatprep.mubr.bf16.mxu1 %v5101_v2 }
 0x241   : > { %v4940_v62 = vpop.eup %4939  ;;  %3390 = vst [vmem:[%s5876_s6 + $0x88] sm:$0xff] %v4938_v60  ;;  %4963 = vtanh.f32 %v1761_v59  ;;  %v971_v4 = vpop.f32.mrb[24].mxu0 }
 0x242   : > { %v4942_v63 = vpop.eup %4941  ;;  %4318 = vst [vmem:[%s5876_s6 + $0x158] sm:$0xff] %v4940_v62  ;;  %4965 = vtanh.f32 %v971_v4  ;;  %v1765_v6 = vpop.f32.mrb[24].mxu1 }
 0x243   : > { %v4944_v0 = vpop.eup %4943  ;;  %3391 = vst [vmem:[%s5876_s6 + $0x90] sm:$0xff] %v4942_v63  ;;  %v973_v7 = vpop.f32.mrb[25].mxu0  ;;  %4967 = vtanh.f32 %v1765_v6 }
 0x244   : > { %v4946_v5 = vpop.eup %4945  ;;  %4319 = vst [vmem:[%s5876_s6 + $0x160] sm:$0xff] %v4944_v0  ;;  %v1767_v8 = vpop.f32.mrb[25].mxu1  ;;  %4969 = vtanh.f32 %v973_v7 }
 0x245   : > { %v4948_v3 = vpop.eup %4947  ;;  %3392 = vst [vmem:[%s5876_s6 + $0x98] sm:$0xff] %v4946_v5  ;;  %v975_v9 = vpop.f32.mrb[26].mxu0  ;;  %4971 = vtanh.f32 %v1767_v8 }
 0x246   : > { %v4950_v14 = vpop.eup %4949  ;;  %4320 = vst [vmem:[%s5876_s6 + $0x168] sm:$0xff] %v4948_v3  ;;  %v1769_v15 = vpop.f32.mrb[26].mxu1  ;;  %4185 = vmatmul.mubr.msk.bf16.gmra.mrb[48].mxu0 %vm284_vm2, %v4865_v61 }
 0x247   : > { %v976_v16 = vpop.f32.mrb[27].mxu0  ;;  %v4952_v19 = vpop.eup %4951  ;;  %3393 = vst [vmem:[%s5876_s6 + $0xa0] sm:$0xff] %v4950_v14  ;;  %4299 = vmatmul.mubr.msk.bf16.gmra.mrb[48].mxu1 %vm284_vm2, %v4866_v11  ;;  %2555 = vmatprep.mubr.bf16.mxu0 %v5101_v2 }
 0x248   : > { %v1770_v21 = vpop.f32.mrb[27].mxu1  ;;  %v4954_v12 = vpop.eup %4953  ;;  %4321 = vst [vmem:[%s5876_s6 + $0x170] sm:$0xff] %v4952_v19  ;;  %3312 = vmatprep.mubr.bf16.mxu1 %v5101_v2 }
 0x249   : > { %v4956_v20 = vpop.eup %4955  ;;  %3394 = vst [vmem:[%s5876_s6 + $0xa8] sm:$0xff] %v4954_v12 }
 0x24a   : > { %v4958_v22 = vpop.eup %4957  ;;  %4322 = vst [vmem:[%s5876_s6 + $0x178] sm:$0xff] %v4956_v20 }
 0x24b   : > { %v4960_v23 = vpop.eup %4959  ;;  %3395 = vst [vmem:[%s5876_s6 + $0xb0] sm:$0xff] %v4958_v22 }
 0x24c   : > { %v4962_v18 = vpop.eup %4961  ;;  %4323 = vst [vmem:[%s5876_s6 + $0x180] sm:$0xff] %v4960_v23 }
 0x24d   : > { %v4964_v25 = vpop.eup %4963  ;;  %3396 = vst [vmem:[%s5876_s6 + $0xb8] sm:$0xff] %v4962_v18 }
 0x24e   : > { %v4966_v27 = vpop.eup %4965  ;;  %4324 = vst [vmem:[%s5876_s6 + $0x188] sm:$0xff] %v4964_v25  ;;  %4186 = vmatmul.mubr.msk.bf16.gmra.mrb[52].mxu0 %vm284_vm2, %v4867_v24 }
 0x24f   : > { %v4968_v28 = vpop.eup %4967  ;;  %3397 = vst [vmem:[%s5876_s6 + $0xc0] sm:$0xf] %v4966_v27  ;;  %4300 = vmatmul.mubr.msk.bf16.gmra.mrb[52].mxu1 %vm284_vm2, %v4868_v26 }
 0x250   : > { %v4970_v2 = vpop.eup %4969  ;;  %4325 = vst [vmem:[%s5876_s6 + $0x190] sm:$0xf] %v4968_v28 }
 0x251   : > { %v4972_v29 = vpop.eup %4971  ;;  %3398 = vst [vmem:[%s5876_s6 + $0xc8] sm:$0xf] %v4970_v2 }
 0x252   : > { %4326 = vst [vmem:[%s5876_s6 + $0x198] sm:$0xf] %v4972_v29 }
 0x2f1   : > { %v2497_v32 = vpop.f32.mrb[28].mxu0 }
 0x2f2   : > { %4973 = vtanh.f32 %v2497_v32  ;;  %v3254_v33 = vpop.f32.mrb[28].mxu1  ;;  %v2499_v34 = vpop.f32.mrb[29].mxu0 }
 0x2f3   : > { %4975 = vtanh.f32 %v3254_v33  ;;  %v3256_v35 = vpop.f32.mrb[29].mxu1  ;;  %v2501_v36 = vpop.f32.mrb[30].mxu0 }
 0x2f4   : > { %4977 = vtanh.f32 %v2499_v34  ;;  %v3258_v30 = vpop.f32.mrb[30].mxu1  ;;  %v2503_v31 = vpop.f32.mrb[31].mxu0 }
 0x2f5   : > { %4979 = vtanh.f32 %v3256_v35  ;;  %v3260_v37 = vpop.f32.mrb[31].mxu1 }
 0x2f6   : > { %4981 = vtanh.f32 %v2501_v36 }
 0x2f7   : > { %4983 = vtanh.f32 %v3258_v30 }
 0x2f8   : > { %4985 = vtanh.f32 %v2503_v31 }
 0x2f9   : > { %4987 = vtanh.f32 %v3260_v37  ;;  %v2507_v38 = vpop.f32.mrb[32].mxu0 }
 0x2fa   : > { %4989 = vtanh.f32 %v2507_v38  ;;  %v3264_v39 = vpop.f32.mrb[32].mxu1  ;;  %v2509_v40 = vpop.f32.mrb[33].mxu0 }
 0x2fb   : > { %4991 = vtanh.f32 %v3264_v39  ;;  %v3266_v41 = vpop.f32.mrb[33].mxu1  ;;  %v2511_v42 = vpop.f32.mrb[34].mxu0 }
 0x2fc   : > { %v4974_v1 = vpop.eup %4973  ;;  %4993 = vtanh.f32 %v2509_v40  ;;  %v3268_v43 = vpop.f32.mrb[34].mxu1 }
 0x2fd   : > { %v2513_v10 = vpop.f32.mrb[35].mxu0  ;;  %v4976_v13 = vpop.eup %4975  ;;  %4327 = vst [vmem:[%s5876_s6 + $0x1a0] sm:$0xff] %v4974_v1  ;;  %4995 = vtanh.f32 %v3266_v41 }
 0x2fe   : > { %v3270_v44 = vpop.f32.mrb[35].mxu1  ;;  %v4978_v45 = vpop.eup %4977  ;;  %4353 = vst [vmem:[%s5876_s6 + $0x270] sm:$0xff] %v4976_v13  ;;  %4997 = vtanh.f32 %v2511_v42 }
 0x2ff   : > { %v4980_v46 = vpop.eup %4979  ;;  %4328 = vst [vmem:[%s5876_s6 + $0x1a8] sm:$0xff] %v4978_v45  ;;  %4999 = vtanh.f32 %v3268_v43 }
 0x300   : > { %v4982_v47 = vpop.eup %4981  ;;  %4354 = vst [vmem:[%s5876_s6 + $0x278] sm:$0xff] %v4980_v46  ;;  %5001 = vtanh.f32 %v2513_v10 }
 0x301   : > { %v4984_v48 = vpop.eup %4983  ;;  %4329 = vst [vmem:[%s5876_s6 + $0x1b0] sm:$0xff] %v4982_v47  ;;  %5003 = vtanh.f32 %v3270_v44  ;;  %v2517_v49 = vpop.f32.mrb[36].mxu0 }
 0x302   : > { %v4986_v17 = vpop.eup %4985  ;;  %4355 = vst [vmem:[%s5876_s6 + $0x280] sm:$0xff] %v4984_v48  ;;  %5005 = vtanh.f32 %v2517_v49  ;;  %v3274_v50 = vpop.f32.mrb[36].mxu1 }
 0x303   : > { %v2519_v51 = vpop.f32.mrb[37].mxu0  ;;  %v4988_v52 = vpop.eup %4987  ;;  %4330 = vst [vmem:[%s5876_s6 + $0x1b8] sm:$0xff] %v4986_v17  ;;  %5007 = vtanh.f32 %v3274_v50 }
 0x304   : > { %v3276_v53 = vpop.f32.mrb[37].mxu1  ;;  %v2521_v54 = vpop.f32.mrb[38].mxu0  ;;  %4356 = vst [vmem:[%s5876_s6 + $0x288] sm:$0xff] %v4988_v52  ;;  %5009 = vtanh.f32 %v2519_v51 }
 0x305   : > { %v4990_v55 = vpop.eup %4989  ;;  %v3278_v56 = vpop.f32.mrb[38].mxu1  ;;  %5011 = vtanh.f32 %v3276_v53 }
 0x306   : > { %v2523_v57 = vpop.f32.mrb[39].mxu0  ;;  %v4992_v58 = vpop.eup %4991  ;;  %4331 = vst [vmem:[%s5876_s6 + $0x1c0] sm:$0xff] %v4990_v55  ;;  %5013 = vtanh.f32 %v2521_v54 }
 0x307   : > { %v3280_v59 = vpop.f32.mrb[39].mxu1  ;;  %v4994_v60 = vpop.eup %4993  ;;  %4357 = vst [vmem:[%s5876_s6 + $0x290] sm:$0xff] %v4992_v58  ;;  %5015 = vtanh.f32 %v3278_v56 }
 0x308   : > { %v4996_v62 = vpop.eup %4995  ;;  %4332 = vst [vmem:[%s5876_s6 + $0x1c8] sm:$0xff] %v4994_v60  ;;  %5017 = vtanh.f32 %v2523_v57 }
 0x309   : > { %v4998_v63 = vpop.eup %4997  ;;  %4358 = vst [vmem:[%s5876_s6 + $0x298] sm:$0xff] %v4996_v62  ;;  %5019 = vtanh.f32 %v3280_v59  ;;  %v2527_v4 = vpop.f32.mrb[40].mxu0 }
 0x30a   : > { %v5000_v0 = vpop.eup %4999  ;;  %4333 = vst [vmem:[%s5876_s6 + $0x1d0] sm:$0xff] %v4998_v63  ;;  %5021 = vtanh.f32 %v2527_v4  ;;  %v3284_v6 = vpop.f32.mrb[40].mxu1 }
 0x30b   : > { %v5002_v5 = vpop.eup %5001  ;;  %4359 = vst [vmem:[%s5876_s6 + $0x2a0] sm:$0xff] %v5000_v0  ;;  %v2529_v7 = vpop.f32.mrb[41].mxu0  ;;  %5023 = vtanh.f32 %v3284_v6 }
 0x30c   : > { %v5004_v61 = vpop.eup %5003  ;;  %4334 = vst [vmem:[%s5876_s6 + $0x1d8] sm:$0xff] %v5002_v5  ;;  %v3286_v3 = vpop.f32.mrb[41].mxu1  ;;  %5025 = vtanh.f32 %v2529_v7 }
 0x30d   : > { %v2531_v8 = vpop.f32.mrb[42].mxu0  ;;  %v5006_v9 = vpop.eup %5005  ;;  %4360 = vst [vmem:[%s5876_s6 + $0x2a8] sm:$0xff] %v5004_v61  ;;  %5027 = vtanh.f32 %v3286_v3 }
 0x30e   : > { %v3288_v11 = vpop.f32.mrb[42].mxu1  ;;  %v2533_v14 = vpop.f32.mrb[43].mxu0  ;;  %4335 = vst [vmem:[%s5876_s6 + $0x1e0] sm:$0xff] %v5006_v9  ;;  %5029 = vtanh.f32 %v2531_v8  ;;  %v3580_v8 = vld [vmem:[%s5876_s6] sm:$0xff] (%p5151_p4)  ;;  %v3582_v9 = vld [vmem:[%s5876_s6 + $0x8] sm:$0xff] (%p5151_p4) }
 0x30f   : > { %v5008_v15 = vpop.eup %5007  ;;  %v3290_v16 = vpop.f32.mrb[43].mxu1  ;;  %5031 = vtanh.f32 %v3288_v11  ;;  %v3584_v11 = vld [vmem:[%s5876_s6 + $0x10] sm:$0xff] (%p5151_p4)  ;;  %3581 = vst [vmem:[%s6053_s18] sm:$0xff] (%p5151_p4), %v3580_v8  ;;  %3583 = vst [vmem:[%s6053_s18 + $0x8] sm:$0xff] (%p5151_p4), %v3582_v9 }
 0x310   : > { %v5010_v19 = vpop.eup %5009  ;;  %4361 = vst [vmem:[%s5876_s6 + $0x2b0] sm:$0xff] %v5008_v15  ;;  %5033 = vtanh.f32 %v2533_v14  ;;  %v3586_v14 = vld [vmem:[%s5876_s6 + $0x18] sm:$0xff] (%p5151_p4)  ;;  %v3588_v15 = vld [vmem:[%s5876_s6 + $0x20] sm:$0xff] (%p5151_p4)  ;;  %3585 = vst [vmem:[%s6053_s18 + $0x20] sm:$0xff] (%p5151_p4), %v3584_v11 }
 0x311   : > { %v5012_v21 = vpop.eup %5011  ;;  %4336 = vst [vmem:[%s5876_s6 + $0x1e8] sm:$0xff] %v5010_v19  ;;  %5035 = vtanh.f32 %v3290_v16  ;;  %v2537_v22 = vpop.f32.mrb[44].mxu0  ;;  %v3590_v16 = vld [vmem:[%s5876_s6 + $0x28] sm:$0xff] (%p5151_p4)  ;;  %3587 = vst [vmem:[%s6053_s18 + $0x28] sm:$0xff] (%p5151_p4), %v3586_v14  ;;  %v3592_v19 = vld [vmem:[%s5876_s6 + $0x30] sm:$0xff] (%p5151_p4) }
 0x312   : > { %v5014_v12 = vpop.eup %5013  ;;  %4362 = vst [vmem:[%s5876_s6 + $0x2b8] sm:$0xff] %v5012_v21  ;;  %5037 = vtanh.f32 %v2537_v22  ;;  %v3294_v18 = vpop.f32.mrb[44].mxu1  ;;  %3589 = vst [vmem:[%s6053_s18 + $0x40] sm:$0xff] (%p5151_p4), %v3588_v15  ;;  %v3594_v21 = vld [vmem:[%s5876_s6 + $0x38] sm:$0xff] (%p5151_p4)  ;;  %v3600_v22 = vld [vmem:[%s5876_s6 + $0x50] sm:$0xff] (%p5151_p4) }
 0x313   : > { %v5016_v20 = vpop.eup %5015  ;;  %4337 = vst [vmem:[%s5876_s6 + $0x1f0] sm:$0xff] %v5014_v12  ;;  %v2539_v24 = vpop.f32.mrb[45].mxu0  ;;  %5039 = vtanh.f32 %v3294_v18  ;;  %3591 = vst [vmem:[%s6053_s18 + $0x48] sm:$0xff] (%p5151_p4), %v3590_v16  ;;  %v3596_v12 = vld [vmem:[%s5876_s6 + $0x40] sm:$0xff] (%p5151_p4) }
 0x314   : > { %v5018_v23 = vpop.eup %5017  ;;  %4363 = vst [vmem:[%s5876_s6 + $0x2c0] sm:$0xff] %v5016_v20  ;;  %v3296_v26 = vpop.f32.mrb[45].mxu1  ;;  %5041 = vtanh.f32 %v2539_v24  ;;  %3593 = vst [vmem:[%s6053_s18 + $0x60] sm:$0xff] (%p5151_p4), %v3592_v19  ;;  %v3598_v20 = vld [vmem:[%s5876_s6 + $0x48] sm:$0xff] (%p5151_p4)  ;;  %v3604_v18 = vld [vmem:[%s5876_s6 + $0x60] sm:$0xff] (%p5151_p4) }
 0x315   : > { %v5020_v25 = vpop.eup %5019  ;;  %4338 = vst [vmem:[%s5876_s6 + $0x1f8] sm:$0xff] %v5018_v23  ;;  %v2541_v27 = vpop.f32.mrb[46].mxu0  ;;  %5043 = vtanh.f32 %v3296_v26  ;;  %3595 = vst [vmem:[%s6053_s18 + $0x68] sm:$0xff] (%p5151_p4), %v3594_v21  ;;  %v3602_v23 = vld [vmem:[%s5876_s6 + $0x58] sm:$0xff] (%p5151_p4)  ;;  %v3606_v24 = vld [vmem:[%s5876_s6 + $0x68] sm:$0xff] (%p5151_p4) }
 0x316   : > { %v5022_v28 = vpop.eup %5021  ;;  %4364 = vst [vmem:[%s5876_s6 + $0x2c8] sm:$0xff] %v5020_v25  ;;  %v3298_v2 = vpop.f32.mrb[46].mxu1  ;;  %5045 = vtanh.f32 %v2541_v27  ;;  %3597 = vst [vmem:[%s6053_s18 + $0x80] sm:$0xff] (%p5151_p4), %v3596_v12  ;;  %v3608_v25 = vld [vmem:[%s5876_s6 + $0x70] sm:$0xff] (%p5151_p4)  ;;  %v3610_v26 = vld [vmem:[%s5876_s6 + $0x78] sm:$0xff] (%p5151_p4) }
 0x317   : > { %v2543_v29 = vpop.f32.mrb[47].mxu0  ;;  %v5024_v32 = vpop.eup %5023  ;;  %4339 = vst [vmem:[%s5876_s6 + $0x200] sm:$0xff] %v5022_v28  ;;  %5047 = vtanh.f32 %v3298_v2  ;;  %3599 = vst [vmem:[%s6053_s18 + $0x88] sm:$0xff] (%p5151_p4), %v3598_v20  ;;  %v3612_v27 = vld [vmem:[%s5876_s6 + $0x80] sm:$0xff] (%p5151_p4)  ;;  %v3614_v28 = vld [vmem:[%s5876_s6 + $0x88] sm:$0xff] (%p5151_p4) }
 0x318   : > { %v3300_v33 = vpop.f32.mrb[47].mxu1  ;;  %v5026_v34 = vpop.eup %5025  ;;  %4365 = vst [vmem:[%s5876_s6 + $0x2d0] sm:$0xff] %v5024_v32  ;;  %5049 = vtanh.f32 %v2543_v29  ;;  %3601 = vst [vmem:[%s6053_s18 + $0xa0] sm:$0xff] (%p5151_p4), %v3600_v22  ;;  %v3616_v2 = vld [vmem:[%s5876_s6 + $0x90] sm:$0xff] (%p5151_p4)  ;;  %v3618_v29 = vld [vmem:[%s5876_s6 + $0x98] sm:$0xff] (%p5151_p4) }
 0x319   : > { %v5028_v35 = vpop.eup %5027  ;;  %4340 = vst [vmem:[%s5876_s6 + $0x208] sm:$0xff] %v5026_v34  ;;  %5051 = vtanh.f32 %v3300_v33  ;;  %v2547_v31 = vpop.f32.mrb[48].mxu0  ;;  %3603 = vst [vmem:[%s6053_s18 + $0xa8] sm:$0xff] (%p5151_p4), %v3602_v23  ;;  %v3620_v32 = vld [vmem:[%s5876_s6 + $0xa0] sm:$0xff] (%p5151_p4)  ;;  %v3622_v33 = vld [vmem:[%s5876_s6 + $0xa8] sm:$0xff] (%p5151_p4) }
 0x31a   : > { %v5030_v36 = vpop.eup %5029  ;;  %4366 = vst [vmem:[%s5876_s6 + $0x2d8] sm:$0xff] %v5028_v35  ;;  %5053 = vtanh.f32 %v2547_v31  ;;  %v3304_v38 = vpop.f32.mrb[48].mxu1  ;;  %3605 = vst [vmem:[%s6053_s18 + $0xc0] sm:$0xff] (%p5151_p4), %v3604_v18  ;;  %v3624_v34 = vld [vmem:[%s5876_s6 + $0xb0] sm:$0xff] (%p5151_p4)  ;;  %v3626_v35 = vld [vmem:[%s5876_s6 + $0xb8] sm:$0xff] (%p5151_p4) }
 0x31b   : > { %v5032_v30 = vpop.eup %5031  ;;  %4341 = vst [vmem:[%s5876_s6 + $0x210] sm:$0xff] %v5030_v36  ;;  %v2549_v39 = vpop.f32.mrb[49].mxu0  ;;  %5055 = vtanh.f32 %v3304_v38  ;;  %3607 = vst [vmem:[%s6053_s18 + $0xc8] sm:$0xff] (%p5151_p4), %v3606_v24  ;;  %v3628_v36 = vld [vmem:[%s5876_s6 + $0xc0] sm:$0xff] (%p5151_p4)  ;;  %v3632_v31 = vld [vmem:[%s5876_s6 + $0xd0] sm:$0xff] (%p5151_p4) }
 0x31c   : > { %v5034_v37 = vpop.eup %5033  ;;  %4367 = vst [vmem:[%s5876_s6 + $0x2e0] sm:$0xff] %v5032_v30  ;;  %v3306_v41 = vpop.f32.mrb[49].mxu1  ;;  %5057 = vtanh.f32 %v2549_v39  ;;  %3609 = vst [vmem:[%s6053_s18 + $0xe0] sm:$0xff] (%p5151_p4), %v3608_v25  ;;  %v3630_v30 = vld [vmem:[%s5876_s6 + $0xc8] sm:$0xff] (%p5151_p4)  ;;  %v3636_v38 = vld [vmem:[%s5876_s6 + $0xe0] sm:$0xff] (%p5151_p4) }
 0x31d   : > { %v5036_v40 = vpop.eup %5035  ;;  %4342 = vst [vmem:[%s5876_s6 + $0x218] sm:$0xff] %v5034_v37  ;;  %v2551_v42 = vpop.f32.mrb[50].mxu0  ;;  %5059 = vtanh.f32 %v3306_v41  ;;  %3611 = vst [vmem:[%s6053_s18 + $0xe8] sm:$0xff] (%p5151_p4), %v3610_v26  ;;  %v3634_v37 = vld [vmem:[%s5876_s6 + $0xd8] sm:$0xff] (%p5151_p4)  ;;  %v3638_v39 = vld [vmem:[%s5876_s6 + $0xe8] sm:$0xff] (%p5151_p4) }
 0x31e   : > { %v5038_v1 = vpop.eup %5037  ;;  %4368 = vst [vmem:[%s5876_s6 + $0x2e8] sm:$0xff] %v5036_v40  ;;  %v3308_v43 = vpop.f32.mrb[50].mxu1  ;;  %5061 = vtanh.f32 %v2551_v42  ;;  %3613 = vst [vmem:[%s6053_s18 + $0x100] sm:$0xff] (%p5151_p4), %v3612_v27  ;;  %v3640_v40 = vld [vmem:[%s5876_s6 + $0xf0] sm:$0xff] (%p5151_p4)  ;;  %v3642_v41 = vld [vmem:[%s5876_s6 + $0xf8] sm:$0xff] (%p5151_p4) }
 0x31f   : > { %v2553_v10 = vpop.f32.mrb[51].mxu0  ;;  %v5040_v13 = vpop.eup %5039  ;;  %4343 = vst [vmem:[%s5876_s6 + $0x220] sm:$0xff] %v5038_v1  ;;  %5063 = vtanh.f32 %v3308_v43  ;;  %3615 = vst [vmem:[%s6053_s18 + $0x108] sm:$0xff] (%p5151_p4), %v3614_v28  ;;  %v3644_v42 = vld [vmem:[%s5876_s6 + $0x100] sm:$0xff] (%p5151_p4)  ;;  %v3646_v1 = vld [vmem:[%s5876_s6 + $0x108] sm:$0xff] (%p5151_p4) }
 0x320   : > { %v3310_v44 = vpop.f32.mrb[51].mxu1  ;;  %v5042_v45 = vpop.eup %5041  ;;  %4369 = vst [vmem:[%s5876_s6 + $0x2f0] sm:$0xff] %v5040_v13  ;;  %5065 = vtanh.f32 %v2553_v10  ;;  %3617 = vst [vmem:[%s6053_s18 + $0x120] sm:$0xff] (%p5151_p4), %v3616_v2  ;;  %v3648_v43 = vld [vmem:[%s5876_s6 + $0x110] sm:$0xff] (%p5151_p4)  ;;  %v3650_v10 = vld [vmem:[%s5876_s6 + $0x118] sm:$0xff] (%p5151_p4) }
 0x321   : > { %v5044_v46 = vpop.eup %5043  ;;  %4344 = vst [vmem:[%s5876_s6 + $0x228] sm:$0xff] %v5042_v45  ;;  %5067 = vtanh.f32 %v3310_v44  ;;  %v2557_v49 = vpop.f32.mrb[52].mxu0  ;;  %3619 = vst [vmem:[%s6053_s18 + $0x128] sm:$0xff] (%p5151_p4), %v3618_v29  ;;  %v3652_v13 = vld [vmem:[%s5876_s6 + $0x120] sm:$0xff] (%p5151_p4)  ;;  %v3654_v44 = vld [vmem:[%s5876_s6 + $0x128] sm:$0xff] (%p5151_p4) }
 0x322   : > { %v5046_v47 = vpop.eup %5045  ;;  %4370 = vst [vmem:[%s5876_s6 + $0x2f8] sm:$0xff] %v5044_v46  ;;  %5069 = vtanh.f32 %v2557_v49  ;;  %v3314_v50 = vpop.f32.mrb[52].mxu1  ;;  %3621 = vst [vmem:[%s6053_s18 + $0x140] sm:$0xff] (%p5151_p4), %v3620_v32  ;;  %v3656_v45 = vld [vmem:[%s5876_s6 + $0x130] sm:$0xff] (%p5151_p4)  ;;  %v3658_v46 = vld [vmem:[%s5876_s6 + $0x138] sm:$0xff] (%p5151_p4) }
 0x323   : > { %v5048_v48 = vpop.eup %5047  ;;  %4345 = vst [vmem:[%s5876_s6 + $0x230] sm:$0xff] %v5046_v47  ;;  %v2559_v51 = vpop.f32.mrb[53].mxu0  ;;  %5071 = vtanh.f32 %v3314_v50  ;;  %3623 = vst [vmem:[%s6053_s18 + $0x148] sm:$0xff] (%p5151_p4), %v3622_v33  ;;  %v3660_v47 = vld [vmem:[%s5876_s6 + $0x140] sm:$0xff] (%p5151_p4)  ;;  %v3664_v49 = vld [vmem:[%s5876_s6 + $0x150] sm:$0xff] (%p5151_p4) }
 0x324   : > { %v5050_v17 = vpop.eup %5049  ;;  %4371 = vst [vmem:[%s5876_s6 + $0x300] sm:$0xff] %v5048_v48  ;;  %v3316_v53 = vpop.f32.mrb[53].mxu1  ;;  %5073 = vtanh.f32 %v2559_v51  ;;  %3625 = vst [vmem:[%s6053_s18 + $0x160] sm:$0xff] (%p5151_p4), %v3624_v34  ;;  %v3662_v48 = vld [vmem:[%s5876_s6 + $0x148] sm:$0xff] (%p5151_p4)  ;;  %v3668_v50 = vld [vmem:[%s5876_s6 + $0x160] sm:$0xff] (%p5151_p4) }
 0x325   : > { %v5052_v52 = vpop.eup %5051  ;;  %4346 = vst [vmem:[%s5876_s6 + $0x238] sm:$0xff] %v5050_v17  ;;  %v2561_v54 = vpop.f32.mrb[54].mxu0  ;;  %5075 = vtanh.f32 %v3316_v53  ;;  %3627 = vst [vmem:[%s6053_s18 + $0x168] sm:$0xff] (%p5151_p4), %v3626_v35  ;;  %v3666_v17 = vld [vmem:[%s5876_s6 + $0x158] sm:$0xff] (%p5151_p4)  ;;  %v3670_v51 = vld [vmem:[%s5876_s6 + $0x168] sm:$0xff] (%p5151_p4) }
 0x326   : > { %v5054_v55 = vpop.eup %5053  ;;  %4372 = vst [vmem:[%s5876_s6 + $0x308] sm:$0xff] %v5052_v52  ;;  %v3318_v56 = vpop.f32.mrb[54].mxu1  ;;  %3629 = vst [vmem:[%s6053_s18 + $0x180] sm:$0xff] (%p5151_p4), %v3628_v36  ;;  %v3672_v52 = vld [vmem:[%s5876_s6 + $0x170] sm:$0xff] (%p5151_p4)  ;;  %v3674_v53 = vld [vmem:[%s5876_s6 + $0x178] sm:$0xff] (%p5151_p4) }
 0x327   : > { %v2562_v57 = vpop.f32.mrb[55].mxu0  ;;  %v5056_v58 = vpop.eup %5055  ;;  %4347 = vst [vmem:[%s5876_s6 + $0x240] sm:$0xff] %v5054_v55  ;;  %3631 = vst [vmem:[%s6053_s18 + $0x188] sm:$0xff] (%p5151_p4), %v3630_v30  ;;  %v3676_v54 = vld [vmem:[%s5876_s6 + $0x180] sm:$0xff] (%p5151_p4)  ;;  %v3678_v55 = vld [vmem:[%s5876_s6 + $0x188] sm:$0xff] (%p5151_p4) }
 0x328   : > { %v3319_v59 = vpop.f32.mrb[55].mxu1  ;;  %v5058_v60 = vpop.eup %5057  ;;  %4373 = vst [vmem:[%s5876_s6 + $0x310] sm:$0xff] %v5056_v58  ;;  %3633 = vst [vmem:[%s6053_s18 + $0x1a0] sm:$0xff] (%p5151_p4), %v3632_v31  ;;  %v3680_v56 = vld [vmem:[%s5876_s6 + $0x190] sm:$0xff] (%p5151_p4)  ;;  %v3682_v57 = vld [vmem:[%s5876_s6 + $0x198] sm:$0xff] (%p5151_p4) }
 0x329   : > { %v5060_v62 = vpop.eup %5059  ;;  %4348 = vst [vmem:[%s5876_s6 + $0x248] sm:$0xff] %v5058_v60  ;;  %3635 = vst [vmem:[%s6053_s18 + $0x1a8] sm:$0xff] (%p5151_p4), %v3634_v37  ;;  %v3684_v58 = vld [vmem:[%s5876_s6 + $0x1a0] sm:$0xff] (%p5151_p4)  ;;  %v3686_v59 = vld [vmem:[%s5876_s6 + $0x1a8] sm:$0xff] (%p5151_p4) }
 0x32a   : > { %v5062_v63 = vpop.eup %5061  ;;  %4374 = vst [vmem:[%s5876_s6 + $0x318] sm:$0xff] %v5060_v62  ;;  %3637 = vst [vmem:[%s6053_s18 + $0x1c0] sm:$0xff] (%p5151_p4), %v3636_v38  ;;  %v3688_v60 = vld [vmem:[%s5876_s6 + $0x1b0] sm:$0xff] (%p5151_p4)  ;;  %v3690_v62 = vld [vmem:[%s5876_s6 + $0x1b8] sm:$0xff] (%p5151_p4) }
 0x32b   : > { %v5064_v0 = vpop.eup %5063  ;;  %4349 = vst [vmem:[%s5876_s6 + $0x250] sm:$0xff] %v5062_v63  ;;  %3639 = vst [vmem:[%s6053_s18 + $0x1c8] sm:$0xff] (%p5151_p4), %v3638_v39  ;;  %v3692_v63 = vld [vmem:[%s5876_s6 + $0x1c0] sm:$0xff] (%p5151_p4)  ;;  %v3710_v9 = vld [vmem:[%s5876_s6 + $0x208] sm:$0xff] (%p5151_p4) }
 0x32c   : > { %v5066_v4 = vpop.eup %5065  ;;  %4375 = vst [vmem:[%s5876_s6 + $0x320] sm:$0xff] %v5064_v0  ;;  %3564 = sbr.rel (!%p5151_p4) target bundleno = 853 (0x355), region = 32  ;;  %3641 = vst [vmem:[%s6053_s18 + $0x1e0] sm:$0xff] (%p5151_p4), %v3640_v40  ;;  %v3694_v0 = vld [vmem:[%s5876_s6 + $0x1c8] sm:$0xff] (%p5151_p4)  ;;  %v3708_v8 = vld [vmem:[%s5876_s6 + $0x200] sm:$0xff] (%p5151_p4) }
 0x32d   : > { %v5068_v5 = vpop.eup %5067  ;;  %4350 = vst [vmem:[%s5876_s6 + $0x258] sm:$0xff] %v5066_v4  ;;  %3643 = vst [vmem:[%s6053_s18 + $0x1e8] sm:$0xff] (%p5151_p4), %v3642_v41  ;;  %v3696_v4 = vld [vmem:[%s5876_s6 + $0x1d0] sm:$0xff] (%p5151_p4)  ;;  %v3714_v14 = vld [vmem:[%s5876_s6 + $0x218] sm:$0xff] (%p5151_p4) }
 0x32e   : > { %v5070_v6 = vpop.eup %5069  ;;  %4376 = vst [vmem:[%s5876_s6 + $0x328] sm:$0xff] %v5068_v5  ;;  %3645 = vst [vmem:[%s6053_s18 + $0x200] sm:$0xff] (%p5151_p4), %v3644_v42  ;;  %v3698_v5 = vld [vmem:[%s5876_s6 + $0x1d8] sm:$0xff] (%p5151_p4)  ;;  %v3712_v11 = vld [vmem:[%s5876_s6 + $0x210] sm:$0xff] (%p5151_p4) }
 0x32f   : > { %v5072_v7 = vpop.eup %5071  ;;  %4351 = vst [vmem:[%s5876_s6 + $0x260] sm:$0xf] %v5070_v6  ;;  %3647 = vst [vmem:[%s6053_s18 + $0x208] sm:$0xff] (%p5151_p4), %v3646_v1  ;;  %v3700_v6 = vld [vmem:[%s5876_s6 + $0x1e0] sm:$0xff] (%p5151_p4)  ;;  %v3718_v16 = vld [vmem:[%s5876_s6 + $0x228] sm:$0xff] (%p5151_p4) }
 0x330   : > { %v5074_v61 = vpop.eup %5073  ;;  %4377 = vst [vmem:[%s5876_s6 + $0x330] sm:$0xf] %v5072_v7  ;;  %3649 = vst [vmem:[%s6053_s18 + $0x220] sm:$0xff] (%p5151_p4), %v3648_v43  ;;  %v3702_v7 = vld [vmem:[%s5876_s6 + $0x1e8] sm:$0xff] (%p5151_p4)  ;;  %v3716_v15 = vld [vmem:[%s5876_s6 + $0x220] sm:$0xff] (%p5151_p4) }
 0x331   : > { %v5076_v3 = vpop.eup %5075  ;;  %4352 = vst [vmem:[%s5876_s6 + $0x268] sm:$0xf] %v5074_v61  ;;  %3651 = vst [vmem:[%s6053_s18 + $0x228] sm:$0xff] (%p5151_p4), %v3650_v10  ;;  %v3704_v61 = vld [vmem:[%s5876_s6 + $0x1f0] sm:$0xff] (%p5151_p4)  ;;  %v3722_v21 = vld [vmem:[%s5876_s6 + $0x238] sm:$0xff] (%p5151_p4) }
 0x332   : > { %4378 = vst [vmem:[%s5876_s6 + $0x338] sm:$0xf] %v5076_v3  ;;  %3653 = vst [vmem:[%s6053_s18 + $0x240] sm:$0xff] (%p5151_p4), %v3652_v13  ;;  %v3706_v3 = vld [vmem:[%s5876_s6 + $0x1f8] sm:$0xff] (%p5151_p4)  ;;  %v3720_v19 = vld [vmem:[%s5876_s6 + $0x230] sm:$0xff] (%p5151_p4) }
 0x333   : > { %3655 = vst [vmem:[%s6053_s18 + $0x248] sm:$0xff] %v3654_v44  ;;  %3657 = vst [vmem:[%s6053_s18 + $0x260] sm:$0xff] %v3656_v45  ;;  %v3724_v12 = vld [vmem:[%s5876_s6 + $0x240] sm:$0xff]  ;;  %v3726_v20 = vld [vmem:[%s5876_s6 + $0x248] sm:$0xff] }
 0x334   : > { %3659 = vst [vmem:[%s6053_s18 + $0x268] sm:$0xff] %v3658_v46  ;;  %3661 = vst [vmem:[%s6053_s18 + $0x280] sm:$0xff] %v3660_v47  ;;  %v3728_v22 = vld [vmem:[%s5876_s6 + $0x250] sm:$0xff]  ;;  %v3730_v23 = vld [vmem:[%s5876_s6 + $0x258] sm:$0xff] }
 0x335   : > { %3663 = vst [vmem:[%s6053_s18 + $0x288] sm:$0xff] %v3662_v48  ;;  %3665 = vst [vmem:[%s6053_s18 + $0x2a0] sm:$0xff] %v3664_v49  ;;  %v3736_v25 = vld [vmem:[%s5876_s6 + $0x270] sm:$0xff]  ;;  %v3738_v26 = vld [vmem:[%s5876_s6 + $0x278] sm:$0xff] }
 0x336   : > { %3667 = vst [vmem:[%s6053_s18 + $0x2a8] sm:$0xff] %v3666_v17  ;;  %3669 = vst [vmem:[%s6053_s18 + $0x2c0] sm:$0xff] %v3668_v50  ;;  %v3732_v18 = vld [vmem:[%s5876_s6 + $0x260] sm:$0xff]  ;;  %v3742_v28 = vld [vmem:[%s5876_s6 + $0x288] sm:$0xff] }
 0x337   : > { %3671 = vst [vmem:[%s6053_s18 + $0x2c8] sm:$0xff] %v3670_v51  ;;  %3673 = vst [vmem:[%s6053_s18 + $0x2e0] sm:$0xff] %v3672_v52  ;;  %v3740_v27 = vld [vmem:[%s5876_s6 + $0x280] sm:$0xff]  ;;  %v3744_v2 = vld [vmem:[%s5876_s6 + $0x290] sm:$0xff] }
 0x338   : > { %3675 = vst [vmem:[%s6053_s18 + $0x2e8] sm:$0xff] %v3674_v53  ;;  %3677 = vst [vmem:[%s6053_s18 + $0x300] sm:$0xff] %v3676_v54  ;;  %v3734_v24 = vld [vmem:[%s5876_s6 + $0x268] sm:$0xff]  ;;  %v3746_v29 = vld [vmem:[%s5876_s6 + $0x298] sm:$0xff] }
 0x339   : > { %3679 = vst [vmem:[%s6053_s18 + $0x308] sm:$0xff] %v3678_v55  ;;  %3681 = vst [vmem:[%s6053_s18 + $0x320] sm:$0xff] %v3680_v56  ;;  %v3748_v32 = vld [vmem:[%s5876_s6 + $0x2a0] sm:$0xff]  ;;  %v3750_v33 = vld [vmem:[%s5876_s6 + $0x2a8] sm:$0xff] }
 0x33a   : > { %3683 = vst [vmem:[%s6053_s18 + $0x328] sm:$0xff] %v3682_v57  ;;  %3685 = vst [vmem:[%s6053_s18 + $0x340] sm:$0xff] %v3684_v58  ;;  %v3752_v34 = vld [vmem:[%s5876_s6 + $0x2b0] sm:$0xff]  ;;  %v3754_v35 = vld [vmem:[%s5876_s6 + $0x2b8] sm:$0xff] }
 0x33b   : > { %3687 = vst [vmem:[%s6053_s18 + $0x348] sm:$0xff] %v3686_v59  ;;  %3689 = vst [vmem:[%s6053_s18 + $0x360] sm:$0xff] %v3688_v60  ;;  %v3756_v36 = vld [vmem:[%s5876_s6 + $0x2c0] sm:$0xff]  ;;  %v3758_v30 = vld [vmem:[%s5876_s6 + $0x2c8] sm:$0xff] }
 0x33c   : > { %3691 = vst [vmem:[%s6053_s18 + $0x368] sm:$0xff] %v3690_v62  ;;  %3693 = vst [vmem:[%s6053_s18 + $0x380] sm:$0xff] %v3692_v63  ;;  %v3760_v31 = vld [vmem:[%s5876_s6 + $0x2d0] sm:$0xff]  ;;  %v3762_v37 = vld [vmem:[%s5876_s6 + $0x2d8] sm:$0xff] }
 0x33d   : > { %3695 = vst [vmem:[%s6053_s18 + $0x388] sm:$0xff] %v3694_v0  ;;  %3697 = vst [vmem:[%s6053_s18 + $0x3a0] sm:$0xff] %v3696_v4  ;;  %v3764_v38 = vld [vmem:[%s5876_s6 + $0x2e0] sm:$0xff]  ;;  %v3766_v39 = vld [vmem:[%s5876_s6 + $0x2e8] sm:$0xff] }
 0x33e   : > { %3699 = vst [vmem:[%s6053_s18 + $0x3a8] sm:$0xff] %v3698_v5  ;;  %3701 = vst [vmem:[%s6053_s18 + $0x3c0] sm:$0xff] %v3700_v6  ;;  %v3768_v40 = vld [vmem:[%s5876_s6 + $0x2f0] sm:$0xff]  ;;  %v3770_v41 = vld [vmem:[%s5876_s6 + $0x2f8] sm:$0xff] }
 0x33f   : > { %3703 = vst [vmem:[%s6053_s18 + $0x3c8] sm:$0xff] %v3702_v7  ;;  %3705 = vst [vmem:[%s6053_s18 + $0x3e0] sm:$0xff] %v3704_v61  ;;  %v3772_v42 = vld [vmem:[%s5876_s6 + $0x300] sm:$0xff]  ;;  %v3774_v1 = vld [vmem:[%s5876_s6 + $0x308] sm:$0xff] }
 0x340   : > { %3707 = vst [vmem:[%s6053_s18 + $0x3e8] sm:$0xff] %v3706_v3  ;;  %3709 = vst [vmem:[%s6053_s18 + $0x400] sm:$0xff] %v3708_v8  ;;  %v3776_v43 = vld [vmem:[%s5876_s6 + $0x310] sm:$0xff]  ;;  %v3778_v10 = vld [vmem:[%s5876_s6 + $0x318] sm:$0xff] }
 0x341   : > { %3711 = vst [vmem:[%s6053_s18 + $0x408] sm:$0xff] %v3710_v9  ;;  %3713 = vst [vmem:[%s6053_s18 + $0x420] sm:$0xff] %v3712_v11  ;;  %v3780_v13 = vld [vmem:[%s5876_s6 + $0x320] sm:$0xff]  ;;  %v3782_v44 = vld [vmem:[%s5876_s6 + $0x328] sm:$0xff] }
 0x342   : > { %3715 = vst [vmem:[%s6053_s18 + $0x428] sm:$0xff] %v3714_v14  ;;  %3717 = vst [vmem:[%s6053_s18 + $0x440] sm:$0xff] %v3716_v15  ;;  %v3784_v45 = vld [vmem:[%s5876_s6 + $0x330] sm:$0xff]  ;;  %v3786_v46 = vld [vmem:[%s5876_s6 + $0x338] sm:$0xff] }
 0x343   : > { %3719 = vst [vmem:[%s6053_s18 + $0x448] sm:$0xff] %v3718_v16  ;;  %3721 = vst [vmem:[%s6053_s18 + $0x460] sm:$0xff] %v3720_v19 }
 0x344   : > { %3723 = vst [vmem:[%s6053_s18 + $0x468] sm:$0xff] %v3722_v21  ;;  %3725 = vst [vmem:[%s6053_s18 + $0x480] sm:$0xff] %v3724_v12 }
 0x345   : > { %3727 = vst [vmem:[%s6053_s18 + $0x488] sm:$0xff] %v3726_v20  ;;  %3729 = vst [vmem:[%s6053_s18 + $0x4a0] sm:$0xff] %v3728_v22 }
 0x346   : > { %3731 = vst [vmem:[%s6053_s18 + $0x4a8] sm:$0xff] %v3730_v23  ;;  %3733 = vst [vmem:[%s6053_s18 + $0x4c0] sm:$0xff] %v3732_v18 }
 0x347   : > { %3735 = vst [vmem:[%s6053_s18 + $0x4c8] sm:$0xff] %v3734_v24  ;;  %3737 = vst [vmem:[%s6053_s18 + $0x4e0] sm:$0xff] %v3736_v25 }
 0x348   : > { %3739 = vst [vmem:[%s6053_s18 + $0x4e8] sm:$0xff] %v3738_v26  ;;  %3741 = vst [vmem:[%s6053_s18 + $0x500] sm:$0xff] %v3740_v27 }
 0x349   : > { %3743 = vst [vmem:[%s6053_s18 + $0x508] sm:$0xff] %v3742_v28  ;;  %3745 = vst [vmem:[%s6053_s18 + $0x520] sm:$0xff] %v3744_v2 }
 0x34a   : > { %3747 = vst [vmem:[%s6053_s18 + $0x528] sm:$0xff] %v3746_v29  ;;  %3749 = vst [vmem:[%s6053_s18 + $0x540] sm:$0xff] %v3748_v32 }
 0x34b   : > { %3751 = vst [vmem:[%s6053_s18 + $0x548] sm:$0xff] %v3750_v33  ;;  %3753 = vst [vmem:[%s6053_s18 + $0x560] sm:$0xff] %v3752_v34 }
 0x34c   : > { %3755 = vst [vmem:[%s6053_s18 + $0x568] sm:$0xff] %v3754_v35  ;;  %3757 = vst [vmem:[%s6053_s18 + $0x580] sm:$0xff] %v3756_v36 }
 0x34d   : > { %3759 = vst [vmem:[%s6053_s18 + $0x588] sm:$0xff] %v3758_v30  ;;  %3761 = vst [vmem:[%s6053_s18 + $0x5a0] sm:$0xff] %v3760_v31 }
 0x34e   : > { %3763 = vst [vmem:[%s6053_s18 + $0x5a8] sm:$0xff] %v3762_v37  ;;  %3765 = vst [vmem:[%s6053_s18 + $0x5c0] sm:$0xff] %v3764_v38 }
 0x34f   : > { %3767 = vst [vmem:[%s6053_s18 + $0x5c8] sm:$0xff] %v3766_v39  ;;  %3769 = vst [vmem:[%s6053_s18 + $0x5e0] sm:$0xff] %v3768_v40 }
 0x350   : > { %3771 = vst [vmem:[%s6053_s18 + $0x5e8] sm:$0xff] %v3770_v41  ;;  %3773 = vst [vmem:[%s6053_s18 + $0x600] sm:$0xff] %v3772_v42 }
 0x351   : > { %3775 = vst [vmem:[%s6053_s18 + $0x608] sm:$0xff] %v3774_v1  ;;  %3777 = vst [vmem:[%s6053_s18 + $0x620] sm:$0xff] %v3776_v43 }
 0x352   : > { %3779 = vst [vmem:[%s6053_s18 + $0x628] sm:$0xff] %v3778_v10  ;;  %3781 = vst [vmem:[%s6053_s18 + $0x640] sm:$0xff] %v3780_v13 }
 0x353   : > { %3783 = vst [vmem:[%s6053_s18 + $0x648] sm:$0xff] %v3782_v44  ;;  %3785 = vst [vmem:[%s6053_s18 + $0x660] sm:$0xff] %v3784_v45 }
 0x354   : > { %3787 = vst [vmem:[%s6053_s18 + $0x668] sm:$0xff] %v3786_v46 }
 0x355 PF: > { %p9_p8 = scmp.ge.s32.totalorder %s5141_s13, 4   ;;  %s6282_s9 = smov %s5095_s10 }
 0x356   : > { %s6283_s10 = smov %s5149_s16  ;;  %s6284_s11 = smov %s5141_s13 }
 0x357   :  { %11 = sbr.rel (!%p9_p8) target bundleno = 2 (0x2), region = 99 }

</bundles_post_ra>
